<compile_context>
chip_gen: v7x
topology: tpu7x:2x2x1
jax: 0.10.0
libtpu: 0.0.40
codegen_flags: <defaults>
</compile_context>

<pallas_src>
from functools import partial

import jax
import jax.numpy as jnp
from jax import lax
from jax.experimental import pallas as pl
from jax.experimental.pallas import tpu as pltpu

LANES = 128


def _dp_kernel(x_ref, dw_ref, s1_ref, b1_ref, pw_ref, s2_ref, b2_ref, o_ref,
               *, H, W, K, neg_slope):
    """One batch element per grid step.

    x_ref : (1, H, W, Cp)   un-padded NHWC input tile (Cp = channels padded to 128)
    dw_ref: (K, K, Cp)      depthwise conv taps (padded lanes are zero)
    s1_ref, b1_ref: (1, Cp) folded BN1 scale / bias (padded lanes zero)
    pw_ref: (Cp, Cp)        pointwise weights, (Cin, Cout); padded rows/cols zero
    s2_ref, b2_ref: (1, Cp) folded BN2 scale / bias
    o_ref : (1, H, W, Cp)
    """
    pad = (K - 1) // 2
    Cp = x_ref.shape[-1]
    HW = H * W

    x = x_ref[0]                                       # (H, W, Cp), input dtype

    # In-kernel zero halo along H (axis 0 = untiled/major dim, cheap concat).
    # pad+1 zero rows per side so every flattened tap window below is in bounds.
    zrow = jnp.zeros((pad + 1, W, Cp), x.dtype)
    xh = jnp.concatenate([zrow, x, zrow], axis=0)      # (H + 2*pad + 2, W, Cp)
    xf = xh.reshape((H + 2 * pad + 2) * W, Cp)         # rows merged into sublanes

    # Column index (i mod W) for masking out-of-image columns of horizontally
    # shifted taps (the vertical direction is handled by the zero rows above).
    w_idx = lax.broadcasted_iota(jnp.int32, (HW, 1), 0) % W

    dw = dw_ref[...]                                   # (K, K, Cp)
    zero = jnp.zeros((), x.dtype)

    # Depthwise KxK conv, stride 1, unrolled taps; f32 accumulation.
    acc = jnp.zeros((HW, Cp), jnp.float32)
    for kh in range(K):
        for kw in range(K):
            dwv = kw - pad
            start = (kh + 1) * W + dwv                 # flat offset of this window
            win = xf[start:start + HW, :]              # (HW, Cp)
            if dwv != 0:
                valid = (w_idx + dwv >= 0) & (w_idx + dwv < W)
                win = jnp.where(valid, win, zero)
            tap = dw[kh:kh + 1, kw:kw + 1, :].reshape(1, Cp)
            acc = acc + win * tap                      # promotes to f32

    # BN1 (inference-folded) + leaky_relu
    y = acc * s1_ref[...] + b1_ref[...]
    y = jnp.where(y > 0, y, neg_slope * y)

    # Pointwise 1x1 conv: lane-dense (HW, Cp) @ (Cp, Cp) on the MXU, f32 accum.
    z = jnp.dot(y.astype(pw_ref.dtype), pw_ref[...],
                preferred_element_type=jnp.float32)

    # BN2 (inference-folded) + leaky_relu
    z = z * s2_ref[...] + b2_ref[...]
    z = jnp.where(z > 0, z, neg_slope * z)

    o_ref[0] = z.reshape(H, W, Cp).astype(o_ref.dtype)


@partial(jax.jit, static_argnames=("kernel_size", "neg_slope"))
def dp_module_pallas(x_nchw, params, *, kernel_size=3, neg_slope=0.01):
    N, C, H, W = x_nchw.shape
    K = kernel_size
    Cp = ((C + LANES - 1) // LANES) * LANES            # lane-dense channel count
    cpad = (0, Cp - C)

    # NCHW -> NHWC + channel zero-pad (single fused XLA copy under jit).
    x = jnp.transpose(x_nchw, (0, 2, 3, 1))
    x = jnp.pad(x, ((0, 0), (0, 0), (0, 0), cpad))

    # Weights / folded BN params, channel-padded with zeros so padded lanes stay
    # zero through both BN+activation stages.
    dw_w = jnp.pad(jnp.transpose(params["dw_oikk"][:, 0], (1, 2, 0)),  # (K, K, Cp)
                   ((0, 0), (0, 0), cpad))
    pw_w = jnp.pad(jnp.transpose(params["pw_oi"], (1, 0)), (cpad, cpad))  # (Cin_p, Cout_p)
    s1 = jnp.pad(params["s1"], cpad).reshape(1, Cp)
    b1 = jnp.pad(params["b1"], cpad).reshape(1, Cp)
    s2 = jnp.pad(params["s2"], cpad).reshape(1, Cp)
    b2 = jnp.pad(params["b2"], cpad).reshape(1, Cp)

    itemsize = x.dtype.itemsize
    cost = pl.CostEstimate(
        flops=int(N * H * W * (2 * Cp * Cp + 2 * K * K * Cp + 8 * Cp)),
        transcendentals=0,
        bytes_accessed=int((x.size + N * H * W * Cp) * itemsize
                           + (dw_w.size + pw_w.size + 4 * Cp) * 4),
    )

    out = pl.pallas_call(
        partial(_dp_kernel, H=H, W=W, K=K, neg_slope=neg_slope),
        out_shape=jax.ShapeDtypeStruct((N, H, W, Cp), x.dtype),
        grid_spec=pltpu.PrefetchScalarGridSpec(
            num_scalar_prefetch=0,
            grid=(N,),
            in_specs=[
                pl.BlockSpec((1, H, W, Cp), lambda n: (n, 0, 0, 0)),
                pl.BlockSpec((K, K, Cp), lambda n: (0, 0, 0)),
                pl.BlockSpec((1, Cp), lambda n: (0, 0)),
                pl.BlockSpec((1, Cp), lambda n: (0, 0)),
                pl.BlockSpec((Cp, Cp), lambda n: (0, 0)),
                pl.BlockSpec((1, Cp), lambda n: (0, 0)),
                pl.BlockSpec((1, Cp), lambda n: (0, 0)),
            ],
            out_specs=pl.BlockSpec((1, H, W, Cp), lambda n: (n, 0, 0, 0)),
        ),
        compiler_params=pltpu.CompilerParams(
            dimension_semantics=("parallel",),
            vmem_limit_bytes=64 * 1024 * 1024),
        cost_estimate=cost,
    )(x, dw_w, s1, b1, pw_w, s2, b2)

    # Drop padded lanes, back to NCHW.
    return jnp.transpose(out[..., :C], (0, 3, 1, 2))


def init_params(key, channels, kernel_size=3, eps=1e-5):
    """Deterministic parameter init mimicking the module's __init__ shapes."""
    C, K = channels, kernel_size
    k_dw, k_pw, _ = jax.random.split(key, 3)

    # kaiming_uniform (a=0, fan_in): bound = sqrt(6 / fan_in)
    dw_bound = (6.0 / (1 * K * K)) ** 0.5
    dw_oikk = jax.random.uniform(k_dw, (C, 1, K, K), jnp.float32, -dw_bound, dw_bound)

    pw_bound = (6.0 / C) ** 0.5
    pw_oi = jax.random.uniform(k_pw, (C, C), jnp.float32, -pw_bound, pw_bound)

    # BatchNorm params (deterministic, non-trivial), inference-folded.
    idx = jnp.arange(C, dtype=jnp.float32)
    gamma1, beta1 = 1.0 + 0.01 * idx, 0.02 * idx
    mean1, var1 = 0.05 * idx, 1.0 + 0.03 * idx
    gamma2, beta2 = 1.0 - 0.005 * idx, -0.01 * idx
    mean2, var2 = -0.02 * idx, 1.0 + 0.02 * idx

    s1 = gamma1 / jnp.sqrt(var1 + eps)
    b1 = beta1 - mean1 * s1
    s2 = gamma2 / jnp.sqrt(var2 + eps)
    b2 = beta2 - mean2 * s2

    return {"dw_oikk": dw_oikk, "pw_oi": pw_oi,
            "s1": s1, "b1": b1, "s2": s2, "b2": b2}


def dp_module_reference(x_nchw, params, *, kernel_size=3, neg_slope=0.01):
    """Pure-JAX reference matching PyTorch semantics (NCHW, inference BN)."""
    C = x_nchw.shape[1]
    pad = (kernel_size - 1) // 2
    dn = lax.conv_dimension_numbers(x_nchw.shape, params["dw_oikk"].shape,
                                    ("NCHW", "OIHW", "NCHW"))
    y = lax.conv_general_dilated(x_nchw, params["dw_oikk"], (1, 1),
                                 [(pad, pad), (pad, pad)],
                                 dimension_numbers=dn, feature_group_count=C)
    y = y * params["s1"].reshape(1, C, 1, 1) + params["b1"].reshape(1, C, 1, 1)
    y = jax.nn.leaky_relu(y, neg_slope)

    pw_oikk = params["pw_oi"].reshape(C, C, 1, 1)
    z = lax.conv_general_dilated(y, pw_oikk, (1, 1), [(0, 0), (0, 0)],
                                 dimension_numbers=dn)
    z = z * params["s2"].reshape(1, C, 1, 1) + params["b2"].reshape(1, C, 1, 1)
    z = jax.nn.leaky_relu(z, neg_slope)
    return z


if __name__ == "__main__":
    key = jax.random.PRNGKey(0)
    k_x, k_p = jax.random.split(key)

    N, C, H, W = 2, 16, 16, 16          # small demo shapes; module default is C=96
    x = jax.random.normal(k_x, (N, C, H, W), jnp.float32)
    params = init_params(k_p, C, kernel_size=3)

    out = dp_module_pallas(x, params, kernel_size=3)
    out = jax.block_until_ready(out)

    ref = dp_module_reference(x, params, kernel_size=3)
    assert out.shape == ref.shape == (N, C, H, W)
    err = float(jnp.max(jnp.abs(out - ref)))
    assert err < 1e-3, f"max abs err {err}"

    print("KERNEL_OK")
</pallas_src>

<mosaic_0001>
module attributes {stable_mosaic.version = 11 : i64} {
  func.func @_dp_kernel(%arg0: i32, %arg1: memref<1x16x16x128xf32, #tpu.memory_space<vmem>>, %arg2: memref<3x3x128xf32, #tpu.memory_space<vmem>>, %arg3: memref<1x128xf32, #tpu.memory_space<vmem>>, %arg4: memref<1x128xf32, #tpu.memory_space<vmem>>, %arg5: memref<128x128xf32, #tpu.memory_space<vmem>>, %arg6: memref<1x128xf32, #tpu.memory_space<vmem>>, %arg7: memref<1x128xf32, #tpu.memory_space<vmem>>, %arg8: memref<1x16x16x128xf32, #tpu.memory_space<vmem>>) attributes {dimension_semantics = [#tpu.dimension_semantics<parallel>], iteration_bounds = array<i64: 2>, scalar_prefetch = 0 : i64, scratch_operands = 0 : i64, tpu.core_type = #tpu.core_type<tc>, window_params = [{transform_indices = @transform_0, window_bounds = array<i64: 1, 16, 16, 128>}, {pipeline_mode = #tpu.pipeline_mode<synchronous>, transform_indices = @transform_1, window_bounds = array<i64: 3, 3, 128>}, {pipeline_mode = #tpu.pipeline_mode<synchronous>, transform_indices = @transform_2, window_bounds = array<i64: 1, 128>}, {pipeline_mode = #tpu.pipeline_mode<synchronous>, transform_indices = @transform_3, window_bounds = array<i64: 1, 128>}, {pipeline_mode = #tpu.pipeline_mode<synchronous>, transform_indices = @transform_4, window_bounds = array<i64: 128, 128>}, {pipeline_mode = #tpu.pipeline_mode<synchronous>, transform_indices = @transform_5, window_bounds = array<i64: 1, 128>}, {pipeline_mode = #tpu.pipeline_mode<synchronous>, transform_indices = @transform_6, window_bounds = array<i64: 1, 128>}, {transform_indices = @transform_7, window_bounds = array<i64: 1, 16, 16, 128>}]} {
    %c0 = arith.constant 0 : index
    %c0_0 = arith.constant 0 : index
    %c0_1 = arith.constant 0 : index
    %c0_2 = arith.constant 0 : index
    %0 = vector.load %arg1[%c0, %c0_0, %c0_1, %c0_2] : memref<1x16x16x128xf32, #tpu.memory_space<vmem>>, vector<1x16x16x128xf32>
    %1 = vector.shape_cast %0 : vector<1x16x16x128xf32> to vector<16x16x128xf32>
    %cst = arith.constant 0.000000e+00 : f32
    %2 = vector.broadcast %cst : f32 to vector<2x16x128xf32>
    %3 = tpu.concatenate %2, %1, %2 in 0 : vector<2x16x128xf32>, vector<16x16x128xf32>, vector<2x16x128xf32> -> vector<20x16x128xf32>
    %4 = vector.shape_cast %3 : vector<20x16x128xf32> to vector<320x128xf32>
    %5 = tpu.iota {dimensions = array<i32: 0>} : vector<256x1xi32>
    %c16_i32 = arith.constant 16 : i32
    %c0_i32 = arith.constant 0 : i32
    %6 = arith.cmpi eq, %c16_i32, %c0_i32 : i32
    %c1_i32 = arith.constant 1 : i32
    %7 = arith.select %6, %c1_i32, %c16_i32 : i32
    %8 = vector.broadcast %7 : i32 to vector<256x1xi32>
    %9 = arith.remsi %5, %8 : vector<256x1xi32>
    %c0_i32_3 = arith.constant 0 : i32
    %10 = vector.broadcast %c0_i32_3 : i32 to vector<256x1xi32>
    %11 = arith.cmpi ne, %9, %10 : vector<256x1xi32>
    %c0_i32_4 = arith.constant 0 : i32
    %12 = vector.broadcast %c0_i32_4 : i32 to vector<256x1xi32>
    %13 = arith.cmpi slt, %9, %12 : vector<256x1xi32>
    %c0_i32_5 = arith.constant 0 : i32
    %14 = arith.cmpi slt, %7, %c0_i32_5 : i32
    %15 = vector.broadcast %14 : i1 to vector<256x1xi1>
    %16 = vector.broadcast %15 : vector<256x1xi1> to vector<256x1xi1>
    %17 = arith.xori %13, %16 : vector<256x1xi1>
    %18 = arith.andi %17, %11 : vector<256x1xi1>
    %19 = vector.broadcast %7 : i32 to vector<256x1xi32>
    %20 = arith.addi %9, %19 : vector<256x1xi32>
    %21 = arith.select %18, %20, %9 : vector<256x1xi1>, vector<256x1xi32>
    %c0_6 = arith.constant 0 : index
    %c0_7 = arith.constant 0 : index
    %c0_8 = arith.constant 0 : index
    %22 = vector.load %arg2[%c0_6, %c0_7, %c0_8] : memref<3x3x128xf32, #tpu.memory_space<vmem>>, vector<3x3x128xf32>
    %cst_9 = arith.constant 0.000000e+00 : f32
    %23 = vector.broadcast %cst_9 : f32 to vector<256x128xf32>
    %24 = vector.extract_strided_slice %4 {offsets = [15, 0], sizes = [256, 128], strides = [1, 1]} : vector<320x128xf32> to vector<256x128xf32>
    %c-1_i32 = arith.constant -1 : i32
    %25 = vector.broadcast %c-1_i32 : i32 to vector<256x1xi32>
    %26 = arith.addi %21, %25 : vector<256x1xi32>
    %c0_i32_10 = arith.constant 0 : i32
    %27 = vector.broadcast %c0_i32_10 : i32 to vector<256x1xi32>
    %28 = arith.cmpi sge, %26, %27 : vector<256x1xi32>
    %c-1_i32_11 = arith.constant -1 : i32
    %29 = vector.broadcast %c-1_i32_11 : i32 to vector<256x1xi32>
    %30 = arith.addi %21, %29 : vector<256x1xi32>
    %c16_i32_12 = arith.constant 16 : i32
    %31 = vector.broadcast %c16_i32_12 : i32 to vector<256x1xi32>
    %32 = arith.cmpi slt, %30, %31 : vector<256x1xi32>
    %33 = arith.andi %28, %32 : vector<256x1xi1>
    %cst_13 = arith.constant 0.000000e+00 : f32
    %34 = vector.shape_cast %33 : vector<256x1xi1> to vector<256x1xi1>
    %35 = vector.broadcast %34 : vector<256x1xi1> to vector<256x128xi1>
    %36 = vector.broadcast %cst_13 : f32 to vector<256x128xf32>
    %37 = arith.select %35, %24, %36 : vector<256x128xi1>, vector<256x128xf32>
    %38 = vector.extract_strided_slice %22 {offsets = [0, 0, 0], sizes = [1, 1, 128], strides = [1, 1, 1]} : vector<3x3x128xf32> to vector<1x1x128xf32>
    %39 = vector.shape_cast %38 : vector<1x1x128xf32> to vector<1x128xf32>
    %40 = vector.broadcast %39 : vector<1x128xf32> to vector<256x128xf32>
    %41 = arith.mulf %37, %40 : vector<256x128xf32>
    %42 = arith.addf %23, %41 : vector<256x128xf32>
    %43 = vector.extract_strided_slice %4 {offsets = [16, 0], sizes = [256, 128], strides = [1, 1]} : vector<320x128xf32> to vector<256x128xf32>
    %44 = vector.extract_strided_slice %22 {offsets = [0, 1, 0], sizes = [1, 1, 128], strides = [1, 1, 1]} : vector<3x3x128xf32> to vector<1x1x128xf32>
    %45 = vector.shape_cast %44 : vector<1x1x128xf32> to vector<1x128xf32>
    %46 = vector.broadcast %45 : vector<1x128xf32> to vector<256x128xf32>
    %47 = arith.mulf %43, %46 : vector<256x128xf32>
    %48 = arith.addf %42, %47 : vector<256x128xf32>
    %49 = vector.extract_strided_slice %4 {offsets = [17, 0], sizes = [256, 128], strides = [1, 1]} : vector<320x128xf32> to vector<256x128xf32>
    %c1_i32_14 = arith.constant 1 : i32
    %50 = vector.broadcast %c1_i32_14 : i32 to vector<256x1xi32>
    %51 = arith.addi %21, %50 : vector<256x1xi32>
    %c0_i32_15 = arith.constant 0 : i32
    %52 = vector.broadcast %c0_i32_15 : i32 to vector<256x1xi32>
    %53 = arith.cmpi sge, %51, %52 : vector<256x1xi32>
    %c1_i32_16 = arith.constant 1 : i32
    %54 = vector.broadcast %c1_i32_16 : i32 to vector<256x1xi32>
    %55 = arith.addi %21, %54 : vector<256x1xi32>
    %c16_i32_17 = arith.constant 16 : i32
    %56 = vector.broadcast %c16_i32_17 : i32 to vector<256x1xi32>
    %57 = arith.cmpi slt, %55, %56 : vector<256x1xi32>
    %58 = arith.andi %53, %57 : vector<256x1xi1>
    %cst_18 = arith.constant 0.000000e+00 : f32
    %59 = vector.shape_cast %58 : vector<256x1xi1> to vector<256x1xi1>
    %60 = vector.broadcast %59 : vector<256x1xi1> to vector<256x128xi1>
    %61 = vector.broadcast %cst_18 : f32 to vector<256x128xf32>
    %62 = arith.select %60, %49, %61 : vector<256x128xi1>, vector<256x128xf32>
    %63 = vector.extract_strided_slice %22 {offsets = [0, 2, 0], sizes = [1, 1, 128], strides = [1, 1, 1]} : vector<3x3x128xf32> to vector<1x1x128xf32>
    %64 = vector.shape_cast %63 : vector<1x1x128xf32> to vector<1x128xf32>
    %65 = vector.broadcast %64 : vector<1x128xf32> to vector<256x128xf32>
    %66 = arith.mulf %62, %65 : vector<256x128xf32>
    %67 = arith.addf %48, %66 : vector<256x128xf32>
    %68 = vector.extract_strided_slice %4 {offsets = [31, 0], sizes = [256, 128], strides = [1, 1]} : vector<320x128xf32> to vector<256x128xf32>
    %c-1_i32_19 = arith.constant -1 : i32
    %69 = vector.broadcast %c-1_i32_19 : i32 to vector<256x1xi32>
    %70 = arith.addi %21, %69 : vector<256x1xi32>
    %c0_i32_20 = arith.constant 0 : i32
    %71 = vector.broadcast %c0_i32_20 : i32 to vector<256x1xi32>
    %72 = arith.cmpi sge, %70, %71 : vector<256x1xi32>
    %c-1_i32_21 = arith.constant -1 : i32
    %73 = vector.broadcast %c-1_i32_21 : i32 to vector<256x1xi32>
    %74 = arith.addi %21, %73 : vector<256x1xi32>
    %c16_i32_22 = arith.constant 16 : i32
    %75 = vector.broadcast %c16_i32_22 : i32 to vector<256x1xi32>
    %76 = arith.cmpi slt, %74, %75 : vector<256x1xi32>
    %77 = arith.andi %72, %76 : vector<256x1xi1>
    %cst_23 = arith.constant 0.000000e+00 : f32
    %78 = vector.shape_cast %77 : vector<256x1xi1> to vector<256x1xi1>
    %79 = vector.broadcast %78 : vector<256x1xi1> to vector<256x128xi1>
    %80 = vector.broadcast %cst_23 : f32 to vector<256x128xf32>
    %81 = arith.select %79, %68, %80 : vector<256x128xi1>, vector<256x128xf32>
    %82 = vector.extract_strided_slice %22 {offsets = [1, 0, 0], sizes = [1, 1, 128], strides = [1, 1, 1]} : vector<3x3x128xf32> to vector<1x1x128xf32>
    %83 = vector.shape_cast %82 : vector<1x1x128xf32> to vector<1x128xf32>
    %84 = vector.broadcast %83 : vector<1x128xf32> to vector<256x128xf32>
    %85 = arith.mulf %81, %84 : vector<256x128xf32>
    %86 = arith.addf %67, %85 : vector<256x128xf32>
    %87 = vector.extract_strided_slice %4 {offsets = [32, 0], sizes = [256, 128], strides = [1, 1]} : vector<320x128xf32> to vector<256x128xf32>
    %88 = vector.extract_strided_slice %22 {offsets = [1, 1, 0], sizes = [1, 1, 128], strides = [1, 1, 1]} : vector<3x3x128xf32> to vector<1x1x128xf32>
    %89 = vector.shape_cast %88 : vector<1x1x128xf32> to vector<1x128xf32>
    %90 = vector.broadcast %89 : vector<1x128xf32> to vector<256x128xf32>
    %91 = arith.mulf %87, %90 : vector<256x128xf32>
    %92 = arith.addf %86, %91 : vector<256x128xf32>
    %93 = vector.extract_strided_slice %4 {offsets = [33, 0], sizes = [256, 128], strides = [1, 1]} : vector<320x128xf32> to vector<256x128xf32>
    %c1_i32_24 = arith.constant 1 : i32
    %94 = vector.broadcast %c1_i32_24 : i32 to vector<256x1xi32>
    %95 = arith.addi %21, %94 : vector<256x1xi32>
    %c0_i32_25 = arith.constant 0 : i32
    %96 = vector.broadcast %c0_i32_25 : i32 to vector<256x1xi32>
    %97 = arith.cmpi sge, %95, %96 : vector<256x1xi32>
    %c1_i32_26 = arith.constant 1 : i32
    %98 = vector.broadcast %c1_i32_26 : i32 to vector<256x1xi32>
    %99 = arith.addi %21, %98 : vector<256x1xi32>
    %c16_i32_27 = arith.constant 16 : i32
    %100 = vector.broadcast %c16_i32_27 : i32 to vector<256x1xi32>
    %101 = arith.cmpi slt, %99, %100 : vector<256x1xi32>
    %102 = arith.andi %97, %101 : vector<256x1xi1>
    %cst_28 = arith.constant 0.000000e+00 : f32
    %103 = vector.shape_cast %102 : vector<256x1xi1> to vector<256x1xi1>
    %104 = vector.broadcast %103 : vector<256x1xi1> to vector<256x128xi1>
    %105 = vector.broadcast %cst_28 : f32 to vector<256x128xf32>
    %106 = arith.select %104, %93, %105 : vector<256x128xi1>, vector<256x128xf32>
    %107 = vector.extract_strided_slice %22 {offsets = [1, 2, 0], sizes = [1, 1, 128], strides = [1, 1, 1]} : vector<3x3x128xf32> to vector<1x1x128xf32>
    %108 = vector.shape_cast %107 : vector<1x1x128xf32> to vector<1x128xf32>
    %109 = vector.broadcast %108 : vector<1x128xf32> to vector<256x128xf32>
    %110 = arith.mulf %106, %109 : vector<256x128xf32>
    %111 = arith.addf %92, %110 : vector<256x128xf32>
    %112 = vector.extract_strided_slice %4 {offsets = [47, 0], sizes = [256, 128], strides = [1, 1]} : vector<320x128xf32> to vector<256x128xf32>
    %c-1_i32_29 = arith.constant -1 : i32
    %113 = vector.broadcast %c-1_i32_29 : i32 to vector<256x1xi32>
    %114 = arith.addi %21, %113 : vector<256x1xi32>
    %c0_i32_30 = arith.constant 0 : i32
    %115 = vector.broadcast %c0_i32_30 : i32 to vector<256x1xi32>
    %116 = arith.cmpi sge, %114, %115 : vector<256x1xi32>
    %c-1_i32_31 = arith.constant -1 : i32
    %117 = vector.broadcast %c-1_i32_31 : i32 to vector<256x1xi32>
    %118 = arith.addi %21, %117 : vector<256x1xi32>
    %c16_i32_32 = arith.constant 16 : i32
    %119 = vector.broadcast %c16_i32_32 : i32 to vector<256x1xi32>
    %120 = arith.cmpi slt, %118, %119 : vector<256x1xi32>
    %121 = arith.andi %116, %120 : vector<256x1xi1>
    %cst_33 = arith.constant 0.000000e+00 : f32
    %122 = vector.shape_cast %121 : vector<256x1xi1> to vector<256x1xi1>
    %123 = vector.broadcast %122 : vector<256x1xi1> to vector<256x128xi1>
    %124 = vector.broadcast %cst_33 : f32 to vector<256x128xf32>
    %125 = arith.select %123, %112, %124 : vector<256x128xi1>, vector<256x128xf32>
    %126 = vector.extract_strided_slice %22 {offsets = [2, 0, 0], sizes = [1, 1, 128], strides = [1, 1, 1]} : vector<3x3x128xf32> to vector<1x1x128xf32>
    %127 = vector.shape_cast %126 : vector<1x1x128xf32> to vector<1x128xf32>
    %128 = vector.broadcast %127 : vector<1x128xf32> to vector<256x128xf32>
    %129 = arith.mulf %125, %128 : vector<256x128xf32>
    %130 = arith.addf %111, %129 : vector<256x128xf32>
    %131 = vector.extract_strided_slice %4 {offsets = [48, 0], sizes = [256, 128], strides = [1, 1]} : vector<320x128xf32> to vector<256x128xf32>
    %132 = vector.extract_strided_slice %22 {offsets = [2, 1, 0], sizes = [1, 1, 128], strides = [1, 1, 1]} : vector<3x3x128xf32> to vector<1x1x128xf32>
    %133 = vector.shape_cast %132 : vector<1x1x128xf32> to vector<1x128xf32>
    %134 = vector.broadcast %133 : vector<1x128xf32> to vector<256x128xf32>
    %135 = arith.mulf %131, %134 : vector<256x128xf32>
    %136 = arith.addf %130, %135 : vector<256x128xf32>
    %137 = vector.extract_strided_slice %4 {offsets = [49, 0], sizes = [256, 128], strides = [1, 1]} : vector<320x128xf32> to vector<256x128xf32>
    %c1_i32_34 = arith.constant 1 : i32
    %138 = vector.broadcast %c1_i32_34 : i32 to vector<256x1xi32>
    %139 = arith.addi %21, %138 : vector<256x1xi32>
    %c0_i32_35 = arith.constant 0 : i32
    %140 = vector.broadcast %c0_i32_35 : i32 to vector<256x1xi32>
    %141 = arith.cmpi sge, %139, %140 : vector<256x1xi32>
    %c1_i32_36 = arith.constant 1 : i32
    %142 = vector.broadcast %c1_i32_36 : i32 to vector<256x1xi32>
    %143 = arith.addi %21, %142 : vector<256x1xi32>
    %c16_i32_37 = arith.constant 16 : i32
    %144 = vector.broadcast %c16_i32_37 : i32 to vector<256x1xi32>
    %145 = arith.cmpi slt, %143, %144 : vector<256x1xi32>
    %146 = arith.andi %141, %145 : vector<256x1xi1>
    %cst_38 = arith.constant 0.000000e+00 : f32
    %147 = vector.shape_cast %146 : vector<256x1xi1> to vector<256x1xi1>
    %148 = vector.broadcast %147 : vector<256x1xi1> to vector<256x128xi1>
    %149 = vector.broadcast %cst_38 : f32 to vector<256x128xf32>
    %150 = arith.select %148, %137, %149 : vector<256x128xi1>, vector<256x128xf32>
    %151 = vector.extract_strided_slice %22 {offsets = [2, 2, 0], sizes = [1, 1, 128], strides = [1, 1, 1]} : vector<3x3x128xf32> to vector<1x1x128xf32>
    %152 = vector.shape_cast %151 : vector<1x1x128xf32> to vector<1x128xf32>
    %153 = vector.broadcast %152 : vector<1x128xf32> to vector<256x128xf32>
    %154 = arith.mulf %150, %153 : vector<256x128xf32>
    %155 = arith.addf %136, %154 : vector<256x128xf32>
    %c0_39 = arith.constant 0 : index
    %c0_40 = arith.constant 0 : index
    %156 = vector.load %arg3[%c0_39, %c0_40] : memref<1x128xf32, #tpu.memory_space<vmem>>, vector<1x128xf32>
    %157 = vector.broadcast %156 : vector<1x128xf32> to vector<256x128xf32>
    %158 = arith.mulf %155, %157 : vector<256x128xf32>
    %c0_41 = arith.constant 0 : index
    %c0_42 = arith.constant 0 : index
    %159 = vector.load %arg4[%c0_41, %c0_42] : memref<1x128xf32, #tpu.memory_space<vmem>>, vector<1x128xf32>
    %160 = vector.broadcast %159 : vector<1x128xf32> to vector<256x128xf32>
    %161 = arith.addf %158, %160 : vector<256x128xf32>
    %cst_43 = arith.constant 0.000000e+00 : f32
    %162 = vector.broadcast %cst_43 : f32 to vector<256x128xf32>
    %163 = arith.cmpf ogt, %161, %162 : vector<256x128xf32>
    %cst_44 = arith.constant 0.00999999977 : f32
    %164 = vector.broadcast %cst_44 : f32 to vector<256x128xf32>
    %165 = arith.mulf %164, %161 : vector<256x128xf32>
    %166 = arith.select %163, %161, %165 : vector<256x128xi1>, vector<256x128xf32>
    %c0_45 = arith.constant 0 : index
    %c0_46 = arith.constant 0 : index
    %167 = vector.load %arg5[%c0_45, %c0_46] : memref<128x128xf32, #tpu.memory_space<vmem>>, vector<128x128xf32>
    %cst_47 = arith.constant dense<0.000000e+00> : vector<256x128xf32>
    %168 = tpu.matmul %166, %167, %cst_47 {dimension_numbers = #tpu.dot_dimension_numbers<[1], [0], [0], [1], [0, 0, 1, 1], [], []>} : vector<256x128xf32>, vector<128x128xf32>, vector<256x128xf32> -> vector<256x128xf32>
    %c0_48 = arith.constant 0 : index
    %c0_49 = arith.constant 0 : index
    %169 = vector.load %arg6[%c0_48, %c0_49] : memref<1x128xf32, #tpu.memory_space<vmem>>, vector<1x128xf32>
    %170 = vector.broadcast %169 : vector<1x128xf32> to vector<256x128xf32>
    %171 = arith.mulf %168, %170 : vector<256x128xf32>
    %c0_50 = arith.constant 0 : index
    %c0_51 = arith.constant 0 : index
    %172 = vector.load %arg7[%c0_50, %c0_51] : memref<1x128xf32, #tpu.memory_space<vmem>>, vector<1x128xf32>
    %173 = vector.broadcast %172 : vector<1x128xf32> to vector<256x128xf32>
    %174 = arith.addf %171, %173 : vector<256x128xf32>
    %cst_52 = arith.constant 0.000000e+00 : f32
    %175 = vector.broadcast %cst_52 : f32 to vector<256x128xf32>
    %176 = arith.cmpf ogt, %174, %175 : vector<256x128xf32>
    %cst_53 = arith.constant 0.00999999977 : f32
    %177 = vector.broadcast %cst_53 : f32 to vector<256x128xf32>
    %178 = arith.mulf %177, %174 : vector<256x128xf32>
    %179 = arith.select %176, %174, %178 : vector<256x128xi1>, vector<256x128xf32>
    %180 = vector.shape_cast %179 : vector<256x128xf32> to vector<16x16x128xf32>
    %c0_54 = arith.constant 0 : index
    %c0_55 = arith.constant 0 : index
    %c0_56 = arith.constant 0 : index
    %c0_57 = arith.constant 0 : index
    %181 = vector.load %arg8[%c0_54, %c0_55, %c0_56, %c0_57] : memref<1x16x16x128xf32, #tpu.memory_space<vmem>>, vector<1x16x16x128xf32>
    %182 = vector.shape_cast %181 : vector<1x16x16x128xf32> to vector<16x16x128xf32>
    %183 = vector.shape_cast %180 : vector<16x16x128xf32> to vector<1x16x16x128xf32>
    tpu.vector_store %arg8[%c0_54, %c0_55, %c0_56, %c0_57], %183 {strides = array<i32>} : memref<1x16x16x128xf32, #tpu.memory_space<vmem>>, vector<1x16x16x128xf32>,
    return
  }
  func.func @transform_0(%arg0: i32) -> (i32, i32, i32, i32) {
    %c0_i32 = arith.constant 0 : i32
    %c0_i32_0 = arith.constant 0 : i32
    %c0_i32_1 = arith.constant 0 : i32
    %c0_i32_2 = arith.constant 0 : i32
    return %arg0, %c0_i32, %c0_i32_0, %c0_i32_1 : i32, i32, i32, i32
  }
  func.func @transform_1(%arg0: i32) -> (i32, i32, i32) {
    %c0_i32 = arith.constant 0 : i32
    %c0_i32_0 = arith.constant 0 : i32
    %c0_i32_1 = arith.constant 0 : i32
    %c0_i32_2 = arith.constant 0 : i32
    return %c0_i32, %c0_i32_0, %c0_i32_1 : i32, i32, i32
  }
  func.func @transform_2(%arg0: i32) -> (i32, i32) {
    %c0_i32 = arith.constant 0 : i32
    %c0_i32_0 = arith.constant 0 : i32
    %c0_i32_1 = arith.constant 0 : i32
    return %c0_i32, %c0_i32_0 : i32, i32
  }
  func.func @transform_3(%arg0: i32) -> (i32, i32) {
    %c0_i32 = arith.constant 0 : i32
    %c0_i32_0 = arith.constant 0 : i32
    %c0_i32_1 = arith.constant 0 : i32
    return %c0_i32, %c0_i32_0 : i32, i32
  }
  func.func @transform_4(%arg0: i32) -> (i32, i32) {
    %c0_i32 = arith.constant 0 : i32
    %c0_i32_0 = arith.constant 0 : i32
    %c0_i32_1 = arith.constant 0 : i32
    return %c0_i32, %c0_i32_0 : i32, i32
  }
  func.func @transform_5(%arg0: i32) -> (i32, i32) {
    %c0_i32 = arith.constant 0 : i32
    %c0_i32_0 = arith.constant 0 : i32
    %c0_i32_1 = arith.constant 0 : i32
    return %c0_i32, %c0_i32_0 : i32, i32
  }
  func.func @transform_6(%arg0: i32) -> (i32, i32) {
    %c0_i32 = arith.constant 0 : i32
    %c0_i32_0 = arith.constant 0 : i32
    %c0_i32_1 = arith.constant 0 : i32
    return %c0_i32, %c0_i32_0 : i32, i32
  }
  func.func @transform_7(%arg0: i32) -> (i32, i32, i32, i32) {
    %c0_i32 = arith.constant 0 : i32
    %c0_i32_0 = arith.constant 0 : i32
    %c0_i32_1 = arith.constant 0 : i32
    %c0_i32_2 = arith.constant 0 : i32
    return %arg0, %c0_i32, %c0_i32_0, %c0_i32_1 : i32, i32, i32, i32
  }
}

</mosaic_0001>

<bundles_post_ra>
// kernel: dp_module_pallas.1
= control target key start
LH: loop header
LB: loop body
LE: loop exit
PB: predicated region body
PF: predicated region fallthrough
CT: control target
= control target key end

     0   :  { %12 = vsyncpa [#allocation3], 0  ;;  %s5694_s0 = inlined_call_operand.hbm [shape: f32[2,16,16,128], index: 0, kind: input, shape index: {}]   ;;  %s5695_s1 = inlined_call_operand.hbm [shape: f32[3,3,128], index: 1, kind: input, shape index: {}]   ;;  %s5696_s2 = inlined_call_operand.hbm [shape: f32[1,128], index: 2, kind: input, shape index: {}]   ;;  %s5697_s3 = inlined_call_operand.hbm [shape: f32[1,128], index: 3, kind: input, shape index: {}]   ;;  %s5698_s4 = inlined_call_operand.hbm [shape: f32[128,128], index: 4, kind: input, shape index: {}]   ;;  %s5699_s5 = inlined_call_operand.hbm [shape: f32[1,128], index: 5, kind: input, shape index: {}]   ;;  %s5700_s6 = inlined_call_operand.hbm [shape: f32[1,128], index: 6, kind: input, shape index: {}]   ;;  %s5701_s7 = inlined_call_operand.hbm [shape: f32[2,16,16,128], index: 7, kind: output, shape index: {}]  }
   0x1   :  { %14 = vsyncpa [#allocation3 + $0x1], 0 }
   0x2   :  { %15 = vsyncpa [#allocation6], 0 }
   0x3   :  { %16 = vsyncpa [#allocation9], 0 }
   0x4   :  { %17 = vsyncpa [#allocation12], 0 }
   0x5   :  { %18 = vsyncpa [#allocation4], 0 }
   0x6   :  { %20 = vsyncpa [#allocation4 + $0x1], 0  ;;  %s3678_s24 = smov 0   ;;  %s3680_s25 = smov 0  }
   0x7   :  { %s3682_s26 = smov 0   ;;  %s3684_s27 = smov 0  }
   0x8 LB: > { %s3623_s28 = smov [#allocation5]   ;;  %s3699_s30 = sadd.s32 4294967295, %s3621_s27   ;;  %s3621_s27 = sphi %s3684_s27, %s5895_s27   ;;  %s3617_s26 = sphi %s3682_s26, %s5894_s26   ;;  %s3613_s25 = sphi %s3680_s25, %s5893_s25   ;;  %s3609_s24 = sphi %s3678_s24, %s5892_s24  }
   0x9   : > { %s221_s29 = sshll.u32 %s3623_s28, 4  ;;  %p3017_p0 = scmp.ge.s32.totalorder %s3621_s27, 1  ;;  %s3704_s29 = int_to_ptr.vmem [resolvable:$true] %s221_s29 }
   0xa   : > { %p5702_p1 = scmp.eq.s32.totalorder %s3699_s30, 0  ;;  %p209_p2 = scmp.lt.s32.totalorder %s3621_s27, 3 }
   0xb   : > { %s3624_s9 = smov [#allocation8]   ;;  %s3625_s12 = smov [#allocation11]  }
   0xc   : > { %p3706_p3 = pnand %p3017_p0, %p209_p2  ;;  %s246_s10 = sshll.u32 %s3624_s9, 4  ;;  %s3719_s10 = int_to_ptr.vmem [resolvable:$true] %s246_s10 }
   0xd   : > { %s270_s13 = sshll.u32 %s3625_s12, 4  ;;  %s3345_s16 = scalar_lea.hbm %s5695_s1, 192  ;;  %s3721_s13 = int_to_ptr.vmem [resolvable:$true] %s270_s13 }
   0xe   : > { %s5775_s8 = scalar_select %p3706_p3, 1, 0 }
   0xf   : > { %p3252_p5 = pneg %p3706_p3  ;;  %p3346_p7 = scmp.ne.s32.totalorder %s5695_s1, %s3345_s16 }
  0x10   : > { %p3352_p11 = scmp.lt.u32.totalorder %s3345_s16, %s5695_s1 }
  0x11   : > { %p3715_p6 = pnand %p3252_p5, %p5702_p1 }
  0x13   : > { %p3731_p8 = pneg %p3715_p6 }
  0x15   : > { %p3348_p9 = pnand %p3731_p8, %p3346_p7 }
  0x17   : > { %p3349_p10 = pneg %p3348_p9 }
  0x19   : > { %p3354_p12 = pnand %p3352_p11, %p3349_p10 }
  0x1b   : > { %3357 = shalt.err (!%p3354_p12)
}
  0x1c   : > { %s3358_s22 = scalar_lea.vmem %s3704_s29, 192  ;;  %p3366_p5 = scmp.lt.s32.totalorder %s3704_s29, %s3704_s29 }
  0x1d   : > { %p3359_p13 = scmp.ne.s32.totalorder %s3704_s29, %s3358_s22  ;;  %p3367_p4 = scmp.lt.s32.totalorder %s3358_s22, %s3358_s22 }
  0x1f   : > { %p3361_p0 = pnand %p3359_p13, %p3731_p8  ;;  %p3368_p7 = por %p3367_p4, %p3366_p5 }
  0x21   : > { %p3362_p2 = pneg %p3361_p0 }
  0x23   : > { %p3369_p9 = pnand %p3368_p7, %p3362_p2 }
  0x25   : > { %3372 = shalt.err (!%p3369_p9)
}
  0x26   : > { %s3626_s23 = smov 64   ;;  %s3627_s28 = smov 4  }
  0x27   : > { %3255 = dma.hbm_to_vmem [thread:$0]  (!%p3715_p6), %s5695_s1, 192, %s3704_s29, [#allocation6], %s3626_s23, %s3626_s23, %s3627_s28  }
  0x28   : > { %s3373_s16 = scalar_lea.hbm %s5697_s3, 16 }
  0x29   : > { %p3374_p4 = scmp.ne.s32.totalorder %s5697_s3, %s3373_s16  ;;  %p3380_p12 = scmp.lt.u32.totalorder %s3373_s16, %s5697_s3 }
  0x2b   : > { %p3376_p10 = pnand %p3374_p4, %p3731_p8 }
  0x2d   : > { %p3377_p11 = pneg %p3376_p10 }
  0x2f   : > { %p3382_p13 = pnand %p3380_p12, %p3377_p11 }
  0x31   : > { %3385 = shalt.err (!%p3382_p13)
}
  0x32   : > { %s3386_s29 = scalar_lea.vmem %s3719_s10, 16  ;;  %s3393_s22 = scalar_lea.vmem %s3719_s10, 32 }
  0x33   : > { %p3387_p0 = scmp.ne.s32.totalorder %s3719_s10, %s3386_s29  ;;  %p3394_p7 = scmp.lt.s32.totalorder %s3719_s10, %s3719_s10 }
  0x34   : > { %p3395_p9 = scmp.lt.s32.totalorder %s3393_s22, %s3386_s29 }
  0x35   : > { %p3389_p2 = pnand %p3387_p0, %p3731_p8 }
  0x36   : > { %p3396_p4 = por %p3395_p9, %p3394_p7 }
  0x37   : > { %p3390_p5 = pneg %p3389_p2 }
  0x39   : > { %p3397_p10 = pnand %p3396_p4, %p3390_p5 }
  0x3b   : > { %3400 = shalt.err (!%p3397_p10)
}
  0x3c   : > { %3261 = dma.hbm_to_vmem [thread:$0]  (!%p3715_p6), %s5697_s3, 16, %s3719_s10, [#allocation9]  }
  0x3d   : > { %s3401_s14 = scalar_lea.hbm %s5699_s5, 16 }
  0x3e   : > { %p3402_p11 = scmp.ne.s32.totalorder %s5699_s5, %s3401_s14  ;;  %p3408_p0 = scmp.lt.u32.totalorder %s3401_s14, %s5699_s5 }
  0x40   : > { %p3404_p12 = pnand %p3402_p11, %p3731_p8 }
  0x42   : > { %p3405_p13 = pneg %p3404_p12 }
  0x44   : > { %p3410_p2 = pnand %p3408_p0, %p3405_p13 }
  0x46   : > { %3413 = shalt.err (!%p3410_p2)
}
  0x47   : > { %s3414_s10 = scalar_lea.vmem %s3721_s13, 16  ;;  %s3421_s20 = scalar_lea.vmem %s3721_s13, 32 }
  0x48   : > { %p3415_p5 = scmp.ne.s32.totalorder %s3721_s13, %s3414_s10  ;;  %p3422_p4 = scmp.lt.s32.totalorder %s3721_s13, %s3721_s13 }
  0x49   : > { %p3423_p10 = scmp.lt.s32.totalorder %s3421_s20, %s3414_s10 }
  0x4a   : > { %p3417_p7 = pnand %p3415_p5, %p3731_p8 }
  0x4b   : > { %p3424_p11 = por %p3423_p10, %p3422_p4 }
  0x4c   : > { %p3418_p9 = pneg %p3417_p7 }
  0x4e   : > { %p3425_p12 = pnand %p3424_p11, %p3418_p9 }
  0x50   : > { %3428 = shalt.err (!%p3425_p12)
}
  0x51   : > { %3267 = dma.hbm_to_vmem [thread:$0]  (!%p3715_p6), %s5699_s5, 16, %s3721_s13, [#allocation12]  }
  0x52   : > { %s3628_s22 = smov [#allocation7]   ;;  %s3629_s28 = smov [#allocation10]  }
  0x53   : > { %s235_s23 = sshll.u32 %s3628_s22, 4  ;;  %s256_s9 = sshll.u32 %s3629_s28, 4  ;;  %s236_s23 = int_to_ptr.vmem [resolvable:$true] %s235_s23  ;;  %s257_s9 = int_to_ptr.vmem [resolvable:$true] %s256_s9 }
  0x54   : > { %s3429_s15 = scalar_lea.hbm %s5696_s2, 16 }
  0x55   : > { %p3430_p13 = scmp.ne.s32.totalorder %s5696_s2, %s3429_s15  ;;  %p3436_p5 = scmp.lt.u32.totalorder %s3429_s15, %s5696_s2 }
  0x57   : > { %p3432_p0 = pnand %p3430_p13, %p3731_p8 }
  0x59   : > { %p3433_p2 = pneg %p3432_p0 }
  0x5b   : > { %p3438_p7 = pnand %p3436_p5, %p3433_p2 }
  0x5d   : > { %3441 = shalt.err (!%p3438_p7)
}
  0x5e   : > { %s3442_s13 = scalar_lea.vmem %s236_s23, 16  ;;  %s3449_s20 = scalar_lea.vmem %s236_s23, 32 }
  0x5f   : > { %p3443_p9 = scmp.ne.s32.totalorder %s236_s23, %s3442_s13  ;;  %p3450_p11 = scmp.lt.s32.totalorder %s236_s23, %s236_s23 }
  0x60   : > { %p3451_p12 = scmp.lt.s32.totalorder %s3449_s20, %s3442_s13 }
  0x61   : > { %p3445_p4 = pnand %p3443_p9, %p3731_p8 }
  0x62   : > { %p3452_p1 = por %p3451_p12, %p3450_p11 }
  0x63   : > { %p3446_p10 = pneg %p3445_p4 }
  0x65   : > { %p3453_p3 = pnand %p3452_p1, %p3446_p10 }
  0x67   : > { %3456 = shalt.err (!%p3453_p3)
}
  0x68   : > { %3258 = dma.hbm_to_vmem [thread:$0]  (!%p3715_p6), %s5696_s2, 16, %s236_s23, [#allocation6]  }
  0x69   : > { %s3457_s12 = scalar_lea.hbm %s5698_s4, 2048 }
  0x6a   : > { %p3458_p13 = scmp.ne.s32.totalorder %s5698_s4, %s3457_s12  ;;  %p3464_p3 = scmp.lt.u32.totalorder %s3457_s12, %s5698_s4 }
  0x6c   : > { %p3460_p0 = pnand %p3458_p13, %p3731_p8 }
  0x6e   : > { %p3461_p1 = pneg %p3460_p0 }
  0x70   : > { %p3466_p2 = pnand %p3464_p3, %p3461_p1 }
  0x72   : > { %3469 = shalt.err (!%p3466_p2)
}
  0x73   : > { %s3470_s18 = scalar_lea.vmem %s257_s9, 2048  ;;  %p3478_p4 = scmp.lt.s32.totalorder %s257_s9, %s257_s9 }
  0x74   : > { %p3471_p5 = scmp.ne.s32.totalorder %s257_s9, %s3470_s18  ;;  %p3479_p10 = scmp.lt.s32.totalorder %s3470_s18, %s3470_s18 }
  0x76   : > { %p3473_p7 = pnand %p3471_p5, %p3731_p8  ;;  %p3480_p11 = por %p3479_p10, %p3478_p4 }
  0x78   : > { %p3474_p9 = pneg %p3473_p7 }
  0x7a   : > { %p3481_p12 = pnand %p3480_p11, %p3474_p9 }
  0x7c   : > { %3484 = shalt.err (!%p3481_p12)
}
  0x7d   : > { %s5704_s23 = smov 128   ;;  %s3631_s10 = smov 8  }
  0x7e   : > { %3264 = dma.hbm_to_vmem [thread:$0]  (!%p3715_p6), %s5698_s4, 2048, %s257_s9, [#allocation9], %s5704_s23, %s5704_s23, %s3631_s10  }
  0x7f   : > { %s3632_s21 = smov [#allocation13]   ;;  %s3485_s12 = scalar_lea.hbm %s5700_s6, 16 }
  0x80   : > { %s281_s29 = sshll.u32 %s3632_s21, 4  ;;  %p3486_p13 = scmp.ne.s32.totalorder %s5700_s6, %s3485_s12  ;;  %s282_s29 = int_to_ptr.vmem [resolvable:$true] %s281_s29 }
  0x81   : > { %p3492_p3 = scmp.lt.u32.totalorder %s3485_s12, %s5700_s6 }
  0x82   : > { %p3488_p0 = pnand %p3486_p13, %p3731_p8 }
  0x84   : > { %p3489_p1 = pneg %p3488_p0 }
  0x86   : > { %p3494_p2 = pnand %p3492_p3, %p3489_p1 }
  0x88   : > { %3497 = shalt.err (!%p3494_p2)
}
  0x89   : > { %s3498_s9 = scalar_lea.vmem %s282_s29, 16  ;;  %s3505_s18 = scalar_lea.vmem %s282_s29, 32 }
  0x8a   : > { %p3499_p5 = scmp.ne.s32.totalorder %s282_s29, %s3498_s9  ;;  %p3506_p4 = scmp.lt.s32.totalorder %s282_s29, %s282_s29 }
  0x8b   : > { %p3507_p10 = scmp.lt.s32.totalorder %s3505_s18, %s3498_s9 }
  0x8c   : > { %p3501_p7 = pnand %p3499_p5, %p3731_p8 }
  0x8d   : > { %p3508_p11 = por %p3507_p10, %p3506_p4 }
  0x8e   : > { %p3502_p9 = pneg %p3501_p7 }
  0x90   : > { %p3509_p12 = pnand %p3508_p11, %p3502_p9 }
  0x92   : > { %3512 = shalt.err (!%p3509_p12)
}
  0x93   : > { %3270 = dma.hbm_to_vmem [thread:$0]  (!%p3715_p6), %s5700_s6, 16, %s282_s29, [#allocation12]  }
  0x94   : > { %s3016_s19 = sadd.s32 4294967294, %s3621_s27   ;;  %s3859_s11 = sadd.s32 1, %s3621_s27  }
  0x95   : > { %s30_s21 = ssub.s32 %s3621_s27, %s3859_s11  ;;  %s33_s22 = sadd.s32 1, %s3617_s26 }
  0x96   : > { %p31_p8 = scmp.eq.s32.totalorder %s30_s21, 0  ;;  %p40_p13 = scmp.ne.s32.totalorder %s3617_s26, %s3613_s25 }
  0x97   : > { %p41_p0 = scmp.eq.s32.totalorder %s3621_s27, 0  ;;  %p46_p1 = scmp.ne.s32.totalorder %s3613_s25, %s3609_s24 }
  0x98   : > { %s3870_s28 = scalar_select %p31_p8, %s3617_s26, %s33_s22  }
  0x99   : > { %p3872_p3 = por %p41_p0, %p40_p13  ;;  %p5779_p2 = scmp.eq.s32.totalorder %s3699_s30, 0 }
  0x9a   : > { %p196_p5 = scmp.eq.s32.totalorder %s3699_s30, 1  ;;  %p202_p7 = scmp.eq.s32.totalorder %s3016_s19, 1 }
  0x9b   : > { %p3878_p6 = por %p5779_p2, %p46_p1  ;;  %p3285_p9 = scmp.lt.s32.totalorder %s3621_s27, 2 }
  0x9c   : > { %s292_s14 = sand.u32 1, %s3617_s26   ;;  %p3885_p4 = por %p196_p5, %p40_p13 }
  0x9d   : > { %p3889_p10 = por %p202_p7, %p46_p1  ;;  %s3025_s17 = sshll.u32 %s292_s14, 8 }
  0x9e   : > { %s5781_s15 = scalar_select %p3885_p4, 1, 0 }
  0x9f   : > { %s5782_s16 = scalar_select %p3889_p10, 1, 0 }
  0xa0   : > { %s3046_s9 = sshll.u32 %s3621_s27, 12  ;;  %s296_s19 = scalar_lea.vmem [#allocation2], %s3025_s17 }
  0xa1   : > { %s3897_s20 = scalar_lea.hbm %s5694_s0, %s3046_s9  ;;  %s303_s21 = sshll.u32 %s296_s19, 4  ;;  %s3899_s21 = int_to_ptr.vmem [resolvable:$true] %s303_s21 }
  0xa2   : > { %p3903_p11 = pnand %p3285_p9, %p3872_p3  ;;  %s3907_s23 = scalar_lea.sflag [#allocation3], %s292_s14 }
  0xa3   : > { %s3513_s18 = scalar_lea.hbm %s3897_s20, 4096  ;;  %s3518_s12 = scalar_lea.hbm %s5694_s0, 8192 }
  0xa4   : > { %p3514_p12 = scmp.ne.s32.totalorder %s3897_s20, %s3513_s18  ;;  %p3515_p8 = pneg %p3903_p11 }
  0xa5   : > { %p3519_p1 = scmp.lt.u32.totalorder %s3897_s20, %s5694_s0  ;;  %p3520_p3 = scmp.lt.u32.totalorder %s3518_s12, %s3513_s18 }
  0xa6   : > { %p3516_p13 = pnand %p3515_p8, %p3514_p12  ;;  %p3522_p5 = scmp.lt.u32.totalorder %s3513_s18, %s3897_s20 }
  0xa7   : > { %p3521_p2 = por %p3520_p3, %p3519_p1 }
  0xa8   : > { %p3517_p0 = pneg %p3516_p13 }
  0xa9   : > { %p3523_p7 = por %p3522_p5, %p3521_p2 }
  0xab   : > { %p3524_p9 = pnand %p3523_p7, %p3517_p0 }
  0xad   : > { %3527 = shalt.err (!%p3524_p9)
}
  0xae   : > { %s3528_s14 = scalar_lea.vmem %s3899_s21, 4096  ;;  %s3633_s17 = smov [#allocation2]  }
  0xaf   : > { %p3529_p12 = scmp.ne.s32.totalorder %s3899_s21, %s3528_s14  ;;  %s3533_s9 = sshll.u32 %s3633_s17, 4  ;;  %s3534_s9 = int_to_ptr.vmem [resolvable:$false] %s3533_s9 }
  0xb0   : > { %s3535_s13 = scalar_lea.vmem %s3534_s9, 8192  ;;  %p3536_p4 = scmp.lt.s32.totalorder %s3899_s21, %s3534_s9 }
  0xb1   : > { %p3531_p13 = pnand %p3529_p12, %p3515_p8  ;;  %p3537_p1 = scmp.lt.s32.totalorder %s3535_s13, %s3528_s14 }
  0xb3   : > { %p3532_p10 = pneg %p3531_p13  ;;  %p3538_p3 = por %p3537_p1, %p3536_p4 }
  0xb5   : > { %p3539_p2 = pnand %p3538_p3, %p3532_p10 }
  0xb7   : > { %3542 = shalt.err (!%p3539_p2)
}
  0xb8   : > { %s5784_s18 = smov 128   ;;  %p5785_p8 = scmp.ne.s32.totalorder %s5775_s8, 0 }
  0xb9   : > { %3274 = dma.hbm_to_vmem [thread:$0]  (!%p3903_p11), %s3897_s20, 4096, %s3899_s21, %s3907_s23, %s5784_s18, %s5784_s18, %s3631_s10  }
  0xba   : > { %315 = sbr.rel (%p5785_p8) target bundleno = 738 (0x2e2), region = 48 }
  0xc1   : > { %s3941_s12 = sand.u32 1, %s3613_s25  }
  0xc2   : > { %s3029_s19 = sshll.u32 %s3941_s12, 8  ;;  %s318_s14 = scalar_lea.sflag [#allocation3], %s3941_s12 }
  0xc3   : > { %s3947_s22 = scalar_lea.vmem [#allocation2], %s3029_s19 }
  0xc4   : > { %3588 = dma.done.wait (%p3878_p6), %s318_s14, 4096  }
  0xc5   : > { %3590 = vsyncadd (%p3878_p6), %s318_s14, 4294963200  ;;  %p5786_p4 = scmp.eq.s32.totalorder %s3699_s30, 0 }
  0xc7   : > { %3592 = dma.done.wait (%p5786_p4), [#allocation6], 208   ;;  %p5787_p10 = pmov %p5786_p4 }
  0xc8   : > { %p5788_p11 = pmov %p5786_p4 }
  0xc9   : > { %3594 = vsyncadd (%p5787_p10), [#allocation6], 4294967088 }
  0xca   : > { %3596 = dma.done.wait (%p5788_p11), [#allocation9], 2064   ;;  %p5789_p0 = pmov %p5786_p4 }
  0xcc   : > { %3598 = vsyncadd (%p5789_p0), [#allocation9], 4294965232  ;;  %p5790_p5 = pmov %p5789_p0 }
  0xcd   : > { %p5791_p7 = pmov %p5789_p0 }
  0xce   : > { %3600 = dma.done.wait (%p5790_p5), [#allocation12], 32  }
  0xcf   : > { %3602 = vsyncadd (%p5791_p7), [#allocation12], 4294967264  ;;  %v408_v0 = vlaneseq  ;;  %v2425_v10 = vld [vmem:[#allocation10] sm:$0xff]  ;;  %v2426_v11 = vld [vmem:[#allocation10 + $0x8] sm:$0xff]  ;;  %vm1051_vm0 = vcmask 1040384   ;;  %v3634_v15 = vmov 0.0  }
  0xd0   : > { %v2427_v12 = vld [vmem:[#allocation10 + $0x10] sm:$0xff]  ;;  %v3176_v13 = vpack.c.bf16 %v2426_v11, %v2425_v10  ;;  %v2428_v14 = vld [vmem:[#allocation10 + $0x18] sm:$0xff]  ;;  %v3975_v16 = vrot.slane %v3634_v15, 7  ;;  %v2429_v19 = vld [vmem:[#allocation10 + $0x20] sm:$0xff]  ;;  %vm1505_vm2 = vcmask 1046528   ;;  %v3980_v27 = vrot.slane %v3634_v15, 1 }
  0xd1   : > { %v3965_v1 = vshrl.u32 %v408_v0, 7  ;;  %v3180_v18 = vpack.c.bf16 %v2428_v14, %v2427_v12  ;;  %v2430_v20 = vld [vmem:[#allocation10 + $0x28] sm:$0xff]  ;;  %v2431_v21 = vld [vmem:[#allocation10 + $0x30] sm:$0xff]  ;;  %v2432_v24 = vld [vmem:[#allocation10 + $0x38] sm:$0xff]  ;;  %s5549_s8 = scalar_lea.vmem [#allocation14], %s3029_s19  ;;  %s3047_s23 = sshll.u32 %s3699_s30, 12 }
  0xd2   : > { %5792 = vst [vmem:[#allocation20_spill] sm:$0xff] %v3975_v16  ;;  %3177 = vmatprep.subr.bf16.mxu0 %v3176_v13  ;;  %3208 = vmatprep.subr.bf16.mxu1 %v3176_v13  ;;  %v2433_v25 = vld [vmem:[#allocation10 + $0x40] sm:$0xff]  ;;  %v2434_v26 = vld [vmem:[#allocation10 + $0x48] sm:$0xff]  ;;  %5794 = vst [vmem:[#allocation22_spill] sm:$0xff] %v3980_v27  ;;  %v3184_v36 = vpack.c.bf16 %v2430_v20, %v2429_v19  ;;  %v3188_v43 = vpack.c.bf16 %v2432_v24, %v2431_v21  ;;  %s2886_s10 = sshll.u32 %s5549_s8, 4  ;;  %s5646_s21 = scalar_lea.hbm %s5701_s7, %s3047_s23  ;;  %s5648_s10 = int_to_ptr.vmem [resolvable:$true] %s2886_s10 }
  0xd3   : > { %v413_v2 = vadd.s32 32, %v3965_v1  ;;  %v445_v3 = vand.u32 15, %v3965_v1  ;;  %v425_v4 = vadd.s32 128, %v3965_v1  ;;  %v429_v5 = vadd.s32 160, %v3965_v1  ;;  %3179 = vmatpush3.bf16.msra.mxu0 %v3176_v13  ;;  %3216 = vmatpush3.bf16.msra.mxu1 %v3176_v13  ;;  %v2435_v30 = vld [vmem:[#allocation10 + $0x50] sm:$0xff]  ;;  %v2436_v31 = vld [vmem:[#allocation10 + $0x58] sm:$0xff] }
  0xd4   : > { %v410_v8 = vadd.s32 8, %v3965_v1  ;;  %v426_v9 = vadd.s32 136, %v3965_v1  ;;  %v2437_v32 = vld [vmem:[#allocation10 + $0x60] sm:$0xff]  ;;  %v3983_v33 = vsub.s32 0, %v3965_v1  ;;  %v3986_v34 = vsub.s32 1, %v3965_v1  ;;  %3181 = vmatprep.subr.bf16.mxu0 %v3180_v18  ;;  %3209 = vmatprep.subr.bf16.mxu1 %v3180_v18  ;;  %v2438_v37 = vld [vmem:[#allocation10 + $0x68] sm:$0xff] }
  0xd5   : > { %v473_v6 = vand.u32 15, %v413_v2  ;;  %v3971_v7 = vadd.s32 4294967295, %v445_v3  ;;  %v557_v17 = vand.u32 15, %v425_v4  ;;  %v585_v23 = vand.u32 15, %v429_v5  ;;  %v3992_v38 = vld [vmem:[%s3947_s22] sm:$0xff]  ;;  %v3995_v39 = vld [vmem:[%s3947_s22 + $0x8] sm:$0xff] }
  0xd6   : > { %v452_v28 = vand.u32 15, %v410_v8  ;;  %v564_v29 = vand.u32 15, %v426_v9  ;;  %v3989_v35 = vsub.s32 2, %v3965_v1  ;;  %v4003_v42 = vadd.s32 16, %v3965_v1  ;;  %v4006_v44 = vld [vmem:[%s3947_s22 + $0x10] sm:$0xff]  ;;  %v4009_v45 = vld [vmem:[%s3947_s22 + $0x18] sm:$0xff] }
  0xd7   : > { %v3977_v22 = vadd.s32 4294967295, %v473_v6  ;;  %vm860_vm1 = vcmp.ge.s32.totalorder %v3971_v7, 0  ;;  %v4000_v41 = vadd.s32 4294967295, %v557_v17  ;;  %v4012_v46 = vld [vmem:[%s3947_s22 + $0x20] sm:$0xff]  ;;  %v5721_v47 = vrot.slane %v3992_v38, 7  ;;  %3183 = vmatpush3.bf16.msra.mxu0 %v3180_v18  ;;  %3217 = vmatpush3.bf16.msra.mxu1 %v3180_v18  ;;  %v2440_v10 = vld [vmem:[#allocation10 + $0x78] sm:$0xff] }
  0xd8   : > { %v1145_v40 = vsel %vm860_vm1, %v3975_v16, 0.0  ;;  %v4016_v48 = vadd.s32 4294967295, %v585_v23  ;;  %v4018_v49 = vpack.c.bf16 %v2434_v26, %v2433_v25  ;;  %v4020_v50 = vpack.c.bf16 %v2436_v31, %v2435_v30  ;;  %v825_v51 = vld [vmem:[#allocation5] sm:$0x7]  ;;  %3185 = vmatprep.subr.bf16.mxu0 %v3184_v36  ;;  %3210 = vmatprep.subr.bf16.mxu1 %v3184_v36  ;;  %v826_v3 = vld [vmem:[#allocation5 + $0x4] sm:$0x7] }
  0xd9   : > { %5793 = vst [vmem:[#allocation21_spill] sm:$0xff] %v3977_v22  ;;  %vm864_vm3 = vcmp.ge.s32.totalorder %v3977_v22, 0  ;;  %v4022_v52 = vadd.s32 1, %v452_v28  ;;  %v4024_v53 = vadd.s32 1, %v564_v29  ;;  %v4026_v54 = vpack.c.bf16 %v2438_v37, %v2437_v32  ;;  %v2439_v9 = vld [vmem:[#allocation10 + $0x70] sm:$0xff]  ;;  %v4090_v21 = vld [vmem:[%s3947_s22 + $0x68] sm:$0xff] }
  0xda   : > { %5795 = vst [vmem:[#allocation23_spill] sm:$0xff] %v4016_v48  ;;  %v4032_v55 = vsel %vm1051_vm0, %v3975_v16, %v5721_v47  ;;  %v5728_v56 = vrot.slane %v3995_v39, 7  ;;  %v5716_v57 = vrot.slane %v4006_v44, 7  ;;  %v5717_v58 = vrot.slane %v4009_v45, 7  ;;  %v827_v15 = vld [vmem:[#allocation5 + $0x8] sm:$0x7] }
  0xdb   : > { %v5706_v59 = vrot.slane %v4012_v46, 7  ;;  %v4039_v60 = vrot.slane %v825_v51, %v3983_v33  ;;  %v4042_v61 = vrot.slane %v825_v51, %v3986_v34  ;;  %v5715_v63 = vrot.slane %v4006_v44, 1  ;;  %3187 = vmatpush3.bf16.msra.mxu0 %v3184_v36  ;;  %3218 = vmatpush3.bf16.msra.mxu1 %v3184_v36  ;;  %5796 = vst [vmem:[#allocation24_spill] sm:$0xff] %v4090_v21  ;;  %v4101_v28 = vld [vmem:[%s3947_s22 + $0x70] sm:$0xff]  ;;  %s2873_s30 = scalar_lea.sflag [#allocation4], %s3941_s12  ;;  %s3543_s17 = scalar_lea.vmem %s5648_s10, 4096 }
  0xdc   : > { %v4049_v62 = vsel %vm1051_vm0, %v5728_v56, %v5716_v57  ;;  %v5709_v0 = vrot.slane %v4009_v45, 1  ;;  %v4054_v2 = vrot.slane %v825_v51, %v3989_v35  ;;  %vm876_vm4 = vcmp.ge.s32.totalorder %v4000_v41, 0  ;;  %3189 = vmatprep.subr.bf16.mxu0 %v3188_v43  ;;  %3211 = vmatprep.subr.bf16.mxu1 %v3188_v43  ;;  %5797 = vst [vmem:[#allocation25_spill] sm:$0xff] %v4101_v28  ;;  %v4124_v51 = vld [vmem:[%s3947_s22 + $0x80] sm:$0xff]  ;;  %p3544_p6 = scmp.ne.s32.totalorder %s5648_s10, %s3543_s17  ;;  %p5889_p9 = scmp.ne.s32.totalorder %s5781_s15, 0 }
  0xdd   : > { %v1149_v4 = vsel %vm864_vm3, %v4049_v62, 0.0  ;;  %v1181_v5 = vmul.f32 %v4039_v60, %v1145_v40  ;;  %v4061_v6 = vmul.f32 0.0, %v4042_v61  ;;  %v1252_v8 = vmul.f32 %v4042_v61, %v4006_v44  ;;  %v4121_v40 = vld [vmem:[%s3947_s22 + $0x78] sm:$0xff]  ;;  %s3635_s9 = smov [#allocation14]  }
  0xde   : > { %v1185_v11 = vmul.f32 %v4039_v60, %v1149_v4  ;;  %v5718_v12 = vrot.slane %v3992_v38, 1  ;;  %v5710_v13 = vrot.slane %v3995_v39, 1  ;;  %v4074_v14 = vsel %vm1505_vm2, %v5715_v63, %v5709_v0  ;;  %p3545_p12 = pnand %p3544_p6, %p5889_p9  ;;  %s3547_s13 = sshll.u32 %s3635_s9, 4  ;;  %s3548_s13 = int_to_ptr.vmem [resolvable:$false] %s3547_s13 }
  0xdf   : > { %v4081_v17 = vsel %vm1051_vm0, %v5717_v58, %v5706_v59  ;;  %v1280_v18 = vadd.f32 %v4061_v6, %v1181_v5  ;;  %v1638_v19 = vmul.f32 %v4054_v2, %v3980_v27  ;;  %v1709_v20 = vsel %vm860_vm1, %v4032_v55, 0.0  ;;  %3191 = vmatpush3.bf16.msra.mxu0 %v3188_v43  ;;  %3219 = vmatpush3.bf16.msra.mxu1 %v3188_v43  ;;  %v4138_v5 = vld [vmem:[%s3947_s22 + $0x88] sm:$0xff]  ;;  %s3549_s18 = scalar_lea.vmem %s3548_s13, 8192  ;;  %p3550_p1 = scmp.lt.s32.totalorder %s5648_s10, %s3548_s13 }
  0xe0   : > { %v1284_v23 = vadd.f32 %v1252_v8, %v1185_v11  ;;  %v1642_v24 = vmul.f32 %v4054_v2, %v4074_v14  ;;  %v4095_v25 = vrot.slane %v826_v3, %v3983_v33  ;;  %v4098_v26 = vrot.slane %v826_v3, %v3986_v34  ;;  %3193 = vmatprep.subr.bf16.mxu0 %v4018_v49  ;;  %v4141_v8 = vld [vmem:[%s3947_s22 + $0x90] sm:$0xff]  ;;  %p3546_p13 = pneg %p3545_p12  ;;  %p3551_p3 = scmp.lt.s32.totalorder %s3549_s18, %s3543_s17 }
  0xe1   : > { %v4103_v29 = vpack.c.bf16 %v2440_v10, %v2439_v9  ;;  %v1670_v30 = vadd.f32 %v1638_v19, %v1280_v18  ;;  %v4106_v31 = vrot.slane %v826_v3, %v3989_v35  ;;  %vm880_vm5 = vcmp.ge.s32.totalorder %v4016_v48, 0  ;;  %3212 = vmatprep.subr.bf16.mxu1 %v4018_v49 }
  0xe2   : > { %v4114_v32 = vsel %vm1505_vm2, %v5718_v12, %v5710_v13  ;;  %v1745_v36 = vmul.f32 %v4095_v25, %v1709_v20  ;;  %v4118_v37 = vrot.slane %v827_v15, %v3983_v33  ;;  %v5707_v3 = vrot.slane %v4090_v21, 7  ;;  %v4152_v20 = vld [vmem:[%s3947_s22 + $0xa0] sm:$0xff]  ;;  %p3552_p2 = por %p3551_p3, %p3550_p1 }
  0xe3   : > { %v1713_v43 = vsel %vm864_vm3, %v4081_v17, 0.0  ;;  %v1813_v4 = vmul.f32 %v4098_v26, %v3992_v38  ;;  %v1984_v33 = vsel %vm860_vm1, %v4049_v62, 0.0  ;;  %v5708_v9 = vrot.slane %v4101_v28, 7  ;;  %3195 = vmatpush3.bf16.msra.mxu0 %v4018_v49  ;;  %3220 = vmatpush3.bf16.msra.mxu1 %v4018_v49 }
  0xe4   : > { %v4144_v10 = vadd.f32 %v1642_v24, %v1284_v23  ;;  %v1777_v11 = vadd.f32 %v1745_v36, %v1670_v30  ;;  %v1918_v18 = vmul.f32 %v4106_v31, %v4114_v32  ;;  %v4149_v19 = vrot.slane %v827_v15, %v3986_v34  ;;  %3197 = vmatprep.subr.bf16.mxu0 %v4020_v50  ;;  %p3553_p8 = pnand %p3552_p2, %p3546_p13 }
  0xe5   : > { %v4155_v7 = vrot.slane %v827_v15, %v3989_v35  ;;  %v4162_v59 = vsel %vm1051_vm0, %v5707_v3, %v5708_v9  ;;  %v5712_v23 = vrot.slane %v4121_v40, 7  ;;  %v5711_v24 = vrot.slane %v4124_v51, 7  ;;  %v4170_v35 = vld [vmem:[%s3947_s22 + $0x98] sm:$0xff]  ;;  %3213 = vmatprep.subr.bf16.mxu1 %v4020_v50 }
  0xe6   : > { %5798 = vst [vmem:[#allocation26_spill] sm:$0xff] %v4162_v59  ;;  %v1845_v34 = vadd.f32 %v1813_v4, %v1777_v11  ;;  %v2020_v30 = vmul.f32 %v4118_v37, %v1984_v33  ;;  %v5714_v15 = vrot.slane %v4138_v5, 7  ;;  %v5713_v36 = vrot.slane %v4141_v8, 7 }
  0xe7   : > { %v2088_v3 = vmul.f32 %v4149_v19, %v4006_v44  ;;  %v2187_v9 = vmul.f32 %v4155_v7, %v4074_v14  ;;  %v4185_v49 = vsel %vm1051_vm0, %v5712_v23, %v5711_v24  ;;  %v5719_v4 = vrot.slane %v4152_v20, 7  ;;  %3199 = vmatpush3.bf16.msra.mxu0 %v4020_v50  ;;  %3221 = vmatpush3.bf16.msra.mxu1 %v4020_v50 }
  0xe8   : > { %5799 = vst [vmem:[#allocation27_spill] sm:$0xff] %v4185_v49  ;;  %v1950_v33 = vadd.f32 %v1918_v18, %v1845_v34  ;;  %v4193_v11 = vsel %vm1051_vm0, %v5714_v15, %v5713_v36  ;;  %v1161_v0 = vsel %vm876_vm4, %v4162_v59, 0.0  ;;  %v1264_v13 = vmul.f32 %v4042_v61, %v4101_v28  ;;  %3201 = vmatprep.subr.bf16.mxu0 %v4026_v54 }
  0xe9   : > { %v5720_v24 = vrot.slane %v4170_v35, 7  ;;  %v1165_v18 = vsel %vm880_vm5, %v4193_v11, 0.0  ;;  %v1197_v34 = vmul.f32 %v4039_v60, %v1161_v0  ;;  %v1268_v23 = vmul.f32 %v4042_v61, %v4141_v8  ;;  %3214 = vmatprep.subr.bf16.mxu1 %v4026_v54 }
  0xea   : > { %v2052_v36 = vadd.f32 %v2020_v30, %v1950_v33  ;;  %v1201_v15 = vmul.f32 %v4039_v60, %v1165_v18  ;;  %v5722_v63 = vrot.slane %v4101_v28, 1  ;;  %v5726_v57 = vrot.slane %v4121_v40, 1 }
  0xeb   : > { %v4219_v0 = vsel %vm1051_vm0, %v5720_v24, %v5719_v4  ;;  %v1296_v58 = vadd.f32 %v1264_v13, %v1197_v34  ;;  %v5727_v50 = vrot.slane %v4124_v51, 1  ;;  %v5723_v30 = vrot.slane %v4138_v5, 1  ;;  %v4234_v34 = vld [vmem:[#allocation7] ss:$0 sm:$0xff]  ;;  %3203 = vmatpush3.bf16.msra.mxu0 %v4026_v54  ;;  %3222 = vmatpush3.bf16.msra.mxu1 %v4026_v54  ;;  %v4260_v54 = vld [vmem:[#allocation8] ss:$0 sm:$0xff] }
  0xec   : > { %vm1377_vm6 = vcmp.lt.s32.totalorder %v4022_v52, 16  ;;  %v2119_v33 = vadd.f32 %v2088_v3, %v2052_v36  ;;  %v4229_v18 = vsel %vm1505_vm2, %v5722_v63, %v5726_v57  ;;  %v5725_v12 = vrot.slane %v4141_v8, 1  ;;  %3205 = vmatprep.subr.bf16.mxu0 %v4103_v29  ;;  %3215 = vmatprep.subr.bf16.mxu1 %v4103_v29 }
  0xed   : > { %5800 = vst [vmem:[#allocation28_spill] sm:$0xff] %v4229_v18  ;;  %v5724_v4 = vrot.slane %v4170_v35, 1  ;;  %v1749_v13 = vmul.f32 %v4095_v25, %v1713_v43  ;;  %v1300_v24 = vadd.f32 %v1268_v23, %v1201_v15  ;;  %v1654_v47 = vmul.f32 %v4054_v2, %v4229_v18 }
  0xee   : > { %v1725_v3 = vsel %vm876_vm4, %v4185_v49, 0.0  ;;  %v2219_v36 = vadd.f32 %v2187_v9, %v2119_v33  ;;  %v4248_v43 = vsel %vm1505_vm2, %v5727_v50, %v5723_v30  ;;  %v4256_v15 = vadd.s32 48, %v3965_v1 }
  0xef   : > { %5801 = vst [vmem:[#allocation29_spill] sm:$0xff] %v4248_v43  ;;  %v1547_v23 = vsel %vm1505_vm2, %v5725_v12, %v5724_v4  ;;  %v1686_v33 = vadd.f32 %v1654_v47, %v1296_v58  ;;  %v1729_v63 = vsel %vm880_vm5, %v4219_v0, 0.0  ;;  %v1761_v30 = vmul.f32 %v4095_v25, %v1725_v3  ;;  %3207 = vmatpush3.bf16.msra.mxu0 %v4103_v29 }
  0xf0   : > { %v1658_v9 = vmul.f32 %v4054_v2, %v1547_v23  ;;  %v4269_v4 = vmul.f32 %v4054_v2, %v4114_v32  ;;  %v2258_v12 = vmul.f32 %v4234_v34, %v2219_v36  ;;  %v1829_v57 = vmul.f32 %v4098_v26, %v4124_v51  ;;  %3223 = vmatpush3.bf16.msra.mxu1 %v4103_v29 }
  0xf1   : > { %v2000_v50 = vsel %vm876_vm4, %v4193_v11, 0.0  ;;  %v4278_v47 = vadd.f32 %v1749_v13, %v4144_v10  ;;  %v4282_v58 = vmul.f32 %v4106_v31, %v4074_v14  ;;  %v1793_v3 = vadd.f32 %v1761_v30, %v1686_v33 }
  0xf2   : > { %v1934_v32 = vmul.f32 %v4106_v31, %v4248_v43  ;;  %v2297_v36 = vadd.f32 %v4260_v54, %v2258_v12  ;;  %v4291_v41 = vmul.f32 %v4054_v2, %v4248_v43  ;;  %v1765_v10 = vmul.f32 %v4095_v25, %v1729_v63 }
  0xf3   : > { %v1690_v14 = vadd.f32 %v1658_v9, %v1300_v24  ;;  %v1861_v56 = vadd.f32 %v1829_v57, %v1793_v3  ;;  %v4296_v30 = vmul.f32 %v4106_v31, %v1547_v23  ;;  %v2036_v33 = vmul.f32 %v4118_v37, %v2000_v50 }
  0xf4   : > { %vm2329_vm7 = vcmp.gt.f32.partialorder %v2297_v36, 0.0  ;;  %v2361_v18 = vmul.f32 0.01, %v2297_v36  ;;  %v5802_v29 = vrot.slane %v3995_v39, 7  ;;  %v5803_v12 = vrot.slane %v3992_v38, 7 }
  0xf5   : > { %v1182_v63 = vmul.f32 %v4039_v60, %v3975_v16  ;;  %v1966_v59 = vadd.f32 %v1934_v32, %v1861_v56  ;;  %v2104_v57 = vmul.f32 %v4149_v19, %v4141_v8  ;;  %v2203_v24 = vmul.f32 %v4155_v7, %v1547_v23 }
  0xf6   : > { %v1057_v43 = vsel %vm1051_vm0, %v5803_v12, %v5802_v29  ;;  %v5804_v9 = vrot.slane %v3992_v38, 1  ;;  %v2393_v3 = vsel %vm2329_vm7, %v2297_v36, %v2361_v18  ;;  %v5805_v13 = vrot.slane %v4009_v45, 7 }
  0xf7   : > { %v5806_v21 = vrot.slane %v4006_v44, 7  ;;  %v1281_v12 = vadd.f32 %v4061_v6, %v1182_v63  ;;  %3128 = vmatprep.mubr.f32.mxu0 %v2393_v3  ;;  %v2068_v32 = vadd.f32 %v2036_v33, %v1966_v59  ;;  %v5807_v23 = vrot.slane %v4006_v44, 1 }
  0xf8   : > { %v1509_v50 = vsel %vm1505_vm2, %v3980_v27, %v5804_v9  ;;  %v5808_v16 = vrot.slane %v3995_v39, 1  ;;  %v1746_v36 = vmul.f32 %v4095_v25, %v1057_v43  ;;  %v4330_v27 = vadd.f32 %v1765_v10, %v1690_v14 }
  0xf9   : > { %v1061_v29 = vsel %vm1051_vm0, %v5806_v21, %v5805_v13  ;;  %v1603_v56 = vsel %vm1377_vm6, %v1509_v50, 0.0  ;;  %v4333_v6 = vmul.f32 %v4039_v60, %v1057_v43  ;;  %vm1393_vm8 = vcmp.lt.s32.totalorder %v4024_v53, 16 }
  0xfa   : > { %v4326_v9 = vsel %vm1505_vm2, %v5808_v16, %v5807_v23  ;;  %v1639_v18 = vmul.f32 %v4054_v2, %v1603_v56  ;;  %5809 = vst [vmem:[#allocation30_spill] sm:$0xff] %v4330_v27  ;;  %v2135_v21 = vadd.f32 %v2104_v57, %v2068_v32  ;;  %v4340_v13 = vmul.f32 %v4039_v60, %v1061_v29 }
  0xfb   : > { %v1883_v59 = vsel %vm1377_vm6, %v4326_v9, 0.0  ;;  %v1814_v33 = vmul.f32 %v4098_v26, %v3995_v39  ;;  %v5811_v10 = vrot.slane %v4012_v46, 1  ;;  %v5812_v14 = vrot.slane %v4009_v45, 1 }
  0xfc   : > { %5810 = vst [vmem:[#allocation31_spill] sm:$0xff] %v4340_v13  ;;  %v1671_v16 = vadd.f32 %v1639_v18, %v1281_v12  ;;  %v1919_v63 = vmul.f32 %v4106_v31, %v1883_v59  ;;  %v2021_v50 = vmul.f32 %v4118_v37, %v1061_v29  ;;  %v5813_v57 = vrot.slane %v4121_v40, 7 }
  0xfd   : > { %v4349_v43 = vsel %vm1505_vm2, %v5812_v14, %v5811_v10  ;;  %v5814_v3 = vrot.slane %v4101_v28, 7  ;;  %v2235_v56 = vadd.f32 %v2203_v24, %v2135_v21  ;;  %v5816_v23 = vrot.slane %v4138_v5, 7 }
  0xfe   : > { %v1778_v32 = vadd.f32 %v1746_v36, %v1671_v16  ;;  %v5817_v18 = vrot.slane %v4124_v51, 7  ;;  %v2089_v14 = vmul.f32 %v4149_v19, %v4009_v45  ;;  %v1265_v24 = vmul.f32 %v4042_v61, %v4121_v40 }
  0xff   : > { %v4358_v12 = vsel %vm1051_vm0, %v5814_v3, %v5813_v57  ;;  %v2152_v57 = vsel %vm1377_vm6, %v4349_v43, 0.0  ;;  %v5819_v36 = vrot.slane %v4124_v51, 1  ;;  %v5820_v21 = vrot.slane %v4121_v40, 1 }
 0x100   : > { %5815 = vst [vmem:[#allocation32_spill] sm:$0xff] %v4358_v12  ;;  %v4365_v10 = vsel %vm1051_vm0, %v5817_v18, %v5816_v23  ;;  %v1198_v59 = vmul.f32 %v4039_v60, %v4358_v12  ;;  %v2274_v3 = vmul.f32 %v4234_v34, %v2235_v56  ;;  %v1846_v23 = vadd.f32 %v1814_v33, %v1778_v32 }
 0x101   : > { %5818 = vst [vmem:[#allocation33_spill] sm:$0xff] %v4365_v10  ;;  %v4381_v16 = vsel %vm1505_vm2, %v5820_v21, %v5819_v36  ;;  %v5822_v18 = vrot.slane %v4170_v35, 7  ;;  %v5823_v12 = vrot.slane %v4141_v8, 7  ;;  %v5824_v27 = vrot.slane %v4141_v8, 1  ;;  %v4418_v21 = vld [vmem:[%s3947_s22 + $0x28] sm:$0xff] }
 0x102   : > { %5821 = vst [vmem:[#allocation34_spill] sm:$0xff] %v4381_v16  ;;  %v1619_v28 = vsel %vm1393_vm8, %v4381_v16, 0.0  ;;  %v1297_v13 = vadd.f32 %v1265_v24, %v1198_v59  ;;  %v5825_v40 = vrot.slane %v4138_v5, 1  ;;  %v1762_v56 = vmul.f32 %v4095_v25, %v4365_v10 }
 0x103   : > { %v1093_v52 = vsel %vm1051_vm0, %v5823_v12, %v5822_v18  ;;  %v1655_v33 = vmul.f32 %v4054_v2, %v1619_v28  ;;  %v2313_v12 = vadd.f32 %v4260_v54, %v2274_v3  ;;  %v1951_v32 = vadd.f32 %v1919_v63, %v1846_v23 }
 0x104   : > { %v4397_v36 = vsel %vm1505_vm2, %v5825_v40, %v5824_v27  ;;  %v4408_v24 = vmul.f32 %v4095_v25, %v1061_v29  ;;  %v2188_v27 = vmul.f32 %v4155_v7, %v2152_v57  ;;  %v1830_v28 = vmul.f32 %v4098_v26, %v4138_v5 }
 0x105   : > { %5826 = vst [vmem:[#allocation35_spill] sm:$0xff] %v4397_v36  ;;  %v1899_v59 = vsel %vm1393_vm8, %v4397_v36, 0.0  ;;  %v1687_v18 = vadd.f32 %v1655_v33, %v1297_v13  ;;  %vm2345_vm9 = vcmp.gt.f32.partialorder %v2313_v12, 0.0  ;;  %v2377_v40 = vmul.f32 0.01, %v2313_v12 }
 0x106   : > { %v2053_v16 = vadd.f32 %v2021_v50, %v1951_v32  ;;  %v4414_v63 = vmul.f32 %v4039_v60, %v1093_v52  ;;  %v1935_v23 = vmul.f32 %v4106_v31, %v1899_v59  ;;  %v459_v29 = vand.u32 15, %v4003_v42 }
 0x107   : > { %v1794_v3 = vadd.f32 %v1762_v56, %v1687_v18  ;;  %v487_v48 = vand.u32 15, %v4256_v15  ;;  %v2409_v57 = vsel %vm2345_vm9, %v2313_v12, %v2377_v40  ;;  %v5828_v33 = vrot.slane %v4152_v20, 1 }
 0x108   : > { %5827 = vst [vmem:[#allocation36_spill] sm:$0xff] %v4414_v63  ;;  %v2120_v13 = vadd.f32 %v2089_v14, %v2053_v16  ;;  %v5829_v22 = vrot.slane %v4170_v35, 1  ;;  %v2037_v32 = vmul.f32 %v4118_v37, %v1093_v52  ;;  %3152 = vmatprep.mubr.f32.mxu1 %v2409_v57  ;;  %v830_v42 = vadd.s32 4294967295, %v459_v29 }
 0x109   : > { %v1862_v56 = vadd.f32 %v1830_v28, %v1794_v3  ;;  %v4433_v18 = vadd.s32 4294967295, %v487_v48  ;;  %v4436_v14 = vmul.f32 %v4095_v25, %v1093_v52  ;;  %v2105_v16 = vmul.f32 %v4149_v19, %v4170_v35 }
 0x10a   : > { %v4427_v50 = vsel %vm1505_vm2, %v5829_v22, %v5828_v33  ;;  %v2220_v15 = vadd.f32 %v2188_v27, %v2120_v13  ;;  %v5746_v22 = vrot.slane %v4418_v21, 1  ;;  %vm862_vm10 = vcmp.ge.s32.totalorder %v830_v42, 0 }
 0x10b   : > { %v2168_v59 = vsel %vm1393_vm8, %v4427_v50, 0.0  ;;  %v1967_v12 = vadd.f32 %v1935_v23, %v1862_v56  ;;  %vm866_vm11 = vcmp.ge.s32.totalorder %v4433_v18, 0  ;;  %v1250_v53 = vmul.f32 %v4042_v61, %v3992_v38 }
 0x10c   : > { %v2259_v28 = vmul.f32 %v4234_v34, %v2220_v15  ;;  %v2204_v48 = vmul.f32 %v4155_v7, %v2168_v59  ;;  %v1147_v52 = vsel %vm862_vm10, %v4032_v55, 0.0  ;;  %v1151_v27 = vsel %vm866_vm11, %v4081_v17, 0.0 }
 0x10d   : > { %v2069_v40 = vadd.f32 %v2037_v32, %v1967_v12  ;;  %v1183_v3 = vmul.f32 %v4039_v60, %v1147_v52  ;;  %v1711_v23 = vsel %vm862_vm10, %v4049_v62, 0.0  ;;  %v427_v29 = vadd.s32 144, %v3965_v1 }
 0x10e   : > { %v2298_v38 = vadd.f32 %v4260_v54, %v2259_v28  ;;  %v1254_v57 = vmul.f32 %v4042_v61, %v4012_v46  ;;  %v5830_v55 = vrot.slane %v4012_v46, 1  ;;  %v1815_v33 = vmul.f32 %v4098_v26, %v4006_v44 }
 0x10f   : > { %v2136_v32 = vadd.f32 %v2105_v16, %v2069_v40  ;;  %v1187_v62 = vmul.f32 %v4039_v60, %v1151_v27  ;;  %v1282_v56 = vadd.f32 %v1250_v53, %v1183_v3  ;;  %v1747_v59 = vmul.f32 %v4095_v25, %v1711_v23  ;;  %v4478_v40 = vld [vmem:[%s3947_s22 + $0xa8] sm:$0xff] }
 0x110   : > { %v1519_v13 = vsel %vm1505_vm2, %v5830_v55, %v5746_v22  ;;  %vm2330_vm12 = vcmp.gt.f32.partialorder %v2298_v38, 0.0  ;;  %v2362_v15 = vmul.f32 0.01, %v2298_v38  ;;  %v2090_v12 = vmul.f32 %v4149_v19, %v4012_v46 }
 0x111   : > { %v431_v28 = vadd.s32 176, %v3965_v1  ;;  %v2236_v52 = vadd.f32 %v2204_v48, %v2136_v32  ;;  %v1672_v55 = vadd.f32 %v4269_v4, %v1282_v56  ;;  %v1986_v44 = vsel %vm862_vm10, %v4081_v17, 0.0 }
 0x112   : > { %v571_v22 = vand.u32 15, %v427_v29  ;;  %v2394_v16 = vsel %vm2330_vm12, %v2298_v38, %v2362_v15  ;;  %v1644_v27 = vmul.f32 %v4054_v2, %v1519_v13  ;;  %v4475_v53 = vmul.f32 %v4106_v31, %v1519_v13 }
 0x113   : > { %v599_v3 = vand.u32 15, %v431_v28  ;;  %3129 = vmatmul.mubr.f32.vlgmr.msra.gmra.mrb[0].mxu0 %v2394_v16  ;;  %v2275_v23 = vmul.f32 %v4234_v34, %v2236_v52  ;;  %v1286_v63 = vadd.f32 %v1254_v57, %v1187_v62  ;;  %v1779_v48 = vadd.f32 %v1747_v59, %v1672_v55 }
 0x114   : > { %v846_v32 = vadd.s32 4294967295, %v571_v22  ;;  %v2022_v4 = vmul.f32 %v4118_v37, %v1986_v44  ;;  %v2189_v17 = vmul.f32 %v4155_v7, %v1519_v13  ;;  %v1266_v29 = vmul.f32 %v4042_v61, %v4124_v51 }
 0x115   : > { %v4483_v42 = vadd.s32 4294967295, %v599_v3  ;;  %v2314_v38 = vadd.f32 %v4260_v54, %v2275_v23  ;;  %v1847_v56 = vadd.f32 %v1815_v33, %v1779_v48  ;;  %v1550_v15 = vrot.slane %v4478_v40, 1  ;;  %v4516_v48 = vld [vmem:[%s3947_s22 + $0x30] sm:$0xff] }
 0x116   : > { %vm878_vm13 = vcmp.ge.s32.totalorder %v846_v32, 0  ;;  %v412_v13 = vadd.s32 24, %v3965_v1  ;;  %v4499_v59 = vadd.f32 %v1644_v27, %v1286_v63  ;;  %v5831_v16 = vrot.slane %v4152_v20, 1 }
 0x117   : > { %vm882_vm14 = vcmp.ge.s32.totalorder %v4483_v42, 0  ;;  %v1163_v22 = vsel %vm878_vm13, %v4185_v49, 0.0  ;;  %v1727_v57 = vsel %vm878_vm13, %v4193_v11, 0.0  ;;  %vm2346_vm15 = vcmp.gt.f32.partialorder %v2314_v38, 0.0 }
 0x118   : > { %v2378_v62 = vmul.f32 0.01, %v2314_v38  ;;  %v1952_v51 = vadd.f32 %v4282_v58, %v1847_v56  ;;  %v1167_v33 = vsel %vm882_vm14, %v4219_v0, 0.0  ;;  %v1199_v28 = vmul.f32 %v4039_v60, %v1163_v22 }
 0x119   : > { %v1203_v52 = vmul.f32 %v4039_v60, %v1167_v33  ;;  %v1270_v11 = vmul.f32 %v4042_v61, %v4152_v20  ;;  %v1551_v58 = vsel %vm1505_vm2, %v5831_v16, %v1550_v15  ;;  %v1831_v3 = vmul.f32 %v4098_v26, %v4141_v8 }
 0x11a   : > { %v2410_v55 = vsel %vm2346_vm15, %v2314_v38, %v2378_v62  ;;  %v2054_v44 = vadd.f32 %v2022_v4, %v1952_v51  ;;  %v1298_v63 = vadd.f32 %v1266_v29, %v1199_v28  ;;  %v1763_v27 = vmul.f32 %v4095_v25, %v1727_v57 }
 0x11b   : > { %3153 = vmatmul.mubr.f32.vlgmr.msra.gmra.mrb[0].mxu1 %v2410_v55  ;;  %v2106_v23 = vmul.f32 %v4149_v19, %v4152_v20  ;;  %v466_v38 = vand.u32 15, %v412_v13  ;;  %v2002_v56 = vsel %vm878_vm13, %v4219_v0, 0.0  ;;  %v1064_v22 = vrot.slane %v4418_v21, 7 }
 0x11c   : > { %v2121_v4 = vadd.f32 %v2090_v12, %v2054_v44  ;;  %v1251_v62 = vmul.f32 %v4042_v61, %v3995_v39  ;;  %v1302_v8 = vadd.f32 %v1270_v11, %v1203_v52  ;;  %v1660_v29 = vmul.f32 %v4054_v2, %v1551_v58 }
 0x11d   : > { %v1688_v57 = vadd.f32 %v4291_v41, %v1298_v63  ;;  %v1315_v51 = vadd.s32 1, %v466_v38  ;;  %v4526_v28 = vmul.f32 %v4106_v31, %v1551_v58  ;;  %v2205_v12 = vmul.f32 %v4155_v7, %v1551_v58 }
 0x11e   : > { %v2221_v33 = vadd.f32 %v2189_v17, %v2121_v4  ;;  %v1520_v32 = vrot.slane %v4516_v48, 1  ;;  %v2038_v13 = vmul.f32 %v4118_v37, %v2002_v56  ;;  %v1283_v55 = vadd.f32 %v1251_v62, %v4333_v6 }
 0x11f   : > { %v1795_v0 = vadd.f32 %v1763_v27, %v1688_v57  ;;  %vm1379_vm1 = vcmp.lt.s32.totalorder %v1315_v51, 16  ;;  %v5832_v41 = vrot.slane %v4012_v46, 7  ;;  %v4542_v44 = vadd.f32 %v1660_v29, %v1302_v8  ;;  %v4563_v29 = vld [vmem:[%s3947_s22 + $0xb0] sm:$0xff] }
 0x120   : > { %v2260_v39 = vmul.f32 %v4234_v34, %v2221_v33  ;;  %v1605_v52 = vsel %vm1379_vm1, %v4326_v9, 0.0  ;;  %v1885_v11 = vsel %vm1379_vm1, %v4349_v43, 0.0  ;;  %v1816_v58 = vmul.f32 %v4098_v26, %v4009_v45 }
 0x121   : > { %v1065_v17 = vsel %vm1051_vm0, %v5832_v41, %v1064_v22  ;;  %v1863_v16 = vadd.f32 %v1831_v3, %v1795_v0  ;;  %v1641_v6 = vmul.f32 %v4054_v2, %v1605_v52  ;;  %v5833_v27 = vrot.slane %v4418_v21, 1 }
 0x122   : > { %v2299_v63 = vadd.f32 %v4260_v54, %v2260_v39  ;;  %v428_v9 = vadd.s32 152, %v3965_v1  ;;  %v5748_v4 = vrot.slane %v4478_v40, 7  ;;  %v4559_v56 = vmul.f32 %v4039_v60, %v1065_v17 }
 0x123   : > { %v4553_v38 = vsel %vm1505_vm2, %v5833_v27, %v1520_v32  ;;  %v1968_v3 = vadd.f32 %v4296_v30, %v1863_v16  ;;  %v1673_v62 = vadd.f32 %v1641_v6, %v1283_v55  ;;  %v1921_v8 = vmul.f32 %v4106_v31, %v1885_v11 }
 0x124   : > { %vm2331_vm4 = vcmp.gt.f32.partialorder %v2299_v63, 0.0  ;;  %v2363_v57 = vmul.f32 0.01, %v2299_v63  ;;  %v578_v33 = vand.u32 15, %v428_v9  ;;  %v1200_v0 = vmul.f32 %v4039_v60, %v4365_v10 }
 0x125   : > { %v2070_v39 = vadd.f32 %v2038_v13, %v1968_v3  ;;  %v1780_v41 = vadd.f32 %v4408_v24, %v1673_v62  ;;  %v2154_v30 = vsel %vm1379_vm1, %v4553_v38, 0.0  ;;  %v1267_v52 = vmul.f32 %v4042_v61, %v4138_v5 }
 0x126   : > { %v2395_v55 = vsel %vm2331_vm4, %v2299_v63, %v2363_v57  ;;  %v5834_v11 = vrot.slane %v4152_v20, 7  ;;  %v1331_v6 = vadd.s32 1, %v578_v33  ;;  %v5747_v27 = vrot.slane %v4563_v29, 1 }
 0x127   : > { %3131 = vmatprep.mubr.f32.mxu0 %v2395_v55  ;;  %v2137_v13 = vadd.f32 %v2106_v23, %v2070_v39  ;;  %v4581_v24 = vmul.f32 %v4095_v25, %v1065_v17  ;;  %v1848_v51 = vadd.f32 %v1816_v58, %v1780_v41  ;;  %v2023_v9 = vmul.f32 %v4118_v37, %v1065_v17 }
 0x128   : > { %v4577_v16 = vsel %vm1051_vm0, %v5834_v11, %v5748_v4  ;;  %v2091_v5 = vmul.f32 %v4149_v19, %v4418_v21  ;;  %v2190_v63 = vmul.f32 %v4155_v7, %v2154_v30  ;;  %v1299_v3 = vadd.f32 %v1267_v52, %v1200_v0  ;;  %v4608_v30 = vld [vmem:[%s3947_s22 + $0x38] sm:$0xff] }
 0x129   : > { %vm1395_vm6 = vcmp.lt.s32.totalorder %v1331_v6, 16  ;;  %v2237_v62 = vadd.f32 %v2205_v12, %v2137_v13  ;;  %v1953_v57 = vadd.f32 %v1921_v8, %v1848_v51  ;;  %v4589_v33 = vmul.f32 %v4039_v60, %v4577_v16 }
 0x12a   : > { %v1621_v23 = vsel %vm1395_vm6, %v4397_v36, 0.0  ;;  %v4598_v17 = vsel %vm1505_vm2, %v1550_v15, %v5747_v27  ;;  %v1832_v12 = vmul.f32 %v4098_v26, %v4170_v35  ;;  %v417_v8 = vadd.s32 64, %v3965_v1 }
 0x12b   : > { %v1657_v58 = vmul.f32 %v4054_v2, %v1621_v23  ;;  %v2276_v0 = vmul.f32 %v4234_v34, %v2237_v62  ;;  %v2055_v39 = vadd.f32 %v2023_v9, %v1953_v57  ;;  %v1901_v41 = vsel %vm1395_vm6, %v4427_v50, 0.0 }
 0x12c   : > { %v1066_v52 = vrot.slane %v4516_v48, 7  ;;  %v2039_v15 = vmul.f32 %v4118_v37, %v4577_v16  ;;  %v2107_v11 = vmul.f32 %v4149_v19, %v4478_v40  ;;  %v501_v13 = vand.u32 15, %v417_v8 }
 0x12d   : > { %v1689_v55 = vadd.f32 %v1657_v58, %v1299_v3  ;;  %v2315_v51 = vadd.f32 %v4260_v54, %v2276_v0  ;;  %v2122_v23 = vadd.f32 %v2091_v5, %v2055_v39  ;;  %v2170_v9 = vsel %vm1395_vm6, %v4598_v17, 0.0 }
 0x12e   : > { %v1817_v62 = vmul.f32 %v4098_v26, %v4012_v46  ;;  %v1937_v3 = vmul.f32 %v4106_v31, %v1901_v41  ;;  %v4622_v58 = vadd.s32 4294967295, %v501_v13  ;;  %v5751_v27 = vrot.slane %v4608_v30, 1 }
 0x12f   : > { %v1796_v57 = vadd.f32 %v4436_v14, %v1689_v55  ;;  %vm2347_vm7 = vcmp.gt.f32.partialorder %v2315_v51, 0.0  ;;  %v2379_v4 = vmul.f32 0.01, %v2315_v51  ;;  %v2222_v8 = vadd.f32 %v2190_v63, %v2122_v23 }
 0x130   : > { %v1067_v6 = vsel %vm1051_vm0, %v1064_v22, %v1066_v52  ;;  %v2206_v46 = vmul.f32 %v4155_v7, %v2170_v9  ;;  %vm868_vm8 = vcmp.ge.s32.totalorder %v4622_v58, 0  ;;  %v1849_v14 = vadd.f32 %v1817_v62, %v4278_v47 }
 0x131   : > { %v1864_v5 = vadd.f32 %v1832_v12, %v1796_v57  ;;  %v2411_v0 = vsel %vm2347_vm7, %v2315_v51, %v2379_v4  ;;  %v2261_v39 = vmul.f32 %v4234_v34, %v2222_v8  ;;  %v1256_v63 = vmul.f32 %v4042_v61, %v4516_v48 }
 0x132   : > { %v1988_v55 = vsel %vm864_vm3, %v1067_v6, 0.0  ;;  %3155 = vmatprep.mubr.f32.mxu1 %v2411_v0  ;;  %v1153_v22 = vsel %vm868_vm8, %v1067_v6, 0.0  ;;  %v1954_v12 = vadd.f32 %v4475_v53, %v1849_v14  ;;  %v1523_v4 = vsel %vm1505_vm2, %v1520_v32, %v5751_v27  ;;  %v4653_v53 = vld [vmem:[%s3947_s22 + $0xb8] sm:$0xff] }
 0x133   : > { %v1969_v13 = vadd.f32 %v1937_v3, %v1864_v5  ;;  %v2024_v23 = vmul.f32 %v4118_v37, %v1988_v55  ;;  %v2300_v47 = vadd.f32 %v4260_v54, %v2261_v39  ;;  %v2092_v51 = vmul.f32 %v4149_v19, %v4516_v48 }
 0x134   : > { %v433_v9 = vadd.s32 192, %v3965_v1  ;;  %v2191_v3 = vmul.f32 %v4155_v7, %v1523_v4  ;;  %v5749_v8 = vrot.slane %v4563_v29, 7  ;;  %v1189_v14 = vmul.f32 %v4039_v60, %v1153_v22 }
 0x135   : > { %v2071_v62 = vadd.f32 %v2039_v15, %v1969_v13  ;;  %v2056_v57 = vadd.f32 %v2024_v23, %v1954_v12  ;;  %vm2332_vm3 = vcmp.gt.f32.partialorder %v2300_v47, 0.0  ;;  %v2364_v5 = vmul.f32 0.01, %v2300_v47 }
 0x136   : > { %v613_v0 = vand.u32 15, %v433_v9  ;;  %v4659_v32 = vmul.f32 %v4095_v25, %v4577_v16  ;;  %v4663_v15 = vsel %vm866_vm11, %v1067_v6, 0.0  ;;  %v5836_v12 = vrot.slane %v4478_v40, 7 }
 0x137   : > { %v2138_v39 = vadd.f32 %v2107_v11, %v2071_v62  ;;  %v2123_v41 = vadd.f32 %v2092_v51, %v2056_v57  ;;  %v2396_v55 = vsel %vm2332_vm3, %v2300_v47, %v2364_v5  ;;  %v5750_v23 = vrot.slane %v4653_v53, 1 }
 0x138   : > { %v4665_v13 = vadd.s32 4294967295, %v613_v0  ;;  %v1099_v22 = vsel %vm1051_vm0, %v5836_v12, %v5749_v8  ;;  %3132 = vmatmul.mubr.f32.gmra.mrb[2].mxu0 %v2396_v55  ;;  %v1833_v11 = vmul.f32 %v4098_v26, %v4152_v20  ;;  %v1288_v47 = vadd.f32 %v1256_v63, %v1189_v14  ;;  %v5839_v0 = vld [vmem:[#allocation30_spill] sm:$0xff] }
 0x139   : > { %v2238_v16 = vadd.f32 %v2206_v46, %v2138_v39  ;;  %v2223_v9 = vadd.f32 %v2191_v3, %v2123_v41  ;;  %v2004_v51 = vsel %vm880_vm5, %v1099_v22, 0.0  ;;  %v1646_v62 = vmul.f32 %v4054_v2, %v1523_v4 }
 0x13a   : > { %vm884_vm9 = vcmp.ge.s32.totalorder %v4665_v13, 0  ;;  %v1272_v57 = vmul.f32 %v4042_v61, %v4563_v29  ;;  %v5838_v20 = vrot.slane %v4563_v29, 1  ;;  %v1865_v39 = vadd.f32 %v1833_v11, %v5839_v0  ;;  %v4703_v0 = vld [vmem:[%s3947_s22 + $0x40] sm:$0xff] }
 0x13b   : > { %v2277_v5 = vmul.f32 %v4234_v34, %v2238_v16  ;;  %v2262_v46 = vmul.f32 %v4234_v34, %v2223_v9  ;;  %v1169_v3 = vsel %vm884_vm9, %v1099_v22, 0.0  ;;  %v2040_v41 = vmul.f32 %v4118_v37, %v2004_v51 }
 0x13c   : > { %v1555_v63 = vsel %vm1505_vm2, %v5838_v20, %v5750_v23  ;;  %v1205_v14 = vmul.f32 %v4039_v60, %v1169_v3  ;;  %v2108_v55 = vmul.f32 %v4149_v19, %v4563_v29  ;;  %v414_v9 = vadd.s32 40, %v3965_v1 }
 0x13d   : > { %v2316_v12 = vadd.f32 %v4260_v54, %v2277_v5  ;;  %v2301_v16 = vadd.f32 %v4260_v54, %v2262_v46  ;;  %v5753_v6 = vrot.slane %v4608_v30, 7  ;;  %v1662_v20 = vmul.f32 %v4054_v2, %v1555_v63 }
 0x13e   : > { %v1304_v8 = vadd.f32 %v1272_v57, %v1205_v14  ;;  %v1970_v3 = vadd.f32 %v4526_v28, %v1865_v39  ;;  %v2207_v11 = vmul.f32 %v4155_v7, %v1555_v63  ;;  %v480_v27 = vand.u32 15, %v414_v9 }
 0x13f   : > { %vm2348_vm5 = vcmp.gt.f32.partialorder %v2316_v12, 0.0  ;;  %v2380_v51 = vmul.f32 0.01, %v2316_v12  ;;  %vm2333_vm10 = vcmp.gt.f32.partialorder %v2301_v16, 0.0  ;;  %v2365_v23 = vmul.f32 0.01, %v2301_v16 }
 0x140   : > { %v2072_v5 = vadd.f32 %v2040_v41, %v1970_v3  ;;  %v1069_v57 = vsel %vm1051_vm0, %v1066_v52, %v5753_v6  ;;  %v1253_v46 = vmul.f32 %v4042_v61, %v4009_v45  ;;  %v4713_v14 = vmul.f32 %v4106_v31, %v1523_v4 }
 0x141   : > { %v2412_v28 = vsel %vm2348_vm5, %v2316_v12, %v2380_v51  ;;  %v2397_v39 = vsel %vm2333_vm10, %v2301_v16, %v2365_v23  ;;  %v5754_v36 = vrot.slane %v4703_v0, 1  ;;  %v4716_v41 = vadd.f32 %v1646_v62, %v1288_v47  ;;  %v5840_v47 = vld [vmem:[#allocation31_spill] sm:$0xff]  ;;  %v4733_v16 = vld [vmem:[%s3947_s22 + $0xc0] sm:$0xff] }
 0x142   : > { %3156 = vmatmul.mubr.f32.gmra.mrb[2].mxu1 %v2412_v28  ;;  %3134 = vmatprep.mubr.f32.mxu0 %v2397_v39  ;;  %v4720_v9 = vsel %vm882_vm14, %v1099_v22, 0.0  ;;  %v2139_v52 = vadd.f32 %v2108_v55, %v2072_v5  ;;  %v1317_v3 = vadd.s32 1, %v480_v27  ;;  %v4722_v6 = vadd.f32 %v1662_v20, %v1304_v8 }
 0x143   : > { %v4725_v45 = vmul.f32 %v4106_v31, %v1555_v63  ;;  %v4728_v4 = vmul.f32 %v4039_v60, %v1069_v57  ;;  %v430_v23 = vadd.s32 168, %v3965_v1  ;;  %v1285_v62 = vadd.f32 %v1253_v46, %v5840_v47 }
 0x144   : > { %v2239_v12 = vadd.f32 %v2207_v11, %v2139_v52  ;;  %vm1381_vm12 = vcmp.lt.s32.totalorder %v1317_v3, 16  ;;  %v5755_v22 = vrot.slane %v4653_v53, 7  ;;  %v5841_v27 = vrot.slane %v4608_v30, 1 }
 0x145   : > { %v1607_v63 = vsel %vm1381_vm12, %v4349_v43, 0.0  ;;  %v592_v55 = vand.u32 15, %v430_v23  ;;  %v1269_v20 = vmul.f32 %v4042_v61, %v4170_v35  ;;  %v4750_v5 = vmul.f32 %v4095_v25, %v1069_v57 }
 0x146   : > { %v4741_v8 = vsel %vm1505_vm2, %v5841_v27, %v5754_v36  ;;  %v2278_v11 = vmul.f32 %v4234_v34, %v2239_v12  ;;  %v1643_v51 = vmul.f32 %v4054_v2, %v1607_v63  ;;  %v1887_v46 = vsel %vm1381_vm12, %v4553_v38, 0.0 }
 0x147   : > { %v1818_v28 = vmul.f32 %v4098_v26, %v4418_v21  ;;  %v2025_v39 = vmul.f32 %v4118_v37, %v1069_v57  ;;  %v1333_v43 = vadd.s32 1, %v592_v55  ;;  %v2156_v12 = vsel %vm1381_vm12, %v4741_v8, 0.0  ;;  %v5843_v55 = vld [vmem:[#allocation36_spill] sm:$0xff] }
 0x148   : > { %v2317_v35 = vadd.f32 %v4260_v54, %v2278_v11  ;;  %v1675_v23 = vadd.f32 %v1643_v51, %v1285_v62  ;;  %v5842_v47 = vrot.slane %v4563_v29, 7  ;;  %v1923_v63 = vmul.f32 %v4106_v31, %v1887_v46 }
 0x149   : > { %v2093_v57 = vmul.f32 %v4149_v19, %v4608_v30  ;;  %v1301_v36 = vadd.f32 %v1269_v20, %v5843_v55  ;;  %vm1397_vm13 = vcmp.lt.s32.totalorder %v1333_v43, 16  ;;  %v2192_v51 = vmul.f32 %v4155_v7, %v2156_v12 }
 0x14a   : > { %v1101_v27 = vsel %vm1051_vm0, %v5842_v47, %v5755_v22  ;;  %vm2349_vm15 = vcmp.gt.f32.partialorder %v2317_v35, 0.0  ;;  %v2381_v11 = vmul.f32 0.01, %v2317_v35  ;;  %v1782_v62 = vadd.f32 %v4581_v24, %v1675_v23 }
 0x14b   : > { %v1623_v3 = vsel %vm1397_vm13, %v4427_v50, 0.0  ;;  %v4774_v52 = vmul.f32 %v4039_v60, %v1101_v27  ;;  %v5845_v46 = vrot.slane %v4733_v16, 1  ;;  %v5846_v47 = vrot.slane %v4653_v53, 1 }
 0x14c   : > { %v1659_v20 = vmul.f32 %v4054_v2, %v1623_v3  ;;  %v2413_v43 = vsel %vm2349_vm15, %v2317_v35, %v2381_v11  ;;  %v1850_v55 = vadd.f32 %v1818_v28, %v1782_v62  ;;  %v1834_v50 = vmul.f32 %v4098_v26, %v4478_v40  ;;  %v4794_v3 = vld [vmem:[%s3947_s22 + $0x48] sm:$0xff] }
 0x14d   : > { %5844 = vst [vmem:[#allocation21_spill] sm:$0xff] %v4774_v52  ;;  %v4781_v22 = vsel %vm1505_vm2, %v5846_v47, %v5845_v46  ;;  %v1903_v24 = vsel %vm1397_vm13, %v4598_v17, 0.0  ;;  %3158 = vmatprep.mubr.f32.mxu1 %v2413_v43  ;;  %v419_v10 = vadd.s32 80, %v3965_v1  ;;  %v4791_v46 = vmul.f32 %v4095_v25, %v1101_v27 }
 0x14e   : > { %v1691_v23 = vadd.f32 %v1659_v20, %v1301_v36  ;;  %v2172_v12 = vsel %vm1397_vm13, %v4781_v22, 0.0  ;;  %v1955_v52 = vadd.f32 %v1923_v63, %v1850_v55  ;;  %v1751_v28 = vmul.f32 %v4095_v25, %v4663_v15 }
 0x14f   : > { %v1819_v35 = vmul.f32 %v4098_v26, %v4516_v48  ;;  %v1939_v11 = vmul.f32 %v4106_v31, %v1903_v24  ;;  %v2041_v62 = vmul.f32 %v4118_v37, %v1101_v27  ;;  %v515_v47 = vand.u32 15, %v419_v10 }
 0x150   : > { %v1798_v36 = vadd.f32 %v4659_v32, %v1691_v23  ;;  %v2057_v63 = vadd.f32 %v2025_v39, %v1955_v52  ;;  %v2109_v20 = vmul.f32 %v4149_v19, %v4653_v53  ;;  %v2208_v43 = vmul.f32 %v4155_v7, %v2172_v12  ;;  %v4822_v12 = vld [vmem:[%s3947_s22 + $0xc8] sm:$0xff] }
 0x151   : > { %v1783_v55 = vadd.f32 %v1751_v28, %v4499_v59  ;;  %v4807_v49 = vadd.s32 4294967295, %v515_v47  ;;  %v5847_v48 = vrot.slane %v4703_v0, 7  ;;  %v5848_v32 = vrot.slane %v4608_v30, 7 }
 0x152   : > { %v1866_v15 = vadd.f32 %v1834_v50, %v1798_v36  ;;  %v1526_v10 = vrot.slane %v4794_v3, 1  ;;  %v2124_v27 = vadd.f32 %v2093_v57, %v2057_v63  ;;  %v1258_v39 = vmul.f32 %v4042_v61, %v4703_v0 }
 0x153   : > { %v1071_v24 = vsel %vm1051_vm0, %v5848_v32, %v5847_v48  ;;  %v1851_v52 = vadd.f32 %v1819_v35, %v1783_v55  ;;  %vm870_vm1 = vcmp.ge.s32.totalorder %v4807_v49, 0  ;;  %v435_v28 = vadd.s32 208, %v3965_v1 }
 0x154   : > { %v1990_v23 = vsel %vm866_vm11, %v1071_v24, 0.0  ;;  %v1971_v59 = vadd.f32 %v1939_v11, %v1866_v15  ;;  %v2224_v36 = vadd.f32 %v2192_v51, %v2124_v27  ;;  %v2094_v57 = vmul.f32 %v4149_v19, %v4703_v0 }
 0x155   : > { %v2026_v50 = vmul.f32 %v4118_v37, %v1990_v23  ;;  %v1956_v47 = vadd.f32 %v4713_v14, %v1851_v52  ;;  %v5759_v35 = vrot.slane %v4733_v16, 7  ;;  %v1155_v18 = vsel %vm870_vm1, %v1071_v24, 0.0 }
 0x156   : > { %v2073_v63 = vadd.f32 %v2041_v62, %v1971_v59  ;;  %v5849_v11 = vrot.slane %v4703_v0, 1  ;;  %v627_v15 = vand.u32 15, %v435_v28  ;;  %v2263_v51 = vmul.f32 %v4234_v34, %v2224_v36 }
 0x157   : > { %v2058_v48 = vadd.f32 %v2026_v50, %v1956_v47  ;;  %v5758_v32 = vrot.slane %v4822_v12, 1  ;;  %v4841_v62 = vsel %vm868_vm8, %v1071_v24, 0.0  ;;  %v5850_v23 = vrot.slane %v4653_v53, 7 }
 0x158   : > { %v1527_v55 = vsel %vm1505_vm2, %v5849_v11, %v1526_v10  ;;  %v2140_v27 = vadd.f32 %v2109_v20, %v2073_v63  ;;  %v4843_v52 = vadd.s32 4294967295, %v627_v15  ;;  %v2302_v28 = vadd.f32 %v4260_v54, %v2263_v51 }
 0x159   : > { %v2193_v14 = vmul.f32 %v4155_v7, %v1527_v55  ;;  %v1103_v59 = vsel %vm1051_vm0, %v5850_v23, %v5759_v35  ;;  %v1191_v50 = vmul.f32 %v4039_v60, %v1155_v18  ;;  %v2125_v36 = vadd.f32 %v2094_v57, %v2058_v48 }
 0x15a   : > { %v1767_v20 = vmul.f32 %v4095_v25, %v4720_v9  ;;  %v2240_v47 = vadd.f32 %v2208_v43, %v2140_v27  ;;  %vm886_vm11 = vcmp.ge.s32.totalorder %v4843_v52, 0  ;;  %v1274_v24 = vmul.f32 %v4042_v61, %v4733_v16 }
 0x15b   : > { %v5851_v63 = vrot.slane %v4733_v16, 1  ;;  %vm2334_vm4 = vcmp.gt.f32.partialorder %v2302_v28, 0.0  ;;  %v2366_v15 = vmul.f32 0.01, %v2302_v28  ;;  %v2225_v51 = vadd.f32 %v2193_v14, %v2125_v36 }
 0x15c   : > { %v1171_v57 = vsel %vm886_vm11, %v1103_v59, 0.0  ;;  %v2279_v9 = vmul.f32 %v4234_v34, %v2240_v47  ;;  %v1799_v18 = vadd.f32 %v1767_v20, %v4542_v44  ;;  %v1835_v48 = vmul.f32 %v4098_v26, %v4563_v29 }
 0x15d   : > { %v1559_v11 = vsel %vm1505_vm2, %v5851_v63, %v5758_v32  ;;  %v1207_v43 = vmul.f32 %v4039_v60, %v1171_v57  ;;  %v2398_v27 = vsel %vm2334_vm4, %v2302_v28, %v2366_v15  ;;  %v1648_v23 = vmul.f32 %v4054_v2, %v1527_v55 }
 0x15e   : > { %v2264_v63 = vmul.f32 %v4234_v34, %v2225_v51  ;;  %v2006_v14 = vsel %vm882_vm14, %v1103_v59, 0.0  ;;  %3135 = vmatmul.mubr.f32.gmra.mrb[4].mxu0 %v2398_v27  ;;  %v2318_v36 = vadd.f32 %v4260_v54, %v2279_v9  ;;  %v1290_v47 = vadd.f32 %v1258_v39, %v1191_v50  ;;  %v4882_v27 = vld [vmem:[%s3947_s22 + $0x50] sm:$0xff] }
 0x15f   : > { %v1867_v32 = vadd.f32 %v1835_v48, %v1799_v18  ;;  %v2042_v57 = vmul.f32 %v4118_v37, %v2006_v14  ;;  %v1306_v20 = vadd.f32 %v1274_v24, %v1207_v43  ;;  %v1664_v29 = vmul.f32 %v4054_v2, %v1559_v11 }
 0x160   : > { %v2303_v44 = vadd.f32 %v4260_v54, %v2264_v63  ;;  %v416_v28 = vadd.s32 56, %v3965_v1  ;;  %vm2350_vm6 = vcmp.gt.f32.partialorder %v2318_v36, 0.0  ;;  %v2382_v15 = vmul.f32 0.01, %v2318_v36 }
 0x161   : > { %v1972_v51 = vadd.f32 %v4725_v45, %v1867_v32  ;;  %v2110_v42 = vmul.f32 %v4149_v19, %v4733_v16  ;;  %v1072_v9 = vrot.slane %v4794_v3, 7  ;;  %v2209_v43 = vmul.f32 %v4155_v7, %v1559_v11 }
 0x162   : > { %vm2335_vm14 = vcmp.gt.f32.partialorder %v2303_v44, 0.0  ;;  %v2367_v39 = vmul.f32 0.01, %v2303_v44  ;;  %v494_v50 = vand.u32 15, %v416_v28  ;;  %v2414_v18 = vsel %vm2350_vm6, %v2318_v36, %v2382_v15 }
 0x163   : > { %v2074_v24 = vadd.f32 %v2042_v57, %v1972_v51  ;;  %v1255_v48 = vmul.f32 %v4042_v61, %v4418_v21  ;;  %3159 = vmatmul.mubr.f32.gmra.mrb[4].mxu1 %v2414_v18  ;;  %v5852_v45 = vrot.slane %v4703_v0, 7  ;;  %v5762_v28 = vrot.slane %v4882_v27, 1 }
 0x164   : > { %v2399_v63 = vsel %vm2335_vm14, %v2303_v44, %v2367_v39  ;;  %v1319_v14 = vadd.s32 1, %v494_v50  ;;  %v4894_v35 = vadd.f32 %v1648_v23, %v1290_v47  ;;  %v4897_v36 = vmul.f32 %v4106_v31, %v1527_v55 }
 0x165   : > { %v1073_v32 = vsel %vm1051_vm0, %v5852_v45, %v1072_v9  ;;  %3137 = vmatprep.mubr.f32.mxu0 %v2399_v63  ;;  %v4901_v21 = vsel %vm884_vm9, %v1103_v59, 0.0  ;;  %v2141_v57 = vadd.f32 %v2110_v42, %v2074_v24  ;;  %v4903_v44 = vadd.f32 %v1664_v29, %v1306_v20  ;;  %v4925_v20 = vld [vmem:[%s3947_s22 + $0xd0] sm:$0xff] }
 0x166   : > { %v4906_v15 = vmul.f32 %v4106_v31, %v1559_v11  ;;  %v1287_v51 = vadd.f32 %v1255_v48, %v4559_v56  ;;  %vm1383_vm7 = vcmp.lt.s32.totalorder %v1319_v14, 16  ;;  %v4910_v47 = vmul.f32 %v4039_v60, %v1073_v32 }
 0x167   : > { %v2241_v23 = vadd.f32 %v2209_v43, %v2141_v57  ;;  %v1609_v55 = vsel %vm1383_vm7, %v4553_v38, 0.0  ;;  %v1820_v39 = vmul.f32 %v4098_v26, %v4608_v30  ;;  %v4920_v59 = vsel %vm1505_vm2, %v1526_v10, %v5762_v28 }
 0x168   : > { %v1645_v11 = vmul.f32 %v4054_v2, %v1609_v55  ;;  %v1889_v56 = vsel %vm1383_vm7, %v4741_v8, 0.0  ;;  %v432_v29 = vadd.s32 184, %v3965_v1  ;;  %v4930_v42 = vmul.f32 %v4095_v25, %v1073_v32 }
 0x169   : > { %v2280_v38 = vmul.f32 %v4234_v34, %v2241_v23  ;;  %v2158_v50 = vsel %vm1383_vm7, %v4920_v59, 0.0  ;;  %v5761_v18 = vrot.slane %v4822_v12, 7  ;;  %v2027_v10 = vmul.f32 %v4118_v37, %v1073_v32 }
 0x16a   : > { %v1677_v24 = vadd.f32 %v1645_v11, %v1287_v51  ;;  %v606_v43 = vand.u32 15, %v432_v29  ;;  %v1271_v48 = vmul.f32 %v4042_v61, %v4478_v40  ;;  %v1925_v45 = vmul.f32 %v4106_v31, %v1889_v56 }
 0x16b   : > { %v2319_v63 = vadd.f32 %v4260_v54, %v2280_v38  ;;  %v2095_v34 = vmul.f32 %v4149_v19, %v4794_v3  ;;  %v5760_v14 = vrot.slane %v4925_v20, 1  ;;  %v2194_v51 = vmul.f32 %v4155_v7, %v2158_v50 }
 0x16c   : > { %v1784_v57 = vadd.f32 %v4750_v5, %v1677_v24  ;;  %v1335_v23 = vadd.s32 1, %v606_v43  ;;  %v1836_v32 = vmul.f32 %v4098_v26, %v4653_v53  ;;  %v5853_v54 = vrot.slane %v4733_v16, 7 }
 0x16d   : > { %vm2351_vm3 = vcmp.gt.f32.partialorder %v2319_v63, 0.0  ;;  %v2383_v40 = vmul.f32 0.01, %v2319_v63  ;;  %v421_v11 = vadd.s32 96, %v3965_v1  ;;  %v1303_v5 = vadd.f32 %v1271_v48, %v4589_v33 }
 0x16e   : > { %v1105_v55 = vsel %vm1051_vm0, %v5853_v54, %v5761_v18  ;;  %v1852_v56 = vadd.f32 %v1820_v39, %v1784_v57  ;;  %vm1399_vm5 = vcmp.lt.s32.totalorder %v1335_v23, 16  ;;  %v5763_v29 = vrot.slane %v4882_v27, 7  ;;  %v4966_v39 = vld [vmem:[%s3947_s22 + $0x58] sm:$0xff] }
 0x16f   : > { %v2415_v38 = vsel %vm2351_vm3, %v2319_v63, %v2383_v40  ;;  %v5854_v50 = vrot.slane %v4822_v12, 1  ;;  %v1625_v43 = vsel %vm1399_vm5, %v4598_v17, 0.0  ;;  %v2111_v54 = vmul.f32 %v4149_v19, %v4822_v12 }
 0x170   : > { %3161 = vmatprep.mubr.f32.mxu1 %v2415_v38  ;;  %v1957_v33 = vadd.f32 %v1925_v45, %v1852_v56  ;;  %v4969_v48 = vmul.f32 %v4039_v60, %v1105_v55  ;;  %v1661_v63 = vmul.f32 %v4054_v2, %v1625_v43  ;;  %v4973_v57 = vmul.f32 %v4095_v25, %v1105_v55 }
 0x171   : > { %v4959_v24 = vsel %vm1505_vm2, %v5854_v50, %v5760_v14  ;;  %v1905_v40 = vsel %vm1399_vm5, %v4781_v22, 0.0  ;;  %v529_v50 = vand.u32 15, %v421_v11  ;;  %v1075_v17 = vsel %vm1051_vm0, %v1072_v9, %v5763_v29 }
 0x172   : > { %v1753_v45 = vmul.f32 %v4095_v25, %v4841_v62  ;;  %v2059_v56 = vadd.f32 %v2027_v10, %v1957_v33  ;;  %v1693_v38 = vadd.f32 %v1661_v63, %v1303_v5  ;;  %v5764_v43 = vrot.slane %v4966_v39, 1 }
 0x173   : > { %v1821_v14 = vmul.f32 %v4098_v26, %v4703_v0  ;;  %v2043_v18 = vmul.f32 %v4118_v37, %v1105_v55  ;;  %v4988_v11 = vadd.s32 4294967295, %v529_v50  ;;  %v1992_v9 = vsel %vm868_vm8, %v1075_v17, 0.0 }
 0x174   : > { %v1785_v28 = vadd.f32 %v1753_v45, %v4716_v41  ;;  %v2126_v29 = vadd.f32 %v2095_v34, %v2059_v56  ;;  %v1800_v62 = vadd.f32 %v4791_v46, %v1693_v38  ;;  %v1941_v10 = vmul.f32 %v4106_v31, %v1905_v40  ;;  %v5011_v40 = vld [vmem:[%s3947_s22 + $0xd8] sm:$0xff] }
 0x175   : > { %v1260_v5 = vmul.f32 %v4042_v61, %v4882_v27  ;;  %v2174_v0 = vsel %vm1399_vm5, %v4959_v24, 0.0  ;;  %vm872_vm10 = vcmp.ge.s32.totalorder %v4988_v11, 0  ;;  %v2028_v33 = vmul.f32 %v4118_v37, %v1992_v9 }
 0x176   : > { %v1853_v55 = vadd.f32 %v1821_v14, %v1785_v28  ;;  %v2226_v41 = vadd.f32 %v2194_v51, %v2126_v29  ;;  %v1868_v63 = vadd.f32 %v1836_v32, %v1800_v62  ;;  %v5855_v58 = vrot.slane %v4882_v27, 1  ;;  %v5018_v32 = vld [vmem:[#allocation7] ss:$0 sm:$0xff] }
 0x177   : > { %v2096_v34 = vmul.f32 %v4149_v19, %v4882_v27  ;;  %v1157_v23 = vsel %vm872_vm10, %v1075_v17, 0.0  ;;  %v437_v14 = vadd.s32 224, %v3965_v1  ;;  %v5766_v51 = vrot.slane %v4925_v20, 7 }
 0x178   : > { %v5006_v46 = vsel %vm1505_vm2, %v5855_v58, %v5764_v43  ;;  %v1958_v28 = vadd.f32 %v4897_v36, %v1853_v55  ;;  %v2265_v29 = vmul.f32 %v5018_v32, %v2226_v41  ;;  %v1973_v50 = vadd.f32 %v1941_v10, %v1868_v63  ;;  %v5029_v55 = vld [vmem:[#allocation8] ss:$0 sm:$0xff] }
 0x179   : > { %v2210_v45 = vmul.f32 %v4155_v7, %v2174_v0  ;;  %v5024_v56 = vsel %vm870_vm1, %v1075_v17, 0.0  ;;  %v2195_v9 = vmul.f32 %v4155_v7, %v5006_v46  ;;  %v641_v36 = vand.u32 15, %v437_v14 }
 0x17a   : > { %v2060_v38 = vadd.f32 %v2028_v33, %v1958_v28  ;;  %v5765_v62 = vrot.slane %v5011_v40, 1  ;;  %v2304_v58 = vadd.f32 %v5029_v55, %v2265_v29  ;;  %v2075_v43 = vadd.f32 %v2043_v18, %v1973_v50 }
 0x17b   : > { %v1193_v10 = vmul.f32 %v4039_v60, %v1157_v23  ;;  %v1650_v0 = vmul.f32 %v4054_v2, %v5006_v46  ;;  %v5035_v17 = vadd.s32 4294967295, %v641_v36  ;;  %v5856_v33 = vrot.slane %v4822_v12, 7 }
 0x17c   : > { %v2127_v41 = vadd.f32 %v2096_v34, %v2060_v38  ;;  %v1276_v28 = vmul.f32 %v4042_v61, %v4925_v20  ;;  %vm2336_vm8 = vcmp.gt.f32.partialorder %v2304_v58, 0.0  ;;  %v2368_v14 = vmul.f32 0.01, %v2304_v58 }
 0x17d   : > { %v1107_v63 = vsel %vm1051_vm0, %v5856_v33, %v5766_v51  ;;  %v2142_v18 = vadd.f32 %v2111_v54, %v2075_v43  ;;  %v1769_v23 = vmul.f32 %v4095_v25, %v4901_v21  ;;  %vm888_vm12 = vcmp.ge.s32.totalorder %v5035_v17, 0 }
 0x17e   : > { %v2227_v29 = vadd.f32 %v2195_v9, %v2127_v41  ;;  %v5857_v34 = vrot.slane %v4925_v20, 1  ;;  %v1837_v38 = vmul.f32 %v4098_v26, %v4733_v16  ;;  %v2400_v36 = vsel %vm2336_vm8, %v2304_v58, %v2368_v14 }
 0x17f   : > { %v2242_v33 = vadd.f32 %v2210_v45, %v2142_v18  ;;  %v1173_v54 = vsel %vm888_vm12, %v1107_v63, 0.0  ;;  %v1801_v21 = vadd.f32 %v1769_v23, %v4722_v6  ;;  %3138 = vmatmul.mubr.f32.gmra.mrb[6].mxu0 %v2400_v36  ;;  %v1292_v43 = vadd.f32 %v1260_v5, %v1193_v10  ;;  %v5068_v5 = vld [vmem:[%s3947_s22 + $0x60] sm:$0xff] }
 0x180   : > { %v1563_v50 = vsel %vm1505_vm2, %v5857_v34, %v5765_v62  ;;  %v2266_v9 = vmul.f32 %v5018_v32, %v2227_v29  ;;  %v1209_v41 = vmul.f32 %v4039_v60, %v1173_v54  ;;  %v2008_v34 = vsel %vm884_vm9, %v1107_v63, 0.0 }
 0x181   : > { %v2281_v62 = vmul.f32 %v5018_v32, %v2242_v33  ;;  %v1666_v16 = vmul.f32 %v4054_v2, %v1563_v50  ;;  %v1869_v58 = vadd.f32 %v1837_v38, %v1801_v21  ;;  %v2044_v45 = vmul.f32 %v4118_v37, %v2008_v34 }
 0x182   : > { %v2305_v14 = vadd.f32 %v5029_v55, %v2266_v9  ;;  %v2112_v6 = vmul.f32 %v4149_v19, %v4925_v20  ;;  %v418_v10 = vadd.s32 72, %v3965_v1  ;;  %v5768_v18 = vrot.slane %v4966_v39, 7 }
 0x183   : > { %v2320_v13 = vadd.f32 %v5029_v55, %v2281_v62  ;;  %v1308_v23 = vadd.f32 %v1276_v28, %v1209_v41  ;;  %v1974_v29 = vadd.f32 %v4906_v15, %v1869_v58  ;;  %v2211_v38 = vmul.f32 %v4155_v7, %v1563_v50 }
 0x184   : > { %vm2337_vm9 = vcmp.gt.f32.partialorder %v2305_v14, 0.0  ;;  %v2369_v36 = vmul.f32 0.01, %v2305_v14  ;;  %v508_v33 = vand.u32 15, %v418_v10  ;;  %v1257_v54 = vmul.f32 %v4042_v61, %v4608_v30 }
 0x185   : > { %vm2352_vm13 = vcmp.gt.f32.partialorder %v2320_v13, 0.0  ;;  %v2384_v21 = vmul.f32 0.01, %v2320_v13  ;;  %v2076_v9 = vadd.f32 %v2044_v45, %v1974_v29  ;;  %v5767_v34 = vrot.slane %v5068_v5, 1 }
 0x186   : > { %v5080_v51 = vmul.f32 %v4106_v31, %v5006_v46  ;;  %v2401_v62 = vsel %vm2337_vm9, %v2305_v14, %v2369_v36  ;;  %v5858_v15 = vrot.slane %v4882_v27, 7  ;;  %v1321_v41 = vadd.s32 1, %v508_v33 }
 0x187   : > { %v2416_v58 = vsel %vm2352_vm13, %v2320_v13, %v2384_v21  ;;  %v5087_v10 = vadd.f32 %v1650_v0, %v1292_v43  ;;  %3140 = vmatprep.mubr.f32.mxu0 %v2401_v62  ;;  %v5091_v30 = vsel %vm886_vm11, %v1107_v63, 0.0  ;;  %v2143_v45 = vadd.f32 %v2112_v6, %v2076_v9  ;;  %v5116_v13 = vld [vmem:[%s3947_s22 + $0xe0] sm:$0xff] }
 0x188   : > { %v1077_v28 = vsel %vm1051_vm0, %v5858_v15, %v5768_v18  ;;  %3162 = vmatmul.mubr.f32.gmra.mrb[6].mxu1 %v2416_v58  ;;  %v5093_v46 = vadd.f32 %v1666_v16, %v1308_v23  ;;  %v5096_v14 = vmul.f32 %v4106_v31, %v1563_v50  ;;  %v1289_v29 = vadd.f32 %v1257_v54, %v4728_v4 }
 0x189   : > { %vm1385_vm15 = vcmp.lt.s32.totalorder %v1321_v41, 16  ;;  %v2243_v36 = vadd.f32 %v2211_v38, %v2143_v45  ;;  %v5100_v0 = vmul.f32 %v4039_v60, %v1077_v28  ;;  %v5860_v43 = vrot.slane %v4966_v39, 1 }
 0x18a   : > { %v1611_v16 = vsel %vm1385_vm15, %v4741_v8, 0.0  ;;  %v5112_v50 = vmul.f32 %v4095_v25, %v1077_v28  ;;  %v1891_v4 = vsel %vm1385_vm15, %v4920_v59, 0.0  ;;  %v434_v23 = vadd.s32 200, %v3965_v1 }
 0x18b   : > { %5859 = vst [vmem:[#allocation23_spill] sm:$0xff] %v5100_v0  ;;  %v5107_v63 = vsel %vm1505_vm2, %v5860_v43, %v5767_v34  ;;  %v1647_v6 = vmul.f32 %v4054_v2, %v1611_v16  ;;  %v2282_v38 = vmul.f32 %v5018_v32, %v2243_v36  ;;  %v1822_v33 = vmul.f32 %v4098_v26, %v4794_v3  ;;  %v5862_v34 = vld [vmem:[#allocation21_spill] sm:$0xff] }
 0x18c   : > { %v2160_v54 = vsel %vm1385_vm15, %v5107_v63, 0.0  ;;  %v5770_v8 = vrot.slane %v5011_v40, 7  ;;  %v2029_v9 = vmul.f32 %v4118_v37, %v1077_v28  ;;  %v620_v62 = vand.u32 15, %v434_v23 }
 0x18d   : > { %v1679_v21 = vadd.f32 %v1647_v6, %v1289_v29  ;;  %v1273_v15 = vmul.f32 %v4042_v61, %v4653_v53  ;;  %v2321_v41 = vadd.f32 %v5029_v55, %v2282_v38  ;;  %v1927_v58 = vmul.f32 %v4106_v31, %v1891_v4 }
 0x18e   : > { %v2097_v45 = vmul.f32 %v4149_v19, %v4966_v39  ;;  %v5769_v36 = vrot.slane %v5116_v13, 1  ;;  %v2196_v16 = vmul.f32 %v4155_v7, %v2160_v54  ;;  %v1337_v29 = vadd.s32 1, %v620_v62 }
 0x18f   : > { %v1786_v43 = vadd.f32 %v4930_v42, %v1679_v21  ;;  %v1838_v28 = vmul.f32 %v4098_v26, %v4822_v12  ;;  %vm2353_vm4 = vcmp.gt.f32.partialorder %v2321_v41, 0.0  ;;  %v2385_v6 = vmul.f32 0.01, %v2321_v41 }
 0x190   : > { %v5861_v53 = vrot.slane %v4925_v20, 7  ;;  %v423_v23 = vadd.s32 112, %v3965_v1  ;;  %v1305_v18 = vadd.f32 %v1273_v15, %v5862_v34  ;;  %vm1401_vm6 = vcmp.lt.s32.totalorder %v1337_v29, 16 }
 0x191   : > { %v1854_v38 = vadd.f32 %v1822_v33, %v1786_v43  ;;  %v5771_v42 = vrot.slane %v5068_v5, 7  ;;  %v2417_v54 = vsel %vm2353_vm4, %v2321_v41, %v2385_v6  ;;  %v5863_v21 = vrot.slane %v5011_v40, 1 }
 0x192   : > { %v1109_v4 = vsel %vm1051_vm0, %v5861_v53, %v5770_v8  ;;  %v1627_v53 = vsel %vm1401_vm6, %v4781_v22, 0.0  ;;  %v2113_v33 = vmul.f32 %v4149_v19, %v5011_v40  ;;  %3164 = vmatprep.mubr.f32.mxu1 %v2417_v54  ;;  %v1907_v6 = vsel %vm1401_vm6, %v4959_v24, 0.0  ;;  %v5172_v8 = vld [vmem:[%s3947_s22 + $0x68] sm:$0xff] }
 0x193   : > { %v5149_v62 = vsel %vm1505_vm2, %v5863_v21, %v5769_v36  ;;  %v1959_v34 = vadd.f32 %v1927_v58, %v1854_v38  ;;  %v5156_v15 = vmul.f32 %v4039_v60, %v1109_v4  ;;  %v1663_v41 = vmul.f32 %v4054_v2, %v1627_v53 }
 0x194   : > { %v5160_v43 = vmul.f32 %v4095_v25, %v1109_v4  ;;  %v543_v21 = vand.u32 15, %v423_v23  ;;  %v5865_v22 = vrot.slane %v4966_v39, 7  ;;  %v1755_v58 = vmul.f32 %v4095_v25, %v5024_v56 }
 0x195   : > { %5864 = vst [vmem:[#allocation30_spill] sm:$0xff] %v5156_v15  ;;  %v2061_v38 = vadd.f32 %v2029_v9, %v1959_v34  ;;  %v1695_v54 = vadd.f32 %v1663_v41, %v1305_v18  ;;  %v5772_v53 = vrot.slane %v5172_v8, 1  ;;  %v1823_v15 = vmul.f32 %v4098_v26, %v4882_v27 }
 0x196   : > { %v1079_v36 = vsel %vm1051_vm0, %v5865_v22, %v5771_v42  ;;  %v2176_v23 = vsel %vm1401_vm6, %v5149_v62, 0.0  ;;  %v5179_v0 = vadd.s32 4294967295, %v543_v21  ;;  %v1787_v22 = vadd.f32 %v1755_v58, %v4894_v35 }
 0x197   : > { %v1994_v56 = vsel %vm870_vm1, %v1079_v36, 0.0  ;;  %v2128_v9 = vadd.f32 %v2097_v45, %v2061_v38  ;;  %v1802_v18 = vadd.f32 %v4973_v57, %v1695_v54  ;;  %v1943_v34 = vmul.f32 %v4106_v31, %v1907_v6  ;;  %v5198_v6 = vld [vmem:[%s3947_s22 + $0xe8] sm:$0xff] }
 0x198   : > { %v2045_v41 = vmul.f32 %v4118_v37, %v1109_v4  ;;  %vm874_vm14 = vcmp.ge.s32.totalorder %v5179_v0, 0  ;;  %v1262_v27 = vmul.f32 %v4042_v61, %v5068_v5  ;;  %v1855_v29 = vadd.f32 %v1823_v15, %v1787_v22 }
 0x199   : > { %v2030_v21 = vmul.f32 %v4118_v37, %v1994_v56  ;;  %v2228_v42 = vadd.f32 %v2196_v16, %v2128_v9  ;;  %v1870_v35 = vadd.f32 %v1838_v28, %v1802_v18  ;;  %v2212_v49 = vmul.f32 %v4155_v7, %v2176_v23 }
 0x19a   : > { %v5866_v57 = vrot.slane %v5068_v5, 1  ;;  %v1960_v4 = vadd.f32 %v5080_v51, %v1855_v29  ;;  %v2098_v58 = vmul.f32 %v4149_v19, %v5068_v5  ;;  %v439_v15 = vadd.s32 240, %v3965_v1 }
 0x19b   : > { %v5774_v16 = vrot.slane %v5116_v13, 7  ;;  %v2267_v28 = vmul.f32 %v5018_v32, %v2228_v42  ;;  %v1975_v38 = vadd.f32 %v1943_v34, %v1870_v35  ;;  %v1159_v54 = vsel %vm874_vm14, %v1079_v36, 0.0 }
 0x19c   : > { %v1535_v45 = vsel %vm1505_vm2, %v5866_v57, %v5772_v53  ;;  %v5210_v23 = vsel %vm872_vm10, %v1079_v36, 0.0  ;;  %v2062_v22 = vadd.f32 %v2030_v21, %v1960_v4  ;;  %v655_v56 = vand.u32 15, %v439_v15 }
 0x19d   : > { %v2197_v51 = vmul.f32 %v4155_v7, %v1535_v45  ;;  %v5773_v9 = vrot.slane %v5198_v6, 1  ;;  %v2306_v18 = vadd.f32 %v5029_v55, %v2267_v28  ;;  %v2077_v29 = vadd.f32 %v2045_v41, %v1975_v38 }
 0x19e   : > { %v1652_v57 = vmul.f32 %v4054_v2, %v1535_v45  ;;  %v5217_v42 = vmul.f32 %v4106_v31, %v1535_v45  ;;  %v1195_v34 = vmul.f32 %v4039_v60, %v1159_v54  ;;  %v2129_v35 = vadd.f32 %v2098_v58, %v2062_v22 }
 0x19f   : > { %v5220_v53 = vadd.s32 4294967295, %v655_v56  ;;  %v5867_v36 = vrot.slane %v5011_v40, 7  ;;  %vm2338_vm1 = vcmp.gt.f32.partialorder %v2306_v18, 0.0  ;;  %v2370_v4 = vmul.f32 0.01, %v2306_v18 }
 0x1a0   : > { %v2144_v15 = vadd.f32 %v2113_v33, %v2077_v29  ;;  %v1771_v41 = vmul.f32 %v4095_v25, %v5091_v30  ;;  %v2229_v28 = vadd.f32 %v2197_v51, %v2129_v35  ;;  %v5868_v45 = vrot.slane %v5116_v13, 1 }
 0x1a1   : > { %v1111_v21 = vsel %vm1051_vm0, %v5867_v36, %v5774_v16  ;;  %vm890_vm7 = vcmp.ge.s32.totalorder %v5220_v53, 0  ;;  %v1839_v38 = vmul.f32 %v4098_v26, %v4925_v20  ;;  %v2402_v54 = vsel %vm2338_vm1, %v2306_v18, %v2370_v4 }
 0x1a2   : > { %v1567_v58 = vsel %vm1505_vm2, %v5868_v45, %v5773_v9  ;;  %v2244_v22 = vadd.f32 %v2212_v49, %v2144_v15  ;;  %v1175_v33 = vsel %vm890_vm7, %v1111_v21, 0.0  ;;  %v1803_v56 = vadd.f32 %v1771_v41, %v4903_v44  ;;  %3141 = vmatmul.mubr.f32.gmra.mrb[8].mxu0 %v2402_v54 }
 0x1a3   : > { %v1294_v30 = vadd.f32 %v1262_v27, %v1195_v34  ;;  %v2268_v51 = vmul.f32 %v5018_v32, %v2229_v28  ;;  %v1278_v29 = vmul.f32 %v4042_v61, %v5116_v13  ;;  %v2010_v35 = vsel %vm886_vm11, %v1111_v21, 0.0  ;;  %v5869_v28 = vld [vmem:[#allocation24_spill] sm:$0xff] }
 0x1a4   : > { %v2283_v36 = vmul.f32 %v5018_v32, %v2244_v22  ;;  %v1211_v20 = vmul.f32 %v4039_v60, %v1175_v33  ;;  %v1871_v49 = vadd.f32 %v1839_v38, %v1803_v56  ;;  %v2046_v18 = vmul.f32 %v4118_v37, %v2010_v35 }
 0x1a5   : > { %v2307_v4 = vadd.f32 %v5029_v55, %v2268_v51  ;;  %v1668_v44 = vmul.f32 %v4054_v2, %v1567_v58  ;;  %v2114_v27 = vmul.f32 %v4149_v19, %v5116_v13  ;;  %v420_v34 = vadd.s32 88, %v3965_v1 }
 0x1a6   : > { %v2322_v15 = vadd.f32 %v5029_v55, %v2283_v36  ;;  %v1976_v52 = vadd.f32 %v5096_v14, %v1871_v49  ;;  %v2213_v41 = vmul.f32 %v4155_v7, %v1567_v58  ;;  %v5870_v45 = vrot.slane %v5869_v28, 7 }
 0x1a7   : > { %v5871_v38 = vrot.slane %v5068_v5, 7  ;;  %vm2339_vm11 = vcmp.gt.f32.partialorder %v2307_v4, 0.0  ;;  %v2371_v22 = vmul.f32 0.01, %v2307_v4  ;;  %v522_v33 = vand.u32 15, %v420_v34 }
 0x1a8   : > { %v1259_v56 = vmul.f32 %v4042_v61, %v4794_v3  ;;  %vm2354_vm3 = vcmp.gt.f32.partialorder %v2322_v15, 0.0  ;;  %v2386_v51 = vmul.f32 0.01, %v2322_v15  ;;  %v1310_v35 = vadd.f32 %v1278_v29, %v1211_v20 }
 0x1a9   : > { %v1081_v54 = vsel %vm1051_vm0, %v5871_v38, %v5870_v45  ;;  %v2078_v36 = vadd.f32 %v2046_v18, %v1976_v52  ;;  %v5263_v9 = vadd.f32 %v1652_v57, %v1294_v30  ;;  %v2403_v14 = vsel %vm2339_vm11, %v2307_v4, %v2371_v22  ;;  %v5872_v18 = vld [vmem:[#allocation25_spill] sm:$0xff] }
 0x1aa   : > { %v5267_v49 = vsel %vm888_vm12, %v1111_v21, 0.0  ;;  %v1323_v28 = vadd.s32 1, %v522_v33  ;;  %v2418_v16 = vsel %vm2354_vm3, %v2322_v15, %v2386_v51  ;;  %3143 = vmatprep.mubr.f32.mxu0 %v2403_v14  ;;  %v5270_v45 = vmul.f32 %v4106_v31, %v1567_v58 }
 0x1ab   : > { %v2145_v34 = vadd.f32 %v2114_v27, %v2078_v36  ;;  %v5273_v3 = vmul.f32 %v4039_v60, %v1081_v54  ;;  %3165 = vmatmul.mubr.f32.gmra.mrb[8].mxu1 %v2418_v16  ;;  %v1291_v29 = vadd.f32 %v1259_v56, %v4910_v47  ;;  %v436_v57 = vadd.s32 216, %v3965_v1  ;;  %v5309_v36 = vld [vmem:[%s3947_s22 + $0xf0] sm:$0xff] }
 0x1ac   : > { %vm1387_vm5 = vcmp.lt.s32.totalorder %v1323_v28, 16  ;;  %v1112_v30 = vrot.slane %v5198_v6, 7  ;;  %v5278_v21 = vadd.f32 %v1668_v44, %v1310_v35  ;;  %v5873_v4 = vrot.slane %v5872_v18, 1 }
 0x1ad   : > { %v2245_v20 = vadd.f32 %v2213_v41, %v2145_v34  ;;  %v5874_v58 = vrot.slane %v5172_v8, 1  ;;  %v1613_v16 = vsel %vm1387_vm5, %v4920_v59, 0.0  ;;  %v5291_v15 = vmul.f32 %v4095_v25, %v1081_v54 }
 0x1ae   : > { %v1649_v47 = vmul.f32 %v4054_v2, %v1613_v16  ;;  %v1893_v44 = vsel %vm1387_vm5, %v5107_v63, 0.0  ;;  %v634_v52 = vand.u32 15, %v436_v57  ;;  %v1824_v38 = vmul.f32 %v4098_v26, %v4966_v39 }
 0x1af   : > { %v5285_v27 = vsel %vm1505_vm2, %v5874_v58, %v5873_v4  ;;  %v2284_v41 = vmul.f32 %v5018_v32, %v2245_v20  ;;  %v5875_v22 = vrot.slane %v5116_v13, 7  ;;  %v1275_v33 = vmul.f32 %v4042_v61, %v4822_v12 }
 0x1b0   : > { %v1681_v56 = vadd.f32 %v1649_v47, %v1291_v29  ;;  %v2031_v51 = vmul.f32 %v4118_v37, %v1081_v54  ;;  %v2099_v35 = vmul.f32 %v5172_v8, %v4149_v19  ;;  %v1339_v14 = vadd.s32 1, %v634_v52 }
 0x1b1   : > { %v1113_v59 = vsel %vm1051_vm0, %v5875_v22, %v1112_v30  ;;  %v2323_v34 = vadd.f32 %v5029_v55, %v2284_v41  ;;  %v1929_v57 = vmul.f32 %v4106_v31, %v1893_v44  ;;  %v2162_v20 = vsel %vm1387_vm5, %v5285_v27, 0.0 }
 0x1b2   : > { %v1279_v18 = vmul.f32 %v4042_v61, %v5198_v6  ;;  %v1788_v12 = vadd.f32 %v5112_v50, %v1681_v56  ;;  %v1212_v54 = vmul.f32 %v4039_v60, %v1113_v59  ;;  %v1307_v29 = vadd.f32 %v1275_v33, %v4969_v48 }
 0x1b3   : > { %vm1403_vm8 = vcmp.lt.s32.totalorder %v1339_v14, 16  ;;  %vm2355_vm9 = vcmp.gt.f32.partialorder %v2323_v34, 0.0  ;;  %v2387_v4 = vmul.f32 0.01, %v2323_v34  ;;  %v1568_v58 = vrot.slane %v5309_v36, 1 }
 0x1b4   : > { %v1629_v16 = vsel %vm1403_vm8, %v4959_v24, 0.0  ;;  %v1856_v47 = vadd.f32 %v1824_v38, %v1788_v12  ;;  %v2198_v28 = vmul.f32 %v4155_v7, %v2162_v20  ;;  %v1909_v50 = vsel %vm1403_vm8, %v5149_v62, 0.0 }
 0x1b5   : > { %v1665_v44 = vmul.f32 %v4054_v2, %v1629_v16  ;;  %v2419_v52 = vsel %vm2355_vm9, %v2323_v34, %v2387_v4  ;;  %v5328_v60 = vmul.f32 %v4095_v25, %v1113_v59  ;;  %v1840_v48 = vmul.f32 %v4098_v26, %v5011_v40  ;;  %v5877_v4 = vld [vmem:[#allocation26_spill] sm:$0xff] }
 0x1b6   : > { %v1757_v41 = vmul.f32 %v4095_v25, %v5210_v23  ;;  %3167 = vmatprep.mubr.f32.mxu1 %v2419_v52  ;;  %v1961_v24 = vadd.f32 %v1929_v57, %v1856_v47  ;;  %v5334_v38 = vadd.f32 %v1279_v18, %v1212_v54  ;;  %v1825_v33 = vmul.f32 %v4098_v26, %v5068_v5  ;;  %v5363_v52 = vld [vmem:[%s3947_s22 + $0x70] sm:$0xff] }
 0x1b7   : > { %v1697_v22 = vadd.f32 %v1665_v44, %v1307_v29  ;;  %v5876_v56 = vrot.slane %v5198_v6, 1  ;;  %v1945_v20 = vmul.f32 %v4106_v31, %v1909_v50  ;;  %v1996_v23 = vsel %vm872_vm10, %v5877_v4, 0.0 }
 0x1b8   : > { %v1789_v12 = vadd.f32 %v1757_v41, %v5087_v10  ;;  %v2063_v57 = vadd.f32 %v2031_v51, %v1961_v24  ;;  %v1703_v54 = vrot.slane %v5309_v36, 7  ;;  %v2032_v16 = vmul.f32 %v4118_v37, %v1996_v23 }
 0x1b9   : > { %v5341_v34 = vsel %vm1505_vm2, %v5876_v56, %v1568_v58  ;;  %v1804_v18 = vadd.f32 %v5160_v43, %v1697_v22  ;;  %v1773_v10 = vmul.f32 %v4095_v25, %v5267_v49  ;;  %v1841_v11 = vmul.f32 %v4098_v26, %v5116_v13  ;;  %v5368_v49 = vld [vmem:[%s3947_s22 + $0xf8] sm:$0xff] }
 0x1ba   : > { %v2178_v5 = vsel %vm1403_vm8, %v5341_v34, 0.0  ;;  %v1857_v29 = vadd.f32 %v1825_v33, %v1789_v12  ;;  %v2130_v47 = vadd.f32 %v2099_v35, %v2063_v57  ;;  %v2047_v51 = vmul.f32 %v4118_v37, %v1113_v59  ;;  %v5878_v22 = vld [vmem:[#allocation28_spill] sm:$0xff] }
 0x1bb   : > { %v1872_v44 = vadd.f32 %v1840_v48, %v1804_v18  ;;  %v2115_v43 = vmul.f32 %v4149_v19, %v5198_v6  ;;  %v2214_v14 = vmul.f32 %v4155_v7, %v2178_v5  ;;  %v2100_v41 = vmul.f32 %v5363_v52, %v4149_v19 }
 0x1bc   : > { %v1962_v50 = vadd.f32 %v5217_v42, %v1857_v29  ;;  %v1805_v13 = vadd.f32 %v1773_v10, %v5093_v46  ;;  %v2230_v35 = vadd.f32 %v2198_v28, %v2130_v47  ;;  %v1704_v59 = vsel %vm1051_vm0, %v1112_v30, %v1703_v54 }
 0x1bd   : > { %v1977_v48 = vadd.f32 %v1945_v20, %v1872_v44  ;;  %v1877_v24 = vrot.slane %v5368_v49, 1  ;;  %v2199_v33 = vmul.f32 %v4155_v7, %v5878_v22  ;;  %v2012_v12 = vsel %vm888_vm12, %v1704_v59, 0.0 }
 0x1be   : > { %v2064_v42 = vadd.f32 %v2032_v16, %v1962_v50  ;;  %v1873_v56 = vadd.f32 %v1841_v11, %v1805_v13  ;;  %v2269_v46 = vmul.f32 %v5018_v32, %v2230_v35  ;;  %v2048_v20 = vmul.f32 %v4118_v37, %v2012_v12  ;;  %v5879_v13 = vld [vmem:[#allocation23_spill] sm:$0xff] }
 0x1bf   : > { %v2079_v28 = vadd.f32 %v2047_v51, %v1977_v48  ;;  %v422_v23 = vadd.s32 104, %v3965_v1  ;;  %v2116_v18 = vmul.f32 %v4149_v19, %v5309_v36  ;;  %v1261_v5 = vmul.f32 %v4042_v61, %v4966_v39 }
 0x1c0   : > { %v2131_v57 = vadd.f32 %v2100_v41, %v2064_v42  ;;  %v1978_v30 = vadd.f32 %v5270_v45, %v1873_v56  ;;  %v2308_v29 = vadd.f32 %v5029_v55, %v2269_v46  ;;  %v5393_v16 = vsel %vm1505_vm2, %v1568_v58, %v1877_v24 }
 0x1c1   : > { %v2146_v17 = vadd.f32 %v2115_v43, %v2079_v28  ;;  %v536_v10 = vand.u32 15, %v422_v23  ;;  %v1739_v47 = vsel %vm890_vm7, %v1704_v59, 0.0  ;;  %v2215_v44 = vmul.f32 %v4155_v7, %v5393_v16  ;;  %v5880_v23 = vld [vmem:[#allocation32_spill] sm:$0xff] }
 0x1c2   : > { %v2231_v11 = vadd.f32 %v2199_v33, %v2131_v57  ;;  %v2080_v45 = vadd.f32 %v2048_v20, %v1978_v30  ;;  %vm2340_vm10 = vcmp.gt.f32.partialorder %v2308_v29, 0.0  ;;  %v2372_v51 = vmul.f32 0.01, %v2308_v29 }
 0x1c3   : > { %v2246_v39 = vadd.f32 %v2214_v14, %v2146_v17  ;;  %v1325_v50 = vadd.s32 1, %v536_v10  ;;  %v1293_v35 = vadd.f32 %v1261_v5, %v5879_v13  ;;  %v1826_v58 = vmul.f32 %v5172_v8, %v4098_v26  ;;  %v5423_v13 = vld [vmem:[%s3947_s22 + $0x78] sm:$0xff] }
 0x1c4   : > { %v2270_v43 = vmul.f32 %v5018_v32, %v2231_v11  ;;  %v2147_v41 = vadd.f32 %v2116_v18, %v2080_v45  ;;  %v2404_v48 = vsel %vm2340_vm10, %v2308_v29, %v2372_v51  ;;  %v438_v59 = vadd.s32 232, %v3965_v1 }
 0x1c5   : > { %v2285_v42 = vmul.f32 %v5018_v32, %v2246_v39  ;;  %vm1389_vm12 = vcmp.lt.s32.totalorder %v1325_v50, 16  ;;  %3144 = vmatmul.mubr.f32.gmra.mrb[10].mxu0 %v2404_v48  ;;  %v440_v12 = vadd.s32 248, %v3965_v1  ;;  %v2033_v57 = vmul.f32 %v4118_v37, %v5880_v23 }
 0x1c6   : > { %v2309_v33 = vadd.f32 %v5029_v55, %v2270_v43  ;;  %v2247_v56 = vadd.f32 %v2215_v44, %v2147_v41  ;;  %v1615_v14 = vsel %vm1389_vm12, %v5107_v63, 0.0  ;;  %v1895_v20 = vsel %vm1389_vm12, %v5285_v27, 0.0 }
 0x1c7   : > { %v2324_v46 = vadd.f32 %v5029_v55, %v2285_v42  ;;  %v1651_v28 = vmul.f32 %v4054_v2, %v1615_v14  ;;  %v1277_v5 = vmul.f32 %v4042_v61, %v5011_v40  ;;  %v648_v17 = vand.u32 15, %v438_v59  ;;  %v5881_v59 = vld [vmem:[#allocation34_spill] sm:$0xff] }
 0x1c8   : > { %vm2341_vm13 = vcmp.gt.f32.partialorder %v2309_v33, 0.0  ;;  %v2373_v30 = vmul.f32 0.01, %v2309_v33  ;;  %v2286_v18 = vmul.f32 %v5018_v32, %v2247_v56  ;;  %v1931_v45 = vmul.f32 %v4106_v31, %v1895_v20  ;;  %v5882_v56 = vld [vmem:[#allocation30_spill] sm:$0xff] }
 0x1c9   : > { %vm2356_vm15 = vcmp.gt.f32.partialorder %v2324_v46, 0.0  ;;  %v2388_v63 = vmul.f32 0.01, %v2324_v46  ;;  %v1683_v29 = vadd.f32 %v1651_v28, %v1293_v35  ;;  %v662_v44 = vand.u32 15, %v440_v12 }
 0x1ca   : > { %v2405_v10 = vsel %vm2341_vm13, %v2309_v33, %v2373_v30  ;;  %v2325_v11 = vadd.f32 %v5029_v55, %v2286_v18  ;;  %v1341_v43 = vadd.s32 1, %v648_v17  ;;  %v1705_v41 = vrot.slane %v5368_v49, 7  ;;  %v5883_v17 = vld [vmem:[#allocation22_spill] sm:$0xff] }
 0x1cb   : > { %v2420_v51 = vsel %vm2356_vm15, %v2324_v46, %v2388_v63  ;;  %3146 = vmatprep.mubr.f32.mxu0 %v2405_v10  ;;  %v1790_v39 = vadd.f32 %v5291_v15, %v1683_v29  ;;  %v2101_v35 = vmul.f32 %v5423_v13, %v4149_v19  ;;  %v5427_v48 = vadd.s32 1, %v662_v44 }
 0x1cc   : > { %3168 = vmatmul.mubr.f32.gmra.mrb[10].mxu1 %v2420_v51  ;;  %vm2357_vm4 = vcmp.gt.f32.partialorder %v2325_v11, 0.0  ;;  %v2389_v40 = vmul.f32 0.01, %v2325_v11  ;;  %v2164_v33 = vsel %vm1389_vm12, %v5881_v59, 0.0  ;;  %v1309_v14 = vadd.f32 %v1277_v5, %v5882_v56 }
 0x1cd   : > { %v1858_v42 = vadd.f32 %v1826_v58, %v1790_v39  ;;  %vm1405_vm6 = vcmp.lt.s32.totalorder %v1341_v43, 16  ;;  %vm1407_vm1 = vcmp.lt.s32.totalorder %v5427_v48, 16  ;;  %v1706_v46 = vsel %vm1051_vm0, %v1703_v54, %v1705_v41  ;;  %v5884_v39 = vld [vmem:[#allocation27_spill] sm:$0xff] }
 0x1ce   : > { %v2421_v15 = vsel %vm2357_vm4, %v2325_v11, %v2389_v40  ;;  %v1631_v12 = vsel %vm1405_vm6, %v5149_v62, 0.0  ;;  %v1633_v50 = vsel %vm1407_vm1, %v5341_v34, 0.0  ;;  %v1911_v20 = vsel %vm1405_vm6, %v5341_v34, 0.0 }
 0x1cf   : > { %3170 = vmatprep.mubr.f32.mxu1 %v2421_v15  ;;  %v1963_v28 = vadd.f32 %v1931_v45, %v1858_v42  ;;  %v1667_v58 = vmul.f32 %v4054_v2, %v1631_v12  ;;  %v1775_v30 = vmul.f32 %v4095_v25, %v1739_v47  ;;  %v1948_v62 = vmul.f32 %v4106_v31, %v5393_v16 }
 0x1d0   : > { %v2200_v18 = vmul.f32 %v4155_v7, %v2164_v33  ;;  %v1842_v54 = vmul.f32 %v4098_v26, %v5198_v6  ;;  %v5451_v29 = vmul.f32 %v4095_v25, %v1706_v46  ;;  %v1879_v34 = vsel %vm1505_vm2, %v1877_v24, %v5883_v17 }
 0x1d1   : > { %v2065_v5 = vadd.f32 %v2033_v57, %v1963_v28  ;;  %v1699_v63 = vadd.f32 %v1667_v58, %v1309_v14  ;;  %v1669_v47 = vmul.f32 %v4054_v2, %v1633_v50  ;;  %v1947_v10 = vmul.f32 %v4106_v31, %v1911_v20  ;;  %v5885_v14 = vld [vmem:[#allocation20_spill] sm:$0xff] }
 0x1d2   : > { %v2180_v16 = vsel %vm1405_vm6, %v1879_v34, 0.0  ;;  %v1723_v6 = vsel %vm874_vm14, %v5877_v4, 0.0  ;;  %v1827_v44 = vmul.f32 %v5363_v52, %v4098_v26  ;;  %v2049_v24 = vmul.f32 %v4118_v37, %v1706_v46  ;;  %v3343_v46 = vld [vmem:[%s3947_s22 + $0x80] sm:$0xff] }
 0x1d3   : > { %v2132_v57 = vadd.f32 %v2101_v35, %v2065_v5  ;;  %v1806_v11 = vadd.f32 %v5328_v60, %v1699_v63  ;;  %v1759_v45 = vmul.f32 %v4095_v25, %v1723_v6  ;;  %v2117_v51 = vmul.f32 %v4149_v19, %v5368_v49 }
 0x1d4   : > { %v1998_v43 = vsel %vm874_vm14, %v5884_v39, 0.0  ;;  %v1807_v4 = vadd.f32 %v1775_v30, %v5278_v21  ;;  %v1932_v42 = vmul.f32 %v4106_v31, %v5878_v22  ;;  %v2216_v52 = vmul.f32 %v4155_v7, %v2180_v16 }
 0x1d5   : > { %v2232_v40 = vadd.f32 %v2200_v18, %v2132_v57  ;;  %v1874_v35 = vadd.f32 %v1842_v54, %v1806_v11  ;;  %v1791_v60 = vadd.f32 %v1759_v45, %v5263_v9  ;;  %v2034_v33 = vmul.f32 %v4118_v37, %v1998_v43 }
 0x1d6   : > { %v1843_v56 = vmul.f32 %v4098_v26, %v5309_v36  ;;  %v1982_v0 = vsel %vm1051_vm0, %v1705_v41, %v5885_v14  ;;  %v2102_v22 = vmul.f32 %v3343_v46, %v4149_v19  ;;  %v424_v58 = vadd.s32 120, %v3965_v1  ;;  %v5886_v41 = vld [vmem:[#allocation29_spill] sm:$0xff] }
 0x1d7   : > { %v2271_v15 = vmul.f32 %v5018_v32, %v2232_v40  ;;  %v1979_v21 = vadd.f32 %v1947_v10, %v1874_v35  ;;  %v1859_v12 = vadd.f32 %v1827_v44, %v1791_v60  ;;  %v2014_v9 = vsel %vm890_vm7, %v1982_v0, 0.0 }
 0x1d8   : > { %v1875_v28 = vadd.f32 %v1843_v56, %v1807_v4  ;;  %v2050_v50 = vmul.f32 %v4118_v37, %v2014_v9  ;;  %v2201_v18 = vmul.f32 %v4155_v7, %v5886_v41  ;;  %v2118_v5 = vmul.f32 0.0, %v4149_v19  ;;  %v5887_v9 = vld [vmem:[#allocation33_spill] sm:$0xff] }
 0x1d9   : > { %v2310_v36 = vadd.f32 %v5029_v55, %v2271_v15  ;;  %v2081_v20 = vadd.f32 %v2049_v24, %v1979_v21  ;;  %v1964_v30 = vadd.f32 %v1932_v42, %v1859_v12  ;;  %v550_v53 = vand.u32 15, %v424_v58 }
 0x1da   : > { %v1980_v54 = vadd.f32 %v1948_v62, %v1875_v28  ;;  %v1263_v63 = vmul.f32 %v5172_v8, %v4042_v61  ;;  %v1913_v1 = vsel %vm1407_vm1, %v1879_v34, 0.0  ;;  %v2217_v11 = vmul.f32 %v4155_v7, %v5883_v17  ;;  %v5888_v28 = vld [vmem:[#allocation35_spill] sm:$0xff] }
 0x1db   : > { %vm2342_vm0 = vcmp.gt.f32.partialorder %v2310_v36, 0.0  ;;  %v2374_v10 = vmul.f32 0.01, %v2310_v36  ;;  %v2148_v16 = vadd.f32 %v2117_v51, %v2081_v20  ;;  %v2066_v6 = vadd.f32 %v2034_v33, %v1964_v30 }
 0x1dc   : > { %v2082_v57 = vadd.f32 %v2050_v50, %v1980_v54  ;;  %v1327_v45 = vadd.s32 1, %v550_v53  ;;  %v1701_v39 = vadd.f32 %v1669_v47, %v5334_v38  ;;  %v1295_v61 = vadd.f32 %v1263_v63, %v5273_v3  ;;  %v5536_v63 = vld [vmem:[#allocation11] ss:$0 sm:$0xff] }
 0x1dd   : > { %v2406_v44 = vsel %vm2342_vm0, %v2310_v36, %v2374_v10  ;;  %v2248_v62 = vadd.f32 %v2216_v52, %v2148_v16  ;;  %v2133_v24 = vadd.f32 %v2102_v22, %v2066_v6  ;;  %v1844_v4 = vmul.f32 %v4098_v26, %v5368_v49  ;;  %v3344_v36 = vld [vmem:[%s3947_s22 + $0x88] sm:$0xff] }
 0x1de   : > { %3147 = vmatmul.mubr.f32.gmra.mrb[12].mxu0 %v2406_v44  ;;  %v2149_v43 = vadd.f32 %v2118_v5, %v2082_v57  ;;  %vm1391_vm2 = vcmp.lt.s32.totalorder %v1327_v45, 16  ;;  %v1949_v40 = vmul.f32 %v4106_v31, %v1913_v1  ;;  %v1760_v38 = vmul.f32 %v4095_v25, %v5880_v23  ;;  %v5539_v1 = vld [vmem:[#allocation13] ss:$0 sm:$0xff] }
 0x1df   : > { %v2287_v8 = vmul.f32 %v5018_v32, %v2248_v62  ;;  %v2233_v51 = vadd.f32 %v2201_v18, %v2133_v24  ;;  %v1617_v34 = vsel %vm1391_vm2, %v5285_v27, 0.0  ;;  %v1897_v42 = vsel %vm1391_vm2, %v5881_v59, 0.0 }
 0x1e0   : > { %v2249_v35 = vadd.f32 %v2217_v11, %v2149_v43  ;;  %v1653_v60 = vmul.f32 %v4054_v2, %v1617_v34  ;;  %v1808_v27 = vadd.f32 %v5451_v29, %v1701_v39  ;;  %v1828_v33 = vmul.f32 %v5423_v13, %v4098_v26 }
 0x1e1   : > { %v2326_v3 = vadd.f32 %v5029_v55, %v2287_v8  ;;  %v2272_v47 = vmul.f32 %v5018_v32, %v2233_v51  ;;  %v2051_v2 = vmul.f32 %v4118_v37, %v5885_v14  ;;  %v1933_v59 = vmul.f32 %v4106_v31, %v1897_v42 }
 0x1e2   : > { %v2288_v52 = vmul.f32 %v5018_v32, %v2249_v35  ;;  %v1685_v49 = vadd.f32 %v1653_v60, %v1295_v61  ;;  %v1876_v56 = vadd.f32 %v1844_v4, %v1808_v27  ;;  %v2182_v29 = vsel %vm1407_vm1, %v5883_v17, 0.0 }
 0x1e3   : > { %vm2358_vm14 = vcmp.gt.f32.partialorder %v2326_v3, 0.0  ;;  %v2390_v25 = vmul.f32 0.01, %v2326_v3  ;;  %v2311_v23 = vadd.f32 %v5029_v55, %v2272_v47  ;;  %v2035_v46 = vmul.f32 %v4118_v37, %v5887_v9 }
 0x1e4   : > { %v2327_v0 = vadd.f32 %v5029_v55, %v2288_v52  ;;  %v1792_v15 = vadd.f32 %v1760_v38, %v1685_v49  ;;  %v1981_v13 = vadd.f32 %v1949_v40, %v1876_v56  ;;  %v2166_v31 = vsel %vm1391_vm2, %v5888_v28, 0.0 }
 0x1e5   : > { %v2422_v21 = vsel %vm2358_vm14, %v2326_v3, %v2390_v25  ;;  %vm2343_vm7 = vcmp.gt.f32.partialorder %v2311_v23, 0.0  ;;  %v2375_v26 = vmul.f32 0.01, %v2311_v23  ;;  %v2218_v48 = vmul.f32 %v4155_v7, %v2182_v29 }
 0x1e6   : > { %3171 = vmatmul.mubr.f32.gmra.mrb[12].mxu1 %v2422_v21  ;;  %vm2359_vm11 = vcmp.gt.f32.partialorder %v2327_v0, 0.0  ;;  %v2391_v14 = vmul.f32 0.01, %v2327_v0  ;;  %v1860_v12 = vadd.f32 %v1828_v33, %v1792_v15  ;;  %v2083_v50 = vadd.f32 %v2051_v2, %v1981_v13  ;;  %v3130_v6 = vpop.f32.mrb[0].mxu0 }
 0x1e7   : > { %v2407_v22 = vsel %vm2343_vm7, %v2311_v23, %v2375_v26  ;;  %v2103_v20 = vmul.f32 %v3344_v36, %v4149_v19  ;;  %v2202_v18 = vmul.f32 %v4155_v7, %v2166_v31  ;;  %v2674_v19 = vmul.f32 %v3130_v6, %v5536_v63 }
 0x1e8   : > { %3149 = vmatprep.mubr.f32.mxu0 %v2407_v22  ;;  %v2423_v17 = vsel %vm2359_vm11, %v2327_v0, %v2391_v14  ;;  %v1965_v58 = vadd.f32 %v1933_v59, %v1860_v12  ;;  %v2150_v30 = vadd.f32 %v2118_v5, %v2083_v50  ;;  %v2507_v5 = vpop.f32.mrb[1].mxu0 }
 0x1e9   : > { %3173 = vmatprep.mubr.f32.mxu1 %v2423_v17  ;;  %v2673_v7 = vmul.f32 %v5536_v63, %v2507_v5  ;;  %v2713_v44 = vadd.f32 %v5539_v1, %v2674_v19 }
 0x1ea   : > { %v2067_v41 = vadd.f32 %v2035_v46, %v1965_v58  ;;  %v2250_v54 = vadd.f32 %v2218_v48, %v2150_v30 }
 0x1eb   : > { %v2712_v24 = vadd.f32 %v5539_v1, %v2673_v7  ;;  %vm2745_vm8 = vcmp.gt.f32.partialorder %v2713_v44, 0.0 }
 0x1ec   : > { %v2134_v37 = vadd.f32 %v2103_v20, %v2067_v41  ;;  %v2289_v53 = vmul.f32 %v5018_v32, %v2250_v54 }
 0x1ed   : > { %vm2744_vm9 = vcmp.gt.f32.partialorder %v2712_v24, 0.0  ;;  %v2776_v43 = vmul.f32 0.01, %v2712_v24 }
 0x1ee   : > { %v2234_v10 = vadd.f32 %v2202_v18, %v2134_v37  ;;  %v2328_v16 = vadd.f32 %v5029_v55, %v2289_v53  ;;  %v3154_v51 = vpop.f32.mrb[0].mxu1 }
 0x1ef   : > { %v2808_v34 = vsel %vm2744_vm9, %v2712_v24, %v2776_v43  ;;  %v2587_v4 = vpop.f32.mrb[1].mxu1 }
 0x1f0   : > { %v2273_v57 = vmul.f32 %v5018_v32, %v2234_v10  ;;  %vm2360_vm3 = vcmp.gt.f32.partialorder %v2328_v16, 0.0  ;;  %v2392_v11 = vmul.f32 0.01, %v2328_v16  ;;  %v2777_v32 = vmul.f32 0.01, %v2713_v44  ;;  %2840 = vst [vmem:[%s5549_s8] sm:$0xff] %v2808_v34 }
 0x1f1   : > { %v2689_v40 = vmul.f32 %v5536_v63, %v2587_v4 }
 0x1f2   : > { %v2312_v45 = vadd.f32 %v5029_v55, %v2273_v57  ;;  %v2424_v62 = vsel %vm2360_vm3, %v2328_v16, %v2392_v11  ;;  %v2809_v8 = vsel %vm2745_vm8, %v2713_v44, %v2777_v32  ;;  %v2690_v55 = vmul.f32 %v3154_v51, %v5536_v63 }
 0x1f3   : > { %3174 = vmatmul.mubr.f32.gmra.mrb[14].mxu1 %v2424_v62  ;;  %2841 = vst [vmem:[%s5549_s8 + $0x8] sm:$0xff] %v2809_v8  ;;  %v2728_v60 = vadd.f32 %v5539_v1, %v2689_v40 }
 0x1f4   : > { %vm2344_vm5 = vcmp.gt.f32.partialorder %v2312_v45, 0.0  ;;  %v2376_v39 = vmul.f32 0.01, %v2312_v45  ;;  %v2729_v35 = vadd.f32 %v5539_v1, %v2690_v55 }
 0x1f5   : > { %vm2760_vm12 = vcmp.gt.f32.partialorder %v2728_v60, 0.0  ;;  %v2792_v3 = vmul.f32 0.01, %v2728_v60 }
 0x1f6   : > { %v2408_v61 = vsel %vm2344_vm5, %v2312_v45, %v2376_v39  ;;  %vm2761_vm10 = vcmp.gt.f32.partialorder %v2729_v35, 0.0  ;;  %v2793_v38 = vmul.f32 0.01, %v2729_v35 }
 0x1f7   : > { %3150 = vmatmul.mubr.f32.gmra.mrb[14].mxu0 %v2408_v61  ;;  %v2824_v42 = vsel %vm2760_vm12, %v2728_v60, %v2792_v3 }
 0x1f8   : > { %v2825_v47 = vsel %vm2761_vm10, %v2729_v35, %v2793_v38  ;;  %2856 = vst [vmem:[%s5549_s8 + $0x80] sm:$0xff] %v2824_v42 }
 0x1f9   : > { %2857 = vst [vmem:[%s5549_s8 + $0x88] sm:$0xff] %v2825_v47 }
 0x20b   : > { %v3133_v27 = vpop.f32.mrb[2].mxu0 }
 0x20c   : > { %v2676_v52 = vmul.f32 %v3133_v27, %v5536_v63  ;;  %v2517_v49 = vpop.f32.mrb[3].mxu0 }
 0x20d   : > { %v2675_v33 = vmul.f32 %v5536_v63, %v2517_v49 }
 0x20e   : > { %v2715_v2 = vadd.f32 %v5539_v1, %v2676_v52 }
 0x20f   : > { %v2714_v25 = vadd.f32 %v5539_v1, %v2675_v33 }
 0x210   : > { %vm2747_vm13 = vcmp.gt.f32.partialorder %v2715_v2, 0.0  ;;  %v2779_v23 = vmul.f32 0.01, %v2715_v2 }
 0x211   : > { %vm2746_vm15 = vcmp.gt.f32.partialorder %v2714_v25, 0.0  ;;  %v2778_v56 = vmul.f32 0.01, %v2714_v25 }
 0x212   : > { %v2811_v0 = vsel %vm2747_vm13, %v2715_v2, %v2779_v23 }
 0x213   : > { %2843 = vst [vmem:[%s5549_s8 + $0x18] sm:$0xff] %v2811_v0  ;;  %v2810_v15 = vsel %vm2746_vm15, %v2714_v25, %v2778_v56 }
 0x214   : > { %2842 = vst [vmem:[%s5549_s8 + $0x10] sm:$0xff] %v2810_v15 }
 0x215   : > { %v3157_v59 = vpop.f32.mrb[2].mxu1 }
 0x216   : > { %v2692_v29 = vmul.f32 %v3157_v59, %v5536_v63  ;;  %v2597_v21 = vpop.f32.mrb[3].mxu1 }
 0x217   : > { %v2691_v26 = vmul.f32 %v5536_v63, %v2597_v21 }
 0x218   : > { %v2731_v13 = vadd.f32 %v5539_v1, %v2692_v29 }
 0x219   : > { %v2730_v14 = vadd.f32 %v5539_v1, %v2691_v26 }
 0x21a   : > { %vm2763_vm4 = vcmp.gt.f32.partialorder %v2731_v13, 0.0  ;;  %v2795_v12 = vmul.f32 0.01, %v2731_v13 }
 0x21b   : > { %vm2762_vm6 = vcmp.gt.f32.partialorder %v2730_v14, 0.0  ;;  %v2794_v9 = vmul.f32 0.01, %v2730_v14 }
 0x21c   : > { %v2827_v46 = vsel %vm2763_vm4, %v2731_v13, %v2795_v12 }
 0x21d   : > { %2859 = vst [vmem:[%s5549_s8 + $0x98] sm:$0xff] %v2827_v46  ;;  %v2826_v22 = vsel %vm2762_vm6, %v2730_v14, %v2794_v9 }
 0x21e   : > { %2858 = vst [vmem:[%s5549_s8 + $0x90] sm:$0xff] %v2826_v22 }
 0x231   : > { %v3136_v28 = vpop.f32.mrb[4].mxu0 }
 0x232   : > { %v2678_v31 = vmul.f32 %v3136_v28, %v5536_v63  ;;  %v2527_v50 = vpop.f32.mrb[5].mxu0 }
 0x233   : > { %v2677_v48 = vmul.f32 %v5536_v63, %v2527_v50 }
 0x234   : > { %v2717_v17 = vadd.f32 %v5539_v1, %v2678_v31 }
 0x235   : > { %v2716_v58 = vadd.f32 %v5539_v1, %v2677_v48 }
 0x236   : > { %vm2749_vm1 = vcmp.gt.f32.partialorder %v2717_v17, 0.0  ;;  %v2781_v36 = vmul.f32 0.01, %v2717_v17  ;;  %v3160_v20 = vpop.f32.mrb[4].mxu1 }
 0x237   : > { %v2694_v30 = vmul.f32 %v3160_v20, %v5536_v63  ;;  %vm2748_vm0 = vcmp.gt.f32.partialorder %v2716_v58, 0.0  ;;  %v2780_v41 = vmul.f32 0.01, %v2716_v58  ;;  %v2607_v18 = vpop.f32.mrb[5].mxu1 }
 0x238   : > { %v2813_v54 = vsel %vm2749_vm1, %v2717_v17, %v2781_v36  ;;  %v2693_v37 = vmul.f32 %v5536_v63, %v2607_v18 }
 0x239   : > { %2845 = vst [vmem:[%s5549_s8 + $0x28] sm:$0xff] %v2813_v54  ;;  %v2733_v53 = vadd.f32 %v5539_v1, %v2694_v30  ;;  %v2812_v10 = vsel %vm2748_vm0, %v2716_v58, %v2780_v41 }
 0x23a   : > { %2844 = vst [vmem:[%s5549_s8 + $0x20] sm:$0xff] %v2812_v10  ;;  %v2732_v16 = vadd.f32 %v5539_v1, %v2693_v37 }
 0x23b   : > { %vm2765_vm2 = vcmp.gt.f32.partialorder %v2733_v53, 0.0  ;;  %v2797_v6 = vmul.f32 0.01, %v2733_v53 }
 0x23c   : > { %vm2764_vm14 = vcmp.gt.f32.partialorder %v2732_v16, 0.0  ;;  %v2796_v57 = vmul.f32 0.01, %v2732_v16 }
 0x23d   : > { %v2829_v19 = vsel %vm2765_vm2, %v2733_v53, %v2797_v6 }
 0x23e   : > { %2861 = vst [vmem:[%s5549_s8 + $0xa8] sm:$0xff] %v2829_v19  ;;  %v2828_v5 = vsel %vm2764_vm14, %v2732_v16, %v2796_v57 }
 0x23f   : > { %2860 = vst [vmem:[%s5549_s8 + $0xa0] sm:$0xff] %v2828_v5 }
 0x252   : > { %v3139_v11 = vpop.f32.mrb[6].mxu0 }
 0x253   : > { %v2680_v7 = vmul.f32 %v3139_v11, %v5536_v63  ;;  %v2537_v45 = vpop.f32.mrb[7].mxu0 }
 0x254   : > { %v2679_v44 = vmul.f32 %v5536_v63, %v2537_v45 }
 0x255   : > { %v2719_v62 = vadd.f32 %v5539_v1, %v2680_v7 }
 0x256   : > { %v2718_v24 = vadd.f32 %v5539_v1, %v2679_v44 }
 0x257   : > { %vm2751_vm7 = vcmp.gt.f32.partialorder %v2719_v62, 0.0  ;;  %v2783_v39 = vmul.f32 0.01, %v2719_v62 }
 0x258   : > { %vm2750_vm11 = vcmp.gt.f32.partialorder %v2718_v24, 0.0  ;;  %v2782_v32 = vmul.f32 0.01, %v2718_v24 }
 0x259   : > { %v2815_v43 = vsel %vm2751_vm7, %v2719_v62, %v2783_v39 }
 0x25a   : > { %2847 = vst [vmem:[%s5549_s8 + $0x38] sm:$0xff] %v2815_v43  ;;  %v2814_v8 = vsel %vm2750_vm11, %v2718_v24, %v2782_v32 }
 0x25b   : > { %v3163_v61 = vpop.f32.mrb[6].mxu1  ;;  %2846 = vst [vmem:[%s5549_s8 + $0x30] sm:$0xff] %v2814_v8 }
 0x25c   : > { %v2696_v51 = vmul.f32 %v3163_v61, %v5536_v63  ;;  %v2617_v55 = vpop.f32.mrb[7].mxu1 }
 0x25d   : > { %v2695_v34 = vmul.f32 %v5536_v63, %v2617_v55 }
 0x25e   : > { %v2735_v4 = vadd.f32 %v5539_v1, %v2696_v51 }
 0x25f   : > { %v2734_v40 = vadd.f32 %v5539_v1, %v2695_v34 }
 0x260   : > { %vm2767_vm3 = vcmp.gt.f32.partialorder %v2735_v4, 0.0  ;;  %v2799_v35 = vmul.f32 0.01, %v2735_v4 }
 0x261   : > { %vm2766_vm5 = vcmp.gt.f32.partialorder %v2734_v40, 0.0  ;;  %v2798_v60 = vmul.f32 0.01, %v2734_v40 }
 0x262   : > { %v2831_v38 = vsel %vm2767_vm3, %v2735_v4, %v2799_v35 }
 0x263   : > { %2863 = vst [vmem:[%s5549_s8 + $0xb8] sm:$0xff] %v2831_v38  ;;  %v2830_v3 = vsel %vm2766_vm5, %v2734_v40, %v2798_v60 }
 0x264   : > { %2862 = vst [vmem:[%s5549_s8 + $0xb0] sm:$0xff] %v2830_v3 }
 0x275   : > { %v3142_v47 = vpop.f32.mrb[8].mxu0 }
 0x276   : > { %v2682_v42 = vmul.f32 %v3142_v47, %v5536_v63  ;;  %v2547_v27 = vpop.f32.mrb[9].mxu0 }
 0x277   : > { %v2681_v52 = vmul.f32 %v5536_v63, %v2547_v27 }
 0x278   : > { %v2721_v49 = vadd.f32 %v5539_v1, %v2682_v42 }
 0x279   : > { %v2720_v33 = vadd.f32 %v5539_v1, %v2681_v52 }
 0x27a   : > { %vm2753_vm8 = vcmp.gt.f32.partialorder %v2721_v49, 0.0  ;;  %v2785_v2 = vmul.f32 0.01, %v2721_v49 }
 0x27b   : > { %vm2752_vm9 = vcmp.gt.f32.partialorder %v2720_v33, 0.0  ;;  %v2784_v25 = vmul.f32 0.01, %v2720_v33 }
 0x27c   : > { %v2817_v23 = vsel %vm2753_vm8, %v2721_v49, %v2785_v2 }
 0x27d   : > { %2849 = vst [vmem:[%s5549_s8 + $0x48] sm:$0xff] %v2817_v23  ;;  %v2816_v0 = vsel %vm2752_vm9, %v2720_v33, %v2784_v25 }
 0x27e   : > { %v3166_v56 = vpop.f32.mrb[8].mxu1  ;;  %2848 = vst [vmem:[%s5549_s8 + $0x40] sm:$0xff] %v2816_v0 }
 0x27f   : > { %v2698_v15 = vmul.f32 %v3166_v56, %v5536_v63  ;;  %v2627_v59 = vpop.f32.mrb[9].mxu1 }
 0x280   : > { %v2697_v29 = vmul.f32 %v5536_v63, %v2627_v59 }
 0x281   : > { %v2737_v21 = vadd.f32 %v5539_v1, %v2698_v15 }
 0x282   : > { %v2736_v26 = vadd.f32 %v5539_v1, %v2697_v29 }
 0x283   : > { %vm2769_vm10 = vcmp.gt.f32.partialorder %v2737_v21, 0.0  ;;  %v2801_v13 = vmul.f32 0.01, %v2737_v21 }
 0x284   : > { %vm2768_vm12 = vcmp.gt.f32.partialorder %v2736_v26, 0.0  ;;  %v2800_v14 = vmul.f32 0.01, %v2736_v26 }
 0x285   : > { %v2833_v12 = vsel %vm2769_vm10, %v2737_v21, %v2801_v13 }
 0x286   : > { %2865 = vst [vmem:[%s5549_s8 + $0xc8] sm:$0xff] %v2833_v12  ;;  %v2832_v9 = vsel %vm2768_vm12, %v2736_v26, %v2800_v14 }
 0x287   : > { %2864 = vst [vmem:[%s5549_s8 + $0xc0] sm:$0xff] %v2832_v9 }
 0x298   : > { %v3145_v46 = vpop.f32.mrb[10].mxu0 }
 0x299   : > { %v2684_v22 = vmul.f32 %v3145_v46, %v5536_v63  ;;  %v2557_v28 = vpop.f32.mrb[11].mxu0 }
 0x29a   : > { %v2683_v31 = vmul.f32 %v5536_v63, %v2557_v28 }
 0x29b   : > { %v2723_v50 = vadd.f32 %v5539_v1, %v2684_v22 }
 0x29c   : > { %v2722_v48 = vadd.f32 %v5539_v1, %v2683_v31 }
 0x29d   : > { %vm2755_vm13 = vcmp.gt.f32.partialorder %v2723_v50, 0.0  ;;  %v2787_v17 = vmul.f32 0.01, %v2723_v50 }
 0x29e   : > { %vm2754_vm15 = vcmp.gt.f32.partialorder %v2722_v48, 0.0  ;;  %v2786_v36 = vmul.f32 0.01, %v2722_v48 }
 0x29f   : > { %v3169_v58 = vpop.f32.mrb[10].mxu1  ;;  %v2819_v20 = vsel %vm2755_vm13, %v2723_v50, %v2787_v17 }
 0x2a0   : > { %v2700_v30 = vmul.f32 %v3169_v58, %v5536_v63  ;;  %v2637_v41 = vpop.f32.mrb[11].mxu1  ;;  %2851 = vst [vmem:[%s5549_s8 + $0x58] sm:$0xff] %v2819_v20  ;;  %v2818_v18 = vsel %vm2754_vm15, %v2722_v48, %v2786_v36 }
 0x2a1   : > { %v2699_v54 = vmul.f32 %v5536_v63, %v2637_v41  ;;  %2850 = vst [vmem:[%s5549_s8 + $0x50] sm:$0xff] %v2818_v18 }
 0x2a2   : > { %v2739_v37 = vadd.f32 %v5539_v1, %v2700_v30 }
 0x2a3   : > { %v2738_v53 = vadd.f32 %v5539_v1, %v2699_v54 }
 0x2a4   : > { %vm2771_vm4 = vcmp.gt.f32.partialorder %v2739_v37, 0.0  ;;  %v2803_v10 = vmul.f32 0.01, %v2739_v37 }
 0x2a5   : > { %vm2770_vm6 = vcmp.gt.f32.partialorder %v2738_v53, 0.0  ;;  %v2802_v16 = vmul.f32 0.01, %v2738_v53 }
 0x2a6   : > { %v2835_v6 = vsel %vm2771_vm4, %v2739_v37, %v2803_v10 }
 0x2a7   : > { %2867 = vst [vmem:[%s5549_s8 + $0xd8] sm:$0xff] %v2835_v6  ;;  %v2834_v57 = vsel %vm2770_vm6, %v2738_v53, %v2802_v16 }
 0x2a8   : > { %2866 = vst [vmem:[%s5549_s8 + $0xd0] sm:$0xff] %v2834_v57 }
 0x2b1   : > { %v3148_v19 = vpop.f32.mrb[12].mxu0 }
 0x2b2   : > { %v2686_v5 = vmul.f32 %v3148_v19, %v5536_v63  ;;  %v2567_v11 = vpop.f32.mrb[13].mxu0 }
 0x2b3   : > { %v2685_v7 = vmul.f32 %v5536_v63, %v2567_v11 }
 0x2b4   : > { %v2725_v45 = vadd.f32 %v5539_v1, %v2686_v5 }
 0x2b5   : > { %v2724_v44 = vadd.f32 %v5539_v1, %v2685_v7 }
 0x2b6   : > { %vm2757_vm1 = vcmp.gt.f32.partialorder %v2725_v45, 0.0  ;;  %v2789_v62 = vmul.f32 0.01, %v2725_v45 }
 0x2b7   : > { %vm2756_vm0 = vcmp.gt.f32.partialorder %v2724_v44, 0.0  ;;  %v2788_v24 = vmul.f32 0.01, %v2724_v44 }
 0x2b8   : > { %v2821_v39 = vsel %vm2757_vm1, %v2725_v45, %v2789_v62 }
 0x2b9   : > { %2853 = vst [vmem:[%s5549_s8 + $0x68] sm:$0xff] %v2821_v39  ;;  %v3172_v32 = vpop.f32.mrb[12].mxu1  ;;  %v2820_v43 = vsel %vm2756_vm0, %v2724_v44, %v2788_v24 }
 0x2ba   : > { %v2702_v61 = vmul.f32 %v3172_v32, %v5536_v63  ;;  %2852 = vst [vmem:[%s5549_s8 + $0x60] sm:$0xff] %v2820_v43  ;;  %v2647_v8 = vpop.f32.mrb[13].mxu1 }
 0x2bb   : > { %v2701_v51 = vmul.f32 %v5536_v63, %v2647_v8 }
 0x2bc   : > { %v2741_v55 = vadd.f32 %v5539_v1, %v2702_v61 }
 0x2bd   : > { %v2740_v34 = vadd.f32 %v5539_v1, %v2701_v51 }
 0x2be   : > { %vm2773_vm2 = vcmp.gt.f32.partialorder %v2741_v55, 0.0  ;;  %v2805_v4 = vmul.f32 0.01, %v2741_v55 }
 0x2bf   : > { %vm2772_vm14 = vcmp.gt.f32.partialorder %v2740_v34, 0.0  ;;  %v2804_v40 = vmul.f32 0.01, %v2740_v34 }
 0x2c0   : > { %v2837_v35 = vsel %vm2773_vm2, %v2741_v55, %v2805_v4 }
 0x2c1   : > { %2869 = vst [vmem:[%s5549_s8 + $0xe8] sm:$0xff] %v2837_v35  ;;  %v2836_v60 = vsel %vm2772_vm14, %v2740_v34, %v2804_v40 }
 0x2c2   : > { %2868 = vst [vmem:[%s5549_s8 + $0xe0] sm:$0xff] %v2836_v60 }
 0x2c6   : > { %v3175_v38 = vpop.f32.mrb[14].mxu1 }
 0x2c7   : > { %v2704_v3 = vmul.f32 %v3175_v38, %v5536_v63  ;;  %v2657_v47 = vpop.f32.mrb[15].mxu1 }
 0x2c8   : > { %v2703_v42 = vmul.f32 %v5536_v63, %v2657_v47 }
 0x2c9   : > { %v2743_v52 = vadd.f32 %v5539_v1, %v2704_v3 }
 0x2ca   : > { %v3151_v27 = vpop.f32.mrb[14].mxu0  ;;  %v2742_v2 = vadd.f32 %v5539_v1, %v2703_v42 }
 0x2cb   : > { %v2688_v49 = vmul.f32 %v3151_v27, %v5536_v63  ;;  %v2577_v33 = vpop.f32.mrb[15].mxu0  ;;  %vm2775_vm7 = vcmp.gt.f32.partialorder %v2743_v52, 0.0  ;;  %v2807_v25 = vmul.f32 0.01, %v2743_v52 }
 0x2cc   : > { %v2687_v23 = vmul.f32 %v5536_v63, %v2577_v33  ;;  %vm2774_vm11 = vcmp.gt.f32.partialorder %v2742_v2, 0.0  ;;  %v2806_v0 = vmul.f32 0.01, %v2742_v2 }
 0x2cd   : > { %v2727_v56 = vadd.f32 %v5539_v1, %v2688_v49  ;;  %v2839_v15 = vsel %vm2775_vm7, %v2743_v52, %v2807_v25 }
 0x2ce   : > { %v2726_v59 = vadd.f32 %v5539_v1, %v2687_v23  ;;  %2871 = vst [vmem:[%s5549_s8 + $0xf8] sm:$0xff] %v2839_v15  ;;  %v2838_v21 = vsel %vm2774_vm11, %v2742_v2, %v2806_v0 }
 0x2cf   : > { %vm2759_vm3 = vcmp.gt.f32.partialorder %v2727_v56, 0.0  ;;  %v2791_v29 = vmul.f32 0.01, %v2727_v56  ;;  %2870 = vst [vmem:[%s5549_s8 + $0xf0] sm:$0xff] %v2838_v21 }
 0x2d0   : > { %vm2758_vm5 = vcmp.gt.f32.partialorder %v2726_v59, 0.0  ;;  %v2790_v26 = vmul.f32 0.01, %v2726_v59 }
 0x2d1   : > { %v2823_v63 = vsel %vm2759_vm3, %v2727_v56, %v2791_v29 }
 0x2d2   : > { %2855 = vst [vmem:[%s5549_s8 + $0x78] sm:$0xff] %v2823_v63  ;;  %v2822_v1 = vsel %vm2758_vm5, %v2726_v59, %v2790_v26 }
 0x2d3   : > { %2854 = vst [vmem:[%s5549_s8 + $0x70] sm:$0xff] %v2822_v1 }
 0x2d4   : > { %3556 = shalt.err (!%p3553_p8)
}
 0x2d5   : > { %s3557_s19 = scalar_lea.hbm %s5646_s21, 4096  ;;  %s3561_s8 = scalar_lea.hbm %s5701_s7, 8192 }
 0x2d6   : > { %p3558_p4 = scmp.ne.s32.totalorder %s5646_s21, %s3557_s19  ;;  %p3562_p0 = scmp.lt.u32.totalorder %s5646_s21, %s5701_s7 }
 0x2d7   : > { %p3563_p5 = scmp.lt.u32.totalorder %s3561_s8, %s3557_s19  ;;  %p3565_p6 = scmp.lt.u32.totalorder %s3557_s19, %s5646_s21 }
 0x2d8   : > { %p3559_p10 = pnand %p3558_p4, %p5889_p9 }
 0x2d9   : > { %p3564_p7 = por %p3563_p5, %p3562_p0 }
 0x2da   : > { %p3560_p11 = pneg %p3559_p10 }
 0x2db   : > { %p3566_p12 = por %p3565_p6, %p3564_p7 }
 0x2dd   : > { %p3567_p13 = pnand %p3566_p12, %p3560_p11 }
 0x2df   : > { %3570 = shalt.err (!%p3567_p13)
}
 0x2e0   : > { %s3636_s20 = smov 128   ;;  %s3637_s17 = smov 8  }
 0x2e1   : > { %3250 = dma.vmem_to_hbm [thread:$0]  (%p5889_p9), %s5648_s10, 4096, %s5646_s21, %s2873_s30, %s3636_s20, %s3636_s20, %s3637_s17  }
 0x2e2 PF: > { %s2901_s9 = sand.u32 1, %s3609_s24   ;;  %p5890_p1 = scmp.ne.s32.totalorder %s5782_s16, 0 }
 0x2e3   : > { %p5891_p3 = scmp.ge.s32.totalorder %s3621_s27, 2  ;;  %s2902_s13 = scalar_lea.sflag [#allocation4], %s2901_s9 }
 0x2e5   : > { %p3276_p2 = pnand %p5891_p3, %p5890_p1 }
 0x2e7   : > { %3604 = dma.done.wait (!%p3276_p2), %s2902_s13, 4096  }
 0x2e8   : > { %3606 = vsyncadd (!%p3276_p2), %s2902_s13, 4294963200  ;;  %p23_p8 = scmp.ge.s32.totalorder %s3859_s11, 4   ;;  %s5892_s24 = smov %s3613_s25 }
 0x2e9   : > { %s5893_s25 = smov %s3617_s26  ;;  %s5894_s26 = smov %s3870_s28 }
 0x2ea   : > { %s5895_s27 = smov %s3859_s11  ;;  %25 = sbr.rel (!%p23_p8) target bundleno = 8 (0x8), region = 117 }
 0x2f1   :  { %2907 = vsyncpa [#allocation3], 1 }
 0x2f2   :  { %2909 = vsyncpa [#allocation3 + $0x1], 1 }
 0x2f3   :  { %2910 = vsyncpa [#allocation6], 1 }
 0x2f4   :  { %2911 = vsyncpa [#allocation9], 1 }
 0x2f5   :  { %2912 = vsyncpa [#allocation12], 1 }
 0x2f6   :  { %2913 = vsyncpa [#allocation4], 1 }
 0x2f7   :  { %2915 = vsyncpa [#allocation4 + $0x1], 1 }

</bundles_post_ra>
